<compile_context>
chip_gen: v5e
topology: v5e:2x2
jax: 0.10.0
libtpu: 0.0.40
codegen_flags: <defaults>
</compile_context>

<pallas_src>
import functools
import math

import jax
import jax.numpy as jnp
from jax import lax
from jax.experimental import pallas as pl
from jax.experimental.pallas import tpu as pltpu


VMEM_LIMIT_BYTES = 32 * 1024 * 1024   # explicit budget; safe on v5e/v6e/v7x (<=64 MiB)
# Set to jnp.bfloat16 on v6e/v7x for 2x MXU throughput (accumulation stays f32 via
# preferred_element_type; LayerNorm / softplus math stays f32).  Keep None on v5e.
COMPUTE_DTYPE = None


def _cdiv(a, b):
    return -(-a // b)


def _round_up(a, b):
    return b * _cdiv(a, b)


# ----------------------------- in-kernel helpers -----------------------------

def _relu(x):
    return jnp.maximum(x, 0.0)


def _softplus(x):
    # torch.nn.Softplus(beta=1, threshold=20)
    return jnp.where(x > 20.0, x, jnp.log1p(jnp.exp(jnp.minimum(x, 20.0))))


def _mm(a, w, compute_dtype):
    if compute_dtype is not None:
        a = a.astype(compute_dtype)
        w = w.astype(compute_dtype)
    return jnp.dot(a, w, preferred_element_type=jnp.float32)


def _mlp_chain(h, wbs, acts, compute_dtype):
    for (w, b), act in zip(wbs, acts):
        h = _mm(h, w, compute_dtype) + b
        if act is not None:
            h = act(h)
    return h


def _layernorm(h, g, b, eps=1e-5):
    h = h.astype(jnp.float32)
    mu = jnp.mean(h, axis=-1, keepdims=True)
    var = jnp.mean(jnp.square(h - mu), axis=-1, keepdims=True)
    return (h - mu) * lax.rsqrt(var + eps) * g + b


# ------------------------ row-tiled fused MLP (+LN) kernel ---------------------

def mlp_rows_pallas(x, layers, acts, *, layernorm=None, row_tile=128,
                    compute_dtype=COMPUTE_DTYPE, vmem_limit=VMEM_LIMIT_BYTES):
    """Fused MLP (+ optional final LayerNorm) over a row-tiled "parallel" grid.

    layers: list of (w [din, dout], b [1, dout]); acts: per-layer activation or None.
    """
    R, Din = x.shape
    Dout = layers[-1][0].shape[1]
    nlayers = len(layers)
    has_ln = layernorm is not None

    Rp = _round_up(R, row_tile)
    xp = jnp.pad(x, ((0, Rp - R), (0, 0))) if Rp != R else x

    def kernel(*refs):
        x_ref = refs[0]
        wrefs = refs[1:1 + 2 * nlayers]
        idx = 1 + 2 * nlayers
        if has_ln:
            g_ref, beta_ref = refs[idx], refs[idx + 1]
            idx += 2
        o_ref = refs[idx]
        wbs = [(wrefs[2 * i][...], wrefs[2 * i + 1][...]) for i in range(nlayers)]
        h = _mlp_chain(x_ref[...].astype(jnp.float32), wbs, acts, compute_dtype)
        if has_ln:
            h = _layernorm(h, g_ref[...], beta_ref[...])
        o_ref[...] = h.astype(o_ref.dtype)

    def _full(shape):
        return pl.BlockSpec(shape, lambda i: (0,) * len(shape))

    args = [xp]
    in_specs = [pl.BlockSpec((row_tile, Din), lambda i: (i, 0))]
    for w, b in layers:
        args += [w, b]
        in_specs += [_full(w.shape), _full(b.shape)]
    if has_ln:
        args += [layernorm[0], layernorm[1]]
        in_specs += [_full(layernorm[0].shape), _full(layernorm[1].shape)]

    out = pl.pallas_call(
        kernel,
        out_shape=jax.ShapeDtypeStruct((Rp, Dout), jnp.float32),
        grid=(Rp // row_tile,),
        in_specs=in_specs,
        out_specs=pl.BlockSpec((row_tile, Dout), lambda i: (i, 0)),
        compiler_params=pltpu.CompilerParams(
            dimension_semantics=("parallel",),
            vmem_limit_bytes=vmem_limit),
    )(*args)
    return out[:R]


# ------------------- fused InteractionNetwork step (edge + node) ----------------

def interaction_step_pallas(x, e, recv, send, sp, *, edge_tile=256,
                            compute_dtype=COMPUTE_DTYPE, vmem_limit=VMEM_LIMIT_BYTES):
    """One fused GNS InteractionNetwork step: edge update + sum agg + node update.

    x:    [Np, L] padded node latents (rows >= number of real nodes).
    e:    [Ep, L] padded edge latents (Ep % edge_tile == 0).
    recv/send: [Ep] int32; padded edges point at a padded node row, so their
               messages never reach real nodes.
    Returns (new_x [Np, L], new_e [Ep, L]), both with residual connections added.
    """
    Np, L = x.shape
    Ep = e.shape[0]
    assert Ep % edge_tile == 0
    num_tiles = Ep // edge_tile
    H = sp["edge_w_recv"].shape[1]

    edge_hidden = sp["edge_hidden"]
    node_hidden = sp["node_hidden"]
    n_eh, n_nh = len(edge_hidden), len(node_hidden)
    ew_last, eb_last = sp["edge_last"]
    nw_last, nb_last = sp["node_last"]
    eg, ebeta = sp["edge_ln"]
    ng, nbeta = sp["node_ln"]

    def kernel(recv_ref, send_ref, x_ref, e_ref,
               w_recv_ref, w_send_ref, w_e_ref, b1e_ref, *rest):
        i = 0
        eh_refs = rest[i:i + 2 * n_eh]; i += 2 * n_eh
        ew_last_ref, eb_last_ref = rest[i:i + 2]; i += 2
        eg_ref, ebeta_ref = rest[i:i + 2]; i += 2
        w_agg_ref, w_x_ref, b1n_ref = rest[i:i + 3]; i += 3
        nh_refs = rest[i:i + 2 * n_nh]; i += 2 * n_nh
        nw_last_ref, nb_last_ref = rest[i:i + 2]; i += 2
        ng_ref, nbeta_ref = rest[i:i + 2]; i += 2
        new_e_ref, new_x_ref = rest[i:i + 2]; i += 2
        pr_sc, ps_sc, agg_sc, hbuf_sc, msg_sc = rest[i:i + 5]

        t = pl.program_id(0)
        nt = pl.num_programs(0)

        # Per-node projections of the split first edge-MLP layer (x@W_recv, x@W_send)
        # computed once and kept resident in VMEM scratch; zero the aggregator.
        @pl.when(t == 0)
        def _init():
            xv = x_ref[...].astype(jnp.float32)
            pr_sc[...] = _mm(xv, w_recv_ref[...], compute_dtype)
            ps_sc[...] = _mm(xv, w_send_ref[...], compute_dtype)
            agg_sc[...] = jnp.zeros_like(agg_sc)

        # ---- edge update for this edge tile ----
        ev = e_ref[...].astype(jnp.float32)
        # edge-feature part of the first layer + bias (vectorized over the tile)
        hbuf_sc[...] = _mm(ev, w_e_ref[...], compute_dtype) + b1e_ref[...]

        base = t * edge_tile

        def gather_body(k, carry):
            r = recv_ref[base + k]
            s = send_ref[base + k]
            hbuf_sc[pl.ds(k, 1), :] = (hbuf_sc[pl.ds(k, 1), :]
                                       + pr_sc[pl.ds(r, 1), :]
                                       + ps_sc[pl.ds(s, 1), :])
            return carry

        lax.fori_loop(0, edge_tile, gather_body, 0)

        h = _relu(hbuf_sc[...])
        for j in range(n_eh):
            h = _relu(_mm(h, eh_refs[2 * j][...], compute_dtype) + eh_refs[2 * j + 1][...])
        h = _mm(h, ew_last_ref[...], compute_dtype) + eb_last_ref[...]
        msg = _layernorm(h, eg_ref[...], ebeta_ref[...])
        msg_sc[...] = msg
        new_e_ref[...] = (ev + msg).astype(new_e_ref.dtype)        # edge residual

        # ---- scatter-add messages into the per-receiver accumulator (segment sum) ----
        def scatter_body(k, carry):
            r = recv_ref[base + k]
            agg_sc[pl.ds(r, 1), :] = agg_sc[pl.ds(r, 1), :] + msg_sc[pl.ds(k, 1), :]
            return carry

        lax.fori_loop(0, edge_tile, scatter_body, 0)

        # ---- node update after every edge tile has been aggregated ----
        @pl.when(t == nt - 1)
        def _node_update():
            xv = x_ref[...].astype(jnp.float32)
            hn = _relu(_mm(agg_sc[...], w_agg_ref[...], compute_dtype)
                       + _mm(xv, w_x_ref[...], compute_dtype)
                       + b1n_ref[...])
            for j in range(n_nh):
                hn = _relu(_mm(hn, nh_refs[2 * j][...], compute_dtype)
                           + nh_refs[2 * j + 1][...])
            hn = _mm(hn, nw_last_ref[...], compute_dtype) + nb_last_ref[...]
            hn = _layernorm(hn, ng_ref[...], nbeta_ref[...])
            new_x_ref[...] = (xv + hn).astype(new_x_ref.dtype)     # node residual

    def _full(shape):
        return pl.BlockSpec(shape, lambda t, *_: (0,) * len(shape))

    tensor_args = [x, e, sp["edge_w_recv"], sp["edge_w_send"], sp["edge_w_e"], sp["edge_b1"]]
    in_specs = [pl.BlockSpec((Np, L), lambda t, *_: (0, 0)),          # x resident
                pl.BlockSpec((edge_tile, L), lambda t, *_: (t, 0)),   # e streamed
                _full(sp["edge_w_recv"].shape), _full(sp["edge_w_send"].shape),
                _full(sp["edge_w_e"].shape), _full(sp["edge_b1"].shape)]
    for w, b in edge_hidden:
        tensor_args += [w, b]
        in_specs += [_full(w.shape), _full(b.shape)]
    for a in (ew_last, eb_last, eg, ebeta,
              sp["node_w_agg"], sp["node_w_x"], sp["node_b1"]):
        tensor_args.append(a)
        in_specs.append(_full(a.shape))
    for w, b in node_hidden:
        tensor_args += [w, b]
        in_specs += [_full(w.shape), _full(b.shape)]
    for a in (nw_last, nb_last, ng, nbeta):
        tensor_args.append(a)
        in_specs.append(_full(a.shape))

    new_e, new_x = pl.pallas_call(
        kernel,
        out_shape=(jax.ShapeDtypeStruct((Ep, L), jnp.float32),
                   jax.ShapeDtypeStruct((Np, L), jnp.float32)),
        grid_spec=pltpu.PrefetchScalarGridSpec(
            num_scalar_prefetch=2,                 # receivers, senders -> SMEM
            grid=(num_tiles,),
            in_specs=in_specs,
            out_specs=(pl.BlockSpec((edge_tile, L), lambda t, *_: (t, 0)),
                       pl.BlockSpec((Np, L), lambda t, *_: (0, 0))),
            scratch_shapes=[pltpu.VMEM((Np, H), jnp.float32),         # x @ W_recv
                            pltpu.VMEM((Np, H), jnp.float32),         # x @ W_send
                            pltpu.VMEM((Np, L), jnp.float32),         # agg accumulator
                            pltpu.VMEM((edge_tile, H), jnp.float32),  # first-layer buf
                            pltpu.VMEM((edge_tile, L), jnp.float32)]),  # message buf
        compiler_params=pltpu.CompilerParams(
            dimension_semantics=("arbitrary",),    # sequential: agg/new_x accumulate
            vmem_limit_bytes=vmem_limit),
    )(recv, send, *tensor_args)
    return new_x, new_e


# --------------------------------- parameters ---------------------------------

def build_params(key, cfg):
    """PyTorch-Linear-style init (U(+/- 1/sqrt(fan_in))).  The first edge/node MLP
    layers are stored pre-split (recv/send/edge and agg/x parts) so the kernels never
    build a concatenated [*, 3L] / [*, 2L] tensor."""
    assert cfg["nmlp_layers"] >= 1
    cnt = [0]

    def nk():
        cnt[0] += 1
        return jax.random.fold_in(key, cnt[0])

    def linear(fi, fo, fan_in=None):
        bound = 1.0 / math.sqrt(fi if fan_in is None else fan_in)
        w = jax.random.uniform(nk(), (fi, fo), jnp.float32, -bound, bound)
        b = jax.random.uniform(nk(), (1, fo), jnp.float32, -bound, bound)
        return w, b

    def mlp(dims):
        return [linear(dims[i], dims[i + 1]) for i in range(len(dims) - 1)]

    def ln(d):
        return (jnp.ones((1, d), jnp.float32), jnp.zeros((1, d), jnp.float32))

    hid = cfg["hidden_emb_size"]
    lat = cfg["edge_emb_size"]          # latent_dim
    nm = cfg["nmlp_layers"]

    processor = []
    for _ in range(cfg["message_passing_steps"]):
        # edge MLP [3*lat] + [hid]*nm + [lat]; first layer split into recv/send/edge parts
        e_w_recv, _ = linear(lat, hid, fan_in=3 * lat)
        e_w_send, _ = linear(lat, hid, fan_in=3 * lat)
        e_w_e, e_b1 = linear(lat, hid, fan_in=3 * lat)
        e_rest = mlp([hid] * nm + [lat])
        # node MLP [2*lat] + [hid]*nm + [lat]; first layer split into agg/x parts
        n_w_agg, _ = linear(lat, hid, fan_in=2 * lat)
        n_w_x, n_b1 = linear(lat, hid, fan_in=2 * lat)
        n_rest = mlp([hid] * nm + [lat])
        processor.append({
            "edge_w_recv": e_w_recv, "edge_w_send": e_w_send,
            "edge_w_e": e_w_e, "edge_b1": e_b1,
            "edge_hidden": e_rest[:-1], "edge_last": e_rest[-1], "edge_ln": ln(lat),
            "node_w_agg": n_w_agg, "node_w_x": n_w_x, "node_b1": n_b1,
            "node_hidden": n_rest[:-1], "node_last": n_rest[-1], "node_ln": ln(lat),
        })

    return {
        "node_enc": mlp([cfg["in_node_feats"]] + [hid] * nm + [lat]),
        "node_enc_ln": ln(lat),
        "edge_enc": mlp([cfg["in_edge_feats"]] + [hid] * nm + [lat]),
        "edge_enc_ln": ln(lat),
        "processor": processor,
        "decoder": mlp([lat] + [hid] * nm + [cfg["node_emb_size"]]),
        "mlp1": mlp([cfg["node_emb_size"]] + [hid] * cfg["MLP1_layers"]
                    + [cfg["MLP1_F_out_dim"]]),
        "mlp2": mlp([cfg["in_type_ohe_size"], 10, 5, 1]),
    }


def _mlp2_gamma_table(mlp2_params):
    """MLP2 is only ever applied to one-hot type vectors, so its output is one of
    `in_type_ohe_size` precomputable values: evaluate it once on the identity
    (Softplus after every layer, including the last). Exact for one-hot inputs."""
    t = jnp.eye(mlp2_params[0][0].shape[0], dtype=jnp.float32)
    for w, b in mlp2_params:
        t = _softplus(jnp.dot(t, w) + b)
    return t                                   # [num_types, 1]


# --------------------------------- FGN forward ---------------------------------

def fgn_forward(params, node_features, edge_index, edge_features, node_type,
                *, node_row_tile=128, edge_tile=256, compute_dtype=COMPUTE_DTYPE):
    """Returns (force [N, MLP1_F_out_dim], gamma [N, 1])."""
    N = node_features.shape[0]
    E = edge_features.shape[0]
    senders = edge_index[0].astype(jnp.int32)      # x_j (source)
    receivers = edge_index[1].astype(jnp.int32)    # x_i (target); aggregation index

    # --- Encoders: fused MLP + LayerNorm, row-tiled ("parallel") ---
    n_enc = params["node_enc"]
    e_enc = params["edge_enc"]
    x = mlp_rows_pallas(node_features, n_enc,
                        acts=[_relu] * (len(n_enc) - 1) + [None],
                        layernorm=params["node_enc_ln"],
                        row_tile=node_row_tile, compute_dtype=compute_dtype)
    e = mlp_rows_pallas(edge_features, e_enc,
                        acts=[_relu] * (len(e_enc) - 1) + [None],
                        layernorm=params["edge_enc_ln"],
                        row_tile=node_row_tile, compute_dtype=compute_dtype)

    # --- Pad the graph: padded edges point at a padded (dummy) node row, so they
    #     never contribute to real nodes; padded rows are sliced away at the end. ---
    Np = _round_up(N + 1, 8)
    Ep = _round_up(E, edge_tile)
    x_p = jnp.pad(x, ((0, Np - N), (0, 0)))
    e_p = jnp.pad(e, ((0, Ep - E), (0, 0)))
    recv_p = jnp.pad(receivers, (0, Ep - E), constant_values=N)
    send_p = jnp.pad(senders, (0, Ep - E), constant_values=N)

    # --- Processor: message passing with residuals, one fused kernel per step ---
    # TODO(synk): stack per-step weights and add an "arbitrary" step grid axis so the
    # whole processor loop becomes a single pallas_call.
    for step in params["processor"]:
        x_p, e_p = interaction_step_pallas(x_p, e_p, recv_p, send_p, step,
                                           edge_tile=edge_tile,
                                           compute_dtype=compute_dtype)

    # --- Decoder + MLP1 fused into one row-tiled kernel; the 3-wide final layer is
    #     zero-padded to 128 lanes so stores stay lane-dense, sliced back here. ---
    dec = params["decoder"]
    mlp1 = params["mlp1"]
    w_last, b_last = mlp1[-1]
    f_out = w_last.shape[1]
    lane_pad = _round_up(max(f_out, 1), 128)
    head_layers = list(dec) + list(mlp1[:-1]) + [
        (jnp.pad(w_last, ((0, 0), (0, lane_pad - f_out))),
         jnp.pad(b_last, ((0, 0), (0, lane_pad - f_out))))]
    head_acts = ([_relu] * (len(dec) - 1) + [None]
                 + [_softplus] * (len(mlp1) - 1) + [None])
    force_padded = mlp_rows_pallas(x_p, head_layers, acts=head_acts,
                                   row_tile=node_row_tile,
                                   compute_dtype=compute_dtype)
    force = force_padded[:N, :f_out]

    # --- Gamma head: MLP2 over one-hot types == exact lookup table (tiny, XLA). ---
    gamma_table = _mlp2_gamma_table(params["mlp2"])      # [num_types, 1]
    gamma = jnp.dot(node_type, gamma_table)              # exact for one-hot node_type
    return force, gamma


# ------------------------------------ main ------------------------------------

if __name__ == "__main__":
    cfg = dict(
        in_edge_feats=8,
        in_node_feats=16,
        in_type_ohe_size=4,
        edge_emb_size=32,     # latent_dim
        node_emb_size=16,
        hidden_emb_size=32,
        nmlp_layers=2,
        MLP1_layers=2,
        MLP1_F_out_dim=3,
        message_passing_steps=2,
    )
    N, E = 12, 24

    root = jax.random.PRNGKey(0)
    k_nodes, k_edges, k_idx, k_type, k_params = jax.random.split(root, 5)

    node_features = jax.random.normal(k_nodes, (N, cfg["in_node_feats"]), jnp.float32)
    edge_features = jax.random.normal(k_edges, (E, cfg["in_edge_feats"]), jnp.float32)
    edge_index = jax.random.randint(k_idx, (2, E), 0, N, dtype=jnp.int32)
    node_type = jax.nn.one_hot(
        jax.random.randint(k_type, (N,), 0, cfg["in_type_ohe_size"]),
        cfg["in_type_ohe_size"], dtype=jnp.float32)

    params = build_params(k_params, cfg)

    # Small tiles so the tiny demo graph still exercises multi-tile grids and the
    # cross-tile aggregation path; production sizes use the 128/256 defaults.
    fwd = jax.jit(functools.partial(fgn_forward, node_row_tile=8, edge_tile=8))
    force, gamma = fwd(params, node_features, edge_index, edge_features, node_type)
    force = jax.block_until_ready(force)
    gamma = jax.block_until_ready(gamma)

    assert force.shape == (N, cfg["MLP1_F_out_dim"]) and force.dtype == jnp.float32
    assert gamma.shape == (N, 1) and gamma.dtype == jnp.float32
    assert bool(jnp.all(jnp.isfinite(force))) and bool(jnp.all(jnp.isfinite(gamma)))
    assert bool(jnp.all(gamma >= 0.0))   # softplus output

    print("KERNEL_OK")
</pallas_src>

<mosaic_0001>
module attributes {stable_mosaic.version = 11 : i64} {
  func.func @kernel(%arg0: i32, %arg1: memref<8x16xf32, #tpu.memory_space<vmem>>, %arg2: memref<16x32xf32, #tpu.memory_space<vmem>>, %arg3: memref<1x32xf32, #tpu.memory_space<vmem>>, %arg4: memref<32x32xf32, #tpu.memory_space<vmem>>, %arg5: memref<1x32xf32, #tpu.memory_space<vmem>>, %arg6: memref<32x32xf32, #tpu.memory_space<vmem>>, %arg7: memref<1x32xf32, #tpu.memory_space<vmem>>, %arg8: memref<1x32xf32, #tpu.memory_space<vmem>>, %arg9: memref<1x32xf32, #tpu.memory_space<vmem>>, %arg10: memref<8x32xf32, #tpu.memory_space<vmem>>) attributes {dimension_semantics = [#tpu.dimension_semantics<parallel>], iteration_bounds = array<i64: 2>, scalar_prefetch = 0 : i64, scratch_operands = 0 : i64, tpu.core_type = #tpu.core_type<tc>, window_params = [{transform_indices = @transform_0, window_bounds = array<i64: 8, 16>}, {pipeline_mode = #tpu.pipeline_mode<synchronous>, transform_indices = @transform_1, window_bounds = array<i64: 16, 32>}, {pipeline_mode = #tpu.pipeline_mode<synchronous>, transform_indices = @transform_2, window_bounds = array<i64: 1, 32>}, {pipeline_mode = #tpu.pipeline_mode<synchronous>, transform_indices = @transform_3, window_bounds = array<i64: 32, 32>}, {pipeline_mode = #tpu.pipeline_mode<synchronous>, transform_indices = @transform_4, window_bounds = array<i64: 1, 32>}, {pipeline_mode = #tpu.pipeline_mode<synchronous>, transform_indices = @transform_5, window_bounds = array<i64: 32, 32>}, {pipeline_mode = #tpu.pipeline_mode<synchronous>, transform_indices = @transform_6, window_bounds = array<i64: 1, 32>}, {pipeline_mode = #tpu.pipeline_mode<synchronous>, transform_indices = @transform_7, window_bounds = array<i64: 1, 32>}, {pipeline_mode = #tpu.pipeline_mode<synchronous>, transform_indices = @transform_8, window_bounds = array<i64: 1, 32>}, {transform_indices = @transform_9, window_bounds = array<i64: 8, 32>}]} {
    %c0 = arith.constant 0 : index
    %c0_0 = arith.constant 0 : index
    %0 = vector.load %arg2[%c0, %c0_0] : memref<16x32xf32, #tpu.memory_space<vmem>>, vector<16x32xf32>
    %c0_1 = arith.constant 0 : index
    %c0_2 = arith.constant 0 : index
    %1 = vector.load %arg3[%c0_1, %c0_2] : memref<1x32xf32, #tpu.memory_space<vmem>>, vector<1x32xf32>
    %c0_3 = arith.constant 0 : index
    %c0_4 = arith.constant 0 : index
    %2 = vector.load %arg4[%c0_3, %c0_4] : memref<32x32xf32, #tpu.memory_space<vmem>>, vector<32x32xf32>
    %c0_5 = arith.constant 0 : index
    %c0_6 = arith.constant 0 : index
    %3 = vector.load %arg5[%c0_5, %c0_6] : memref<1x32xf32, #tpu.memory_space<vmem>>, vector<1x32xf32>
    %c0_7 = arith.constant 0 : index
    %c0_8 = arith.constant 0 : index
    %4 = vector.load %arg6[%c0_7, %c0_8] : memref<32x32xf32, #tpu.memory_space<vmem>>, vector<32x32xf32>
    %c0_9 = arith.constant 0 : index
    %c0_10 = arith.constant 0 : index
    %5 = vector.load %arg7[%c0_9, %c0_10] : memref<1x32xf32, #tpu.memory_space<vmem>>, vector<1x32xf32>
    %c0_11 = arith.constant 0 : index
    %c0_12 = arith.constant 0 : index
    %6 = vector.load %arg1[%c0_11, %c0_12] : memref<8x16xf32, #tpu.memory_space<vmem>>, vector<8x16xf32>
    %cst = arith.constant dense<0.000000e+00> : vector<8x32xf32>
    %7 = tpu.matmul %6, %0, %cst {dimension_numbers = #tpu.dot_dimension_numbers<[1], [0], [0], [1], [0, 0, 1, 1], [], []>} : vector<8x16xf32>, vector<16x32xf32>, vector<8x32xf32> -> vector<8x32xf32>
    %8 = vector.broadcast %1 : vector<1x32xf32> to vector<8x32xf32>
    %9 = arith.addf %7, %8 : vector<8x32xf32>
    %cst_13 = arith.constant 0.000000e+00 : f32
    %10 = vector.broadcast %cst_13 : f32 to vector<8x32xf32>
    %11 = arith.maximumf %9, %10 : vector<8x32xf32>
    %cst_14 = arith.constant dense<0.000000e+00> : vector<8x32xf32>
    %12 = tpu.matmul %11, %2, %cst_14 {dimension_numbers = #tpu.dot_dimension_numbers<[1], [0], [0], [1], [0, 0, 1, 1], [], []>} : vector<8x32xf32>, vector<32x32xf32>, vector<8x32xf32> -> vector<8x32xf32>
    %13 = vector.broadcast %3 : vector<1x32xf32> to vector<8x32xf32>
    %14 = arith.addf %12, %13 : vector<8x32xf32>
    %cst_15 = arith.constant 0.000000e+00 : f32
    %15 = vector.broadcast %cst_15 : f32 to vector<8x32xf32>
    %16 = arith.maximumf %14, %15 : vector<8x32xf32>
    %cst_16 = arith.constant dense<0.000000e+00> : vector<8x32xf32>
    %17 = tpu.matmul %16, %4, %cst_16 {dimension_numbers = #tpu.dot_dimension_numbers<[1], [0], [0], [1], [0, 0, 1, 1], [], []>} : vector<8x32xf32>, vector<32x32xf32>, vector<8x32xf32> -> vector<8x32xf32>
    %18 = vector.broadcast %5 : vector<1x32xf32> to vector<8x32xf32>
    %19 = arith.addf %17, %18 : vector<8x32xf32>
    %c0_17 = arith.constant 0 : index
    %c0_18 = arith.constant 0 : index
    %20 = vector.load %arg8[%c0_17, %c0_18] : memref<1x32xf32, #tpu.memory_space<vmem>>, vector<1x32xf32>
    %c0_19 = arith.constant 0 : index
    %c0_20 = arith.constant 0 : index
    %21 = vector.load %arg9[%c0_19, %c0_20] : memref<1x32xf32, #tpu.memory_space<vmem>>, vector<1x32xf32>
    %cst_21 = arith.constant dense<0.000000e+00> : vector<8xf32>
    %22 = vector.multi_reduction <add>, %19, %cst_21 [1] : vector<8x32xf32> to vector<8xf32>
    %23 = vector.shape_cast %22 : vector<8xf32> to vector<8x1xf32>
    %cst_22 = arith.constant 3.200000e+01 : f32
    %24 = vector.broadcast %cst_22 : f32 to vector<8x1xf32>
    %25 = arith.divf %23, %24 : vector<8x1xf32>
    %26 = vector.broadcast %25 : vector<8x1xf32> to vector<8x32xf32>
    %27 = arith.subf %19, %26 : vector<8x32xf32>
    %28 = arith.mulf %27, %27 : vector<8x32xf32>
    %cst_23 = arith.constant dense<0.000000e+00> : vector<8xf32>
    %29 = vector.multi_reduction <add>, %28, %cst_23 [1] : vector<8x32xf32> to vector<8xf32>
    %30 = vector.shape_cast %29 : vector<8xf32> to vector<8x1xf32>
    %cst_24 = arith.constant 3.200000e+01 : f32
    %31 = vector.broadcast %cst_24 : f32 to vector<8x1xf32>
    %32 = arith.divf %30, %31 : vector<8x1xf32>
    %33 = vector.broadcast %25 : vector<8x1xf32> to vector<8x32xf32>
    %34 = arith.subf %19, %33 : vector<8x32xf32>
    %cst_25 = arith.constant 9.99999974E-6 : f32
    %35 = vector.broadcast %cst_25 : f32 to vector<8x1xf32>
    %36 = arith.addf %32, %35 : vector<8x1xf32>
    %37 = math.rsqrt %36 : vector<8x1xf32>
    %38 = vector.broadcast %37 : vector<8x1xf32> to vector<8x32xf32>
    %39 = arith.mulf %34, %38 : vector<8x32xf32>
    %40 = vector.broadcast %20 : vector<1x32xf32> to vector<8x32xf32>
    %41 = arith.mulf %39, %40 : vector<8x32xf32>
    %42 = vector.broadcast %21 : vector<1x32xf32> to vector<8x32xf32>
    %43 = arith.addf %41, %42 : vector<8x32xf32>
    %c0_26 = arith.constant 0 : index
    %c0_27 = arith.constant 0 : index
    %44 = vector.load %arg10[%c0_26, %c0_27] : memref<8x32xf32, #tpu.memory_space<vmem>>, vector<8x32xf32>
    tpu.vector_store %arg10[%c0_26, %c0_27], %43 {strides = array<i32>} : memref<8x32xf32, #tpu.memory_space<vmem>>, vector<8x32xf32>,
    return
  }
  func.func @transform_0(%arg0: i32) -> (i32, i32) {
    %c0_i32 = arith.constant 0 : i32
    %c0_i32_0 = arith.constant 0 : i32
    return %arg0, %c0_i32 : i32, i32
  }
  func.func @transform_1(%arg0: i32) -> (i32, i32) {
    %c0_i32 = arith.constant 0 : i32
    %c0_i32_0 = arith.constant 0 : i32
    %c0_i32_1 = arith.constant 0 : i32
    return %c0_i32, %c0_i32_0 : i32, i32
  }
  func.func @transform_2(%arg0: i32) -> (i32, i32) {
    %c0_i32 = arith.constant 0 : i32
    %c0_i32_0 = arith.constant 0 : i32
    %c0_i32_1 = arith.constant 0 : i32
    return %c0_i32, %c0_i32_0 : i32, i32
  }
  func.func @transform_3(%arg0: i32) -> (i32, i32) {
    %c0_i32 = arith.constant 0 : i32
    %c0_i32_0 = arith.constant 0 : i32
    %c0_i32_1 = arith.constant 0 : i32
    return %c0_i32, %c0_i32_0 : i32, i32
  }
  func.func @transform_4(%arg0: i32) -> (i32, i32) {
    %c0_i32 = arith.constant 0 : i32
    %c0_i32_0 = arith.constant 0 : i32
    %c0_i32_1 = arith.constant 0 : i32
    return %c0_i32, %c0_i32_0 : i32, i32
  }
  func.func @transform_5(%arg0: i32) -> (i32, i32) {
    %c0_i32 = arith.constant 0 : i32
    %c0_i32_0 = arith.constant 0 : i32
    %c0_i32_1 = arith.constant 0 : i32
    return %c0_i32, %c0_i32_0 : i32, i32
  }
  func.func @transform_6(%arg0: i32) -> (i32, i32) {
    %c0_i32 = arith.constant 0 : i32
    %c0_i32_0 = arith.constant 0 : i32
    %c0_i32_1 = arith.constant 0 : i32
    return %c0_i32, %c0_i32_0 : i32, i32
  }
  func.func @transform_7(%arg0: i32) -> (i32, i32) {
    %c0_i32 = arith.constant 0 : i32
    %c0_i32_0 = arith.constant 0 : i32
    %c0_i32_1 = arith.constant 0 : i32
    return %c0_i32, %c0_i32_0 : i32, i32
  }
  func.func @transform_8(%arg0: i32) -> (i32, i32) {
    %c0_i32 = arith.constant 0 : i32
    %c0_i32_0 = arith.constant 0 : i32
    %c0_i32_1 = arith.constant 0 : i32
    return %c0_i32, %c0_i32_0 : i32, i32
  }
  func.func @transform_9(%arg0: i32) -> (i32, i32) {
    %c0_i32 = arith.constant 0 : i32
    %c0_i32_0 = arith.constant 0 : i32
    return %arg0, %c0_i32 : i32, i32
  }
}

module attributes {stable_mosaic.version = 11 : i64} {
  func.func @kernel(%arg0: i32, %arg1: memref<8x8xf32, #tpu.memory_space<vmem>>, %arg2: memref<8x32xf32, #tpu.memory_space<vmem>>, %arg3: memref<1x32xf32, #tpu.memory_space<vmem>>, %arg4: memref<32x32xf32, #tpu.memory_space<vmem>>, %arg5: memref<1x32xf32, #tpu.memory_space<vmem>>, %arg6: memref<32x32xf32, #tpu.memory_space<vmem>>, %arg7: memref<1x32xf32, #tpu.memory_space<vmem>>, %arg8: memref<1x32xf32, #tpu.memory_space<vmem>>, %arg9: memref<1x32xf32, #tpu.memory_space<vmem>>, %arg10: memref<8x32xf32, #tpu.memory_space<vmem>>) attributes {dimension_semantics = [#tpu.dimension_semantics<parallel>], iteration_bounds = array<i64: 3>, scalar_prefetch = 0 : i64, scratch_operands = 0 : i64, tpu.core_type = #tpu.core_type<tc>, window_params = [{transform_indices = @transform_0, window_bounds = array<i64: 8, 8>}, {pipeline_mode = #tpu.pipeline_mode<synchronous>, transform_indices = @transform_1, window_bounds = array<i64: 8, 32>}, {pipeline_mode = #tpu.pipeline_mode<synchronous>, transform_indices = @transform_2, window_bounds = array<i64: 1, 32>}, {pipeline_mode = #tpu.pipeline_mode<synchronous>, transform_indices = @transform_3, window_bounds = array<i64: 32, 32>}, {pipeline_mode = #tpu.pipeline_mode<synchronous>, transform_indices = @transform_4, window_bounds = array<i64: 1, 32>}, {pipeline_mode = #tpu.pipeline_mode<synchronous>, transform_indices = @transform_5, window_bounds = array<i64: 32, 32>}, {pipeline_mode = #tpu.pipeline_mode<synchronous>, transform_indices = @transform_6, window_bounds = array<i64: 1, 32>}, {pipeline_mode = #tpu.pipeline_mode<synchronous>, transform_indices = @transform_7, window_bounds = array<i64: 1, 32>}, {pipeline_mode = #tpu.pipeline_mode<synchronous>, transform_indices = @transform_8, window_bounds = array<i64: 1, 32>}, {transform_indices = @transform_9, window_bounds = array<i64: 8, 32>}]} {
    %c0 = arith.constant 0 : index
    %c0_0 = arith.constant 0 : index
    %0 = vector.load %arg2[%c0, %c0_0] : memref<8x32xf32, #tpu.memory_space<vmem>>, vector<8x32xf32>
    %c0_1 = arith.constant 0 : index
    %c0_2 = arith.constant 0 : index
    %1 = vector.load %arg3[%c0_1, %c0_2] : memref<1x32xf32, #tpu.memory_space<vmem>>, vector<1x32xf32>
    %c0_3 = arith.constant 0 : index
    %c0_4 = arith.constant 0 : index
    %2 = vector.load %arg4[%c0_3, %c0_4] : memref<32x32xf32, #tpu.memory_space<vmem>>, vector<32x32xf32>
    %c0_5 = arith.constant 0 : index
    %c0_6 = arith.constant 0 : index
    %3 = vector.load %arg5[%c0_5, %c0_6] : memref<1x32xf32, #tpu.memory_space<vmem>>, vector<1x32xf32>
    %c0_7 = arith.constant 0 : index
    %c0_8 = arith.constant 0 : index
    %4 = vector.load %arg6[%c0_7, %c0_8] : memref<32x32xf32, #tpu.memory_space<vmem>>, vector<32x32xf32>
    %c0_9 = arith.constant 0 : index
    %c0_10 = arith.constant 0 : index
    %5 = vector.load %arg7[%c0_9, %c0_10] : memref<1x32xf32, #tpu.memory_space<vmem>>, vector<1x32xf32>
    %c0_11 = arith.constant 0 : index
    %c0_12 = arith.constant 0 : index
    %6 = vector.load %arg1[%c0_11, %c0_12] : memref<8x8xf32, #tpu.memory_space<vmem>>, vector<8x8xf32>
    %cst = arith.constant dense<0.000000e+00> : vector<8x32xf32>
    %7 = tpu.matmul %6, %0, %cst {dimension_numbers = #tpu.dot_dimension_numbers<[1], [0], [0], [1], [0, 0, 1, 1], [], []>} : vector<8x8xf32>, vector<8x32xf32>, vector<8x32xf32> -> vector<8x32xf32>
    %8 = vector.broadcast %1 : vector<1x32xf32> to vector<8x32xf32>
    %9 = arith.addf %7, %8 : vector<8x32xf32>
    %cst_13 = arith.constant 0.000000e+00 : f32
    %10 = vector.broadcast %cst_13 : f32 to vector<8x32xf32>
    %11 = arith.maximumf %9, %10 : vector<8x32xf32>
    %cst_14 = arith.constant dense<0.000000e+00> : vector<8x32xf32>
    %12 = tpu.matmul %11, %2, %cst_14 {dimension_numbers = #tpu.dot_dimension_numbers<[1], [0], [0], [1], [0, 0, 1, 1], [], []>} : vector<8x32xf32>, vector<32x32xf32>, vector<8x32xf32> -> vector<8x32xf32>
    %13 = vector.broadcast %3 : vector<1x32xf32> to vector<8x32xf32>
    %14 = arith.addf %12, %13 : vector<8x32xf32>
    %cst_15 = arith.constant 0.000000e+00 : f32
    %15 = vector.broadcast %cst_15 : f32 to vector<8x32xf32>
    %16 = arith.maximumf %14, %15 : vector<8x32xf32>
    %cst_16 = arith.constant dense<0.000000e+00> : vector<8x32xf32>
    %17 = tpu.matmul %16, %4, %cst_16 {dimension_numbers = #tpu.dot_dimension_numbers<[1], [0], [0], [1], [0, 0, 1, 1], [], []>} : vector<8x32xf32>, vector<32x32xf32>, vector<8x32xf32> -> vector<8x32xf32>
    %18 = vector.broadcast %5 : vector<1x32xf32> to vector<8x32xf32>
    %19 = arith.addf %17, %18 : vector<8x32xf32>
    %c0_17 = arith.constant 0 : index
    %c0_18 = arith.constant 0 : index
    %20 = vector.load %arg8[%c0_17, %c0_18] : memref<1x32xf32, #tpu.memory_space<vmem>>, vector<1x32xf32>
    %c0_19 = arith.constant 0 : index
    %c0_20 = arith.constant 0 : index
    %21 = vector.load %arg9[%c0_19, %c0_20] : memref<1x32xf32, #tpu.memory_space<vmem>>, vector<1x32xf32>
    %cst_21 = arith.constant dense<0.000000e+00> : vector<8xf32>
    %22 = vector.multi_reduction <add>, %19, %cst_21 [1] : vector<8x32xf32> to vector<8xf32>
    %23 = vector.shape_cast %22 : vector<8xf32> to vector<8x1xf32>
    %cst_22 = arith.constant 3.200000e+01 : f32
    %24 = vector.broadcast %cst_22 : f32 to vector<8x1xf32>
    %25 = arith.divf %23, %24 : vector<8x1xf32>
    %26 = vector.broadcast %25 : vector<8x1xf32> to vector<8x32xf32>
    %27 = arith.subf %19, %26 : vector<8x32xf32>
    %28 = arith.mulf %27, %27 : vector<8x32xf32>
    %cst_23 = arith.constant dense<0.000000e+00> : vector<8xf32>
    %29 = vector.multi_reduction <add>, %28, %cst_23 [1] : vector<8x32xf32> to vector<8xf32>
    %30 = vector.shape_cast %29 : vector<8xf32> to vector<8x1xf32>
    %cst_24 = arith.constant 3.200000e+01 : f32
    %31 = vector.broadcast %cst_24 : f32 to vector<8x1xf32>
    %32 = arith.divf %30, %31 : vector<8x1xf32>
    %33 = vector.broadcast %25 : vector<8x1xf32> to vector<8x32xf32>
    %34 = arith.subf %19, %33 : vector<8x32xf32>
    %cst_25 = arith.constant 9.99999974E-6 : f32
    %35 = vector.broadcast %cst_25 : f32 to vector<8x1xf32>
    %36 = arith.addf %32, %35 : vector<8x1xf32>
    %37 = math.rsqrt %36 : vector<8x1xf32>
    %38 = vector.broadcast %37 : vector<8x1xf32> to vector<8x32xf32>
    %39 = arith.mulf %34, %38 : vector<8x32xf32>
    %40 = vector.broadcast %20 : vector<1x32xf32> to vector<8x32xf32>
    %41 = arith.mulf %39, %40 : vector<8x32xf32>
    %42 = vector.broadcast %21 : vector<1x32xf32> to vector<8x32xf32>
    %43 = arith.addf %41, %42 : vector<8x32xf32>
    %c0_26 = arith.constant 0 : index
    %c0_27 = arith.constant 0 : index
    %44 = vector.load %arg10[%c0_26, %c0_27] : memref<8x32xf32, #tpu.memory_space<vmem>>, vector<8x32xf32>
    tpu.vector_store %arg10[%c0_26, %c0_27], %43 {strides = array<i32>} : memref<8x32xf32, #tpu.memory_space<vmem>>, vector<8x32xf32>,
    return
  }
  func.func @transform_0(%arg0: i32) -> (i32, i32) {
    %c0_i32 = arith.constant 0 : i32
    %c0_i32_0 = arith.constant 0 : i32
    return %arg0, %c0_i32 : i32, i32
  }
  func.func @transform_1(%arg0: i32) -> (i32, i32) {
    %c0_i32 = arith.constant 0 : i32
    %c0_i32_0 = arith.constant 0 : i32
    %c0_i32_1 = arith.constant 0 : i32
    return %c0_i32, %c0_i32_0 : i32, i32
  }
  func.func @transform_2(%arg0: i32) -> (i32, i32) {
    %c0_i32 = arith.constant 0 : i32
    %c0_i32_0 = arith.constant 0 : i32
    %c0_i32_1 = arith.constant 0 : i32
    return %c0_i32, %c0_i32_0 : i32, i32
  }
  func.func @transform_3(%arg0: i32) -> (i32, i32) {
    %c0_i32 = arith.constant 0 : i32
    %c0_i32_0 = arith.constant 0 : i32
    %c0_i32_1 = arith.constant 0 : i32
    return %c0_i32, %c0_i32_0 : i32, i32
  }
  func.func @transform_4(%arg0: i32) -> (i32, i32) {
    %c0_i32 = arith.constant 0 : i32
    %c0_i32_0 = arith.constant 0 : i32
    %c0_i32_1 = arith.constant 0 : i32
    return %c0_i32, %c0_i32_0 : i32, i32
  }
  func.func @transform_5(%arg0: i32) -> (i32, i32) {
    %c0_i32 = arith.constant 0 : i32
    %c0_i32_0 = arith.constant 0 : i32
    %c0_i32_1 = arith.constant 0 : i32
    return %c0_i32, %c0_i32_0 : i32, i32
  }
  func.func @transform_6(%arg0: i32) -> (i32, i32) {
    %c0_i32 = arith.constant 0 : i32
    %c0_i32_0 = arith.constant 0 : i32
    %c0_i32_1 = arith.constant 0 : i32
    return %c0_i32, %c0_i32_0 : i32, i32
  }
  func.func @transform_7(%arg0: i32) -> (i32, i32) {
    %c0_i32 = arith.constant 0 : i32
    %c0_i32_0 = arith.constant 0 : i32
    %c0_i32_1 = arith.constant 0 : i32
    return %c0_i32, %c0_i32_0 : i32, i32
  }
  func.func @transform_8(%arg0: i32) -> (i32, i32) {
    %c0_i32 = arith.constant 0 : i32
    %c0_i32_0 = arith.constant 0 : i32
    %c0_i32_1 = arith.constant 0 : i32
    return %c0_i32, %c0_i32_0 : i32, i32
  }
  func.func @transform_9(%arg0: i32) -> (i32, i32) {
    %c0_i32 = arith.constant 0 : i32
    %c0_i32_0 = arith.constant 0 : i32
    return %arg0, %c0_i32 : i32, i32
  }
}

module attributes {stable_mosaic.version = 11 : i64} {
  func.func @kernel(%arg0: i32, %arg1: memref<24xi32, #tpu.memory_space<smem>>, %arg2: memref<24xi32, #tpu.memory_space<smem>>, %arg3: memref<16x32xf32, #tpu.memory_space<vmem>>, %arg4: memref<8x32xf32, #tpu.memory_space<vmem>>, %arg5: memref<32x32xf32, #tpu.memory_space<vmem>>, %arg6: memref<32x32xf32, #tpu.memory_space<vmem>>, %arg7: memref<32x32xf32, #tpu.memory_space<vmem>>, %arg8: memref<1x32xf32, #tpu.memory_space<vmem>>, %arg9: memref<32x32xf32, #tpu.memory_space<vmem>>, %arg10: memref<1x32xf32, #tpu.memory_space<vmem>>, %arg11: memref<32x32xf32, #tpu.memory_space<vmem>>, %arg12: memref<1x32xf32, #tpu.memory_space<vmem>>, %arg13: memref<1x32xf32, #tpu.memory_space<vmem>>, %arg14: memref<1x32xf32, #tpu.memory_space<vmem>>, %arg15: memref<32x32xf32, #tpu.memory_space<vmem>>, %arg16: memref<32x32xf32, #tpu.memory_space<vmem>>, %arg17: memref<1x32xf32, #tpu.memory_space<vmem>>, %arg18: memref<32x32xf32, #tpu.memory_space<vmem>>, %arg19: memref<1x32xf32, #tpu.memory_space<vmem>>, %arg20: memref<32x32xf32, #tpu.memory_space<vmem>>, %arg21: memref<1x32xf32, #tpu.memory_space<vmem>>, %arg22: memref<1x32xf32, #tpu.memory_space<vmem>>, %arg23: memref<1x32xf32, #tpu.memory_space<vmem>>, %arg24: memref<8x32xf32, #tpu.memory_space<vmem>>, %arg25: memref<16x32xf32, #tpu.memory_space<vmem>>, %arg26: memref<16x32xf32, #tpu.memory_space<vmem>>, %arg27: memref<16x32xf32, #tpu.memory_space<vmem>>, %arg28: memref<16x32xf32, #tpu.memory_space<vmem>>, %arg29: memref<8x32xf32, #tpu.memory_space<vmem>>, %arg30: memref<8x32xf32, #tpu.memory_space<vmem>>) attributes {dimension_semantics = [#tpu.dimension_semantics<arbitrary>], iteration_bounds = array<i64: 3>, scalar_prefetch = 2 : i64, scratch_operands = 5 : i64, tpu.core_type = #tpu.core_type<tc>, window_params = [{pipeline_mode = #tpu.pipeline_mode<synchronous>, transform_indices = @transform_0, window_bounds = array<i64: 16, 32>}, {transform_indices = @transform_1, window_bounds = array<i64: 8, 32>}, {pipeline_mode = #tpu.pipeline_mode<synchronous>, transform_indices = @transform_2, window_bounds = array<i64: 32, 32>}, {pipeline_mode = #tpu.pipeline_mode<synchronous>, transform_indices = @transform_3, window_bounds = array<i64: 32, 32>}, {pipeline_mode = #tpu.pipeline_mode<synchronous>, transform_indices = @transform_4, window_bounds = array<i64: 32, 32>}, {pipeline_mode = #tpu.pipeline_mode<synchronous>, transform_indices = @transform_5, window_bounds = array<i64: 1, 32>}, {pipeline_mode = #tpu.pipeline_mode<synchronous>, transform_indices = @transform_6, window_bounds = array<i64: 32, 32>}, {pipeline_mode = #tpu.pipeline_mode<synchronous>, transform_indices = @transform_7, window_bounds = array<i64: 1, 32>}, {pipeline_mode = #tpu.pipeline_mode<synchronous>, transform_indices = @transform_8, window_bounds = array<i64: 32, 32>}, {pipeline_mode = #tpu.pipeline_mode<synchronous>, transform_indices = @transform_9, window_bounds = array<i64: 1, 32>}, {pipeline_mode = #tpu.pipeline_mode<synchronous>, transform_indices = @transform_10, window_bounds = array<i64: 1, 32>}, {pipeline_mode = #tpu.pipeline_mode<synchronous>, transform_indices = @transform_11, window_bounds = array<i64: 1, 32>}, {pipeline_mode = #tpu.pipeline_mode<synchronous>, transform_indices = @transform_12, window_bounds = array<i64: 32, 32>}, {pipeline_mode = #tpu.pipeline_mode<synchronous>, transform_indices = @transform_13, window_bounds = array<i64: 32, 32>}, {pipeline_mode = #tpu.pipeline_mode<synchronous>, transform_indices = @transform_14, window_bounds = array<i64: 1, 32>}, {pipeline_mode = #tpu.pipeline_mode<synchronous>, transform_indices = @transform_15, window_bounds = array<i64: 32, 32>}, {pipeline_mode = #tpu.pipeline_mode<synchronous>, transform_indices = @transform_16, window_bounds = array<i64: 1, 32>}, {pipeline_mode = #tpu.pipeline_mode<synchronous>, transform_indices = @transform_17, window_bounds = array<i64: 32, 32>}, {pipeline_mode = #tpu.pipeline_mode<synchronous>, transform_indices = @transform_18, window_bounds = array<i64: 1, 32>}, {pipeline_mode = #tpu.pipeline_mode<synchronous>, transform_indices = @transform_19, window_bounds = array<i64: 1, 32>}, {pipeline_mode = #tpu.pipeline_mode<synchronous>, transform_indices = @transform_20, window_bounds = array<i64: 1, 32>}, {transform_indices = @transform_21, window_bounds = array<i64: 8, 32>}, {pipeline_mode = #tpu.pipeline_mode<synchronous>, transform_indices = @transform_22, window_bounds = array<i64: 16, 32>}]} {
    %c0_i32 = arith.constant 0 : i32
    %0 = arith.cmpi eq, %arg0, %c0_i32 : i32
    %1 = arith.extui %0 : i1 to i32
    %c0_i32_0 = arith.constant 0 : i32
    %2 = arith.cmpi ne, %1, %c0_i32_0 : i32
    scf.if %2 {
      %c0_43 = arith.constant 0 : index
      %c0_44 = arith.constant 0 : index
      %58 = vector.load %arg3[%c0_43, %c0_44] : memref<16x32xf32, #tpu.memory_space<vmem>>, vector<16x32xf32>
      %c0_45 = arith.constant 0 : index
      %c0_46 = arith.constant 0 : index
      %59 = vector.load %arg5[%c0_45, %c0_46] : memref<32x32xf32, #tpu.memory_space<vmem>>, vector<32x32xf32>
      %cst_47 = arith.constant dense<0.000000e+00> : vector<16x32xf32>
      %60 = tpu.matmul %58, %59, %cst_47 {dimension_numbers = #tpu.dot_dimension_numbers<[1], [0], [0], [1], [0, 0, 1, 1], [], []>} : vector<16x32xf32>, vector<32x32xf32>, vector<16x32xf32> -> vector<16x32xf32>
      %c0_48 = arith.constant 0 : index
      %c0_49 = arith.constant 0 : index
      %61 = vector.load %arg26[%c0_48, %c0_49] : memref<16x32xf32, #tpu.memory_space<vmem>>, vector<16x32xf32>
      tpu.vector_store %arg26[%c0_48, %c0_49], %60 {strides = array<i32>} : memref<16x32xf32, #tpu.memory_space<vmem>>, vector<16x32xf32>,
      %c0_50 = arith.constant 0 : index
      %c0_51 = arith.constant 0 : index
      %62 = vector.load %arg6[%c0_50, %c0_51] : memref<32x32xf32, #tpu.memory_space<vmem>>, vector<32x32xf32>
      %cst_52 = arith.constant dense<0.000000e+00> : vector<16x32xf32>
      %63 = tpu.matmul %58, %62, %cst_52 {dimension_numbers = #tpu.dot_dimension_numbers<[1], [0], [0], [1], [0, 0, 1, 1], [], []>} : vector<16x32xf32>, vector<32x32xf32>, vector<16x32xf32> -> vector<16x32xf32>
      %c0_53 = arith.constant 0 : index
      %c0_54 = arith.constant 0 : index
      %64 = vector.load %arg27[%c0_53, %c0_54] : memref<16x32xf32, #tpu.memory_space<vmem>>, vector<16x32xf32>
      tpu.vector_store %arg27[%c0_53, %c0_54], %63 {strides = array<i32>} : memref<16x32xf32, #tpu.memory_space<vmem>>, vector<16x32xf32>,
      %cst_55 = arith.constant 0.000000e+00 : f32
      %65 = vector.broadcast %cst_55 : f32 to vector<16x32xf32>
      %c0_56 = arith.constant 0 : index
      %c0_57 = arith.constant 0 : index
      %66 = vector.load %arg28[%c0_56, %c0_57] : memref<16x32xf32, #tpu.memory_space<vmem>>, vector<16x32xf32>
      tpu.vector_store %arg28[%c0_56, %c0_57], %65 {strides = array<i32>} : memref<16x32xf32, #tpu.memory_space<vmem>>, vector<16x32xf32>,
    } else {
    }
    %c0 = arith.constant 0 : index
    %c0_1 = arith.constant 0 : index
    %3 = vector.load %arg4[%c0, %c0_1] : memref<8x32xf32, #tpu.memory_space<vmem>>, vector<8x32xf32>
    %c0_2 = arith.constant 0 : index
    %c0_3 = arith.constant 0 : index
    %4 = vector.load %arg7[%c0_2, %c0_3] : memref<32x32xf32, #tpu.memory_space<vmem>>, vector<32x32xf32>
    %cst = arith.constant dense<0.000000e+00> : vector<8x32xf32>
    %5 = tpu.matmul %3, %4, %cst {dimension_numbers = #tpu.dot_dimension_numbers<[1], [0], [0], [1], [0, 0, 1, 1], [], []>} : vector<8x32xf32>, vector<32x32xf32>, vector<8x32xf32> -> vector<8x32xf32>
    %c0_4 = arith.constant 0 : index
    %c0_5 = arith.constant 0 : index
    %6 = vector.load %arg8[%c0_4, %c0_5] : memref<1x32xf32, #tpu.memory_space<vmem>>, vector<1x32xf32>
    %7 = vector.broadcast %6 : vector<1x32xf32> to vector<8x32xf32>
    %8 = arith.addf %5, %7 : vector<8x32xf32>
    %c0_6 = arith.constant 0 : index
    %c0_7 = arith.constant 0 : index
    %9 = vector.load %arg29[%c0_6, %c0_7] : memref<8x32xf32, #tpu.memory_space<vmem>>, vector<8x32xf32>
    tpu.vector_store %arg29[%c0_6, %c0_7], %8 {strides = array<i32>} : memref<8x32xf32, #tpu.memory_space<vmem>>, vector<8x32xf32>,
    %c8_i32 = arith.constant 8 : i32
    %10 = arith.muli %arg0, %c8_i32 : i32
    %c0_i32_8 = arith.constant 0 : i32
    %c8_i32_9 = arith.constant 8 : i32
    %11 = arith.addi %c0_i32_8, %c8_i32_9 : i32
    %c1_i32 = arith.constant 1 : i32
    scf.for %arg31 = %c0_i32_8 to %11 step %c1_i32  : i32 {
      %58 = arith.addi %10, %arg31 : i32
      %59 = arith.index_cast %58 : i32 to index
      %60 = memref.load %arg1[%59] : memref<24xi32, #tpu.memory_space<smem>>
      %61 = arith.addi %10, %arg31 : i32
      %62 = arith.index_cast %61 : i32 to index
      %63 = memref.load %arg2[%62] : memref<24xi32, #tpu.memory_space<smem>>
      %64 = arith.index_cast %arg31 : i32 to index
      %c0_43 = arith.constant 0 : index
      %65 = vector.load %arg29[%64, %c0_43] : memref<8x32xf32, #tpu.memory_space<vmem>>, vector<1x32xf32>
      %66 = arith.index_cast %60 : i32 to index
      %c0_44 = arith.constant 0 : index
      %67 = vector.load %arg26[%66, %c0_44] : memref<16x32xf32, #tpu.memory_space<vmem>>, vector<1x32xf32>
      %68 = arith.addf %65, %67 : vector<1x32xf32>
      %69 = arith.index_cast %63 : i32 to index
      %c0_45 = arith.constant 0 : index
      %70 = vector.load %arg27[%69, %c0_45] : memref<16x32xf32, #tpu.memory_space<vmem>>, vector<1x32xf32>
      %71 = arith.addf %68, %70 : vector<1x32xf32>
      %72 = arith.index_cast %arg31 : i32 to index
      %c0_46 = arith.constant 0 : index
      %73 = vector.load %arg29[%72, %c0_46] : memref<8x32xf32, #tpu.memory_space<vmem>>, vector<1x32xf32>
      tpu.vector_store %arg29[%72, %c0_46], %71 {strides = array<i32>} : memref<8x32xf32, #tpu.memory_space<vmem>>, vector<1x32xf32>,
    }
    %c8_i32_10 = arith.constant 8 : i32
    %c0_11 = arith.constant 0 : index
    %c0_12 = arith.constant 0 : index
    %12 = vector.load %arg29[%c0_11, %c0_12] : memref<8x32xf32, #tpu.memory_space<vmem>>, vector<8x32xf32>
    %cst_13 = arith.constant 0.000000e+00 : f32
    %13 = vector.broadcast %cst_13 : f32 to vector<8x32xf32>
    %14 = arith.maximumf %12, %13 : vector<8x32xf32>
    %c0_14 = arith.constant 0 : index
    %c0_15 = arith.constant 0 : index
    %15 = vector.load %arg9[%c0_14, %c0_15] : memref<32x32xf32, #tpu.memory_space<vmem>>, vector<32x32xf32>
    %cst_16 = arith.constant dense<0.000000e+00> : vector<8x32xf32>
    %16 = tpu.matmul %14, %15, %cst_16 {dimension_numbers = #tpu.dot_dimension_numbers<[1], [0], [0], [1], [0, 0, 1, 1], [], []>} : vector<8x32xf32>, vector<32x32xf32>, vector<8x32xf32> -> vector<8x32xf32>
    %c0_17 = arith.constant 0 : index
    %c0_18 = arith.constant 0 : index
    %17 = vector.load %arg10[%c0_17, %c0_18] : memref<1x32xf32, #tpu.memory_space<vmem>>, vector<1x32xf32>
    %18 = vector.broadcast %17 : vector<1x32xf32> to vector<8x32xf32>
    %19 = arith.addf %16, %18 : vector<8x32xf32>
    %cst_19 = arith.constant 0.000000e+00 : f32
    %20 = vector.broadcast %cst_19 : f32 to vector<8x32xf32>
    %21 = arith.maximumf %19, %20 : vector<8x32xf32>
    %c0_20 = arith.constant 0 : index
    %c0_21 = arith.constant 0 : index
    %22 = vector.load %arg11[%c0_20, %c0_21] : memref<32x32xf32, #tpu.memory_space<vmem>>, vector<32x32xf32>
    %cst_22 = arith.constant dense<0.000000e+00> : vector<8x32xf32>
    %23 = tpu.matmul %21, %22, %cst_22 {dimension_numbers = #tpu.dot_dimension_numbers<[1], [0], [0], [1], [0, 0, 1, 1], [], []>} : vector<8x32xf32>, vector<32x32xf32>, vector<8x32xf32> -> vector<8x32xf32>
    %c0_23 = arith.constant 0 : index
    %c0_24 = arith.constant 0 : index
    %24 = vector.load %arg12[%c0_23, %c0_24] : memref<1x32xf32, #tpu.memory_space<vmem>>, vector<1x32xf32>
    %25 = vector.broadcast %24 : vector<1x32xf32> to vector<8x32xf32>
    %26 = arith.addf %23, %25 : vector<8x32xf32>
    %c0_25 = arith.constant 0 : index
    %c0_26 = arith.constant 0 : index
    %27 = vector.load %arg13[%c0_25, %c0_26] : memref<1x32xf32, #tpu.memory_space<vmem>>, vector<1x32xf32>
    %c0_27 = arith.constant 0 : index
    %c0_28 = arith.constant 0 : index
    %28 = vector.load %arg14[%c0_27, %c0_28] : memref<1x32xf32, #tpu.memory_space<vmem>>, vector<1x32xf32>
    %cst_29 = arith.constant dense<0.000000e+00> : vector<8xf32>
    %29 = vector.multi_reduction <add>, %26, %cst_29 [1] : vector<8x32xf32> to vector<8xf32>
    %30 = vector.shape_cast %29 : vector<8xf32> to vector<8x1xf32>
    %cst_30 = arith.constant 3.200000e+01 : f32
    %31 = vector.broadcast %cst_30 : f32 to vector<8x1xf32>
    %32 = arith.divf %30, %31 : vector<8x1xf32>
    %33 = vector.broadcast %32 : vector<8x1xf32> to vector<8x32xf32>
    %34 = arith.subf %26, %33 : vector<8x32xf32>
    %35 = arith.mulf %34, %34 : vector<8x32xf32>
    %cst_31 = arith.constant dense<0.000000e+00> : vector<8xf32>
    %36 = vector.multi_reduction <add>, %35, %cst_31 [1] : vector<8x32xf32> to vector<8xf32>
    %37 = vector.shape_cast %36 : vector<8xf32> to vector<8x1xf32>
    %cst_32 = arith.constant 3.200000e+01 : f32
    %38 = vector.broadcast %cst_32 : f32 to vector<8x1xf32>
    %39 = arith.divf %37, %38 : vector<8x1xf32>
    %40 = vector.broadcast %32 : vector<8x1xf32> to vector<8x32xf32>
    %41 = arith.subf %26, %40 : vector<8x32xf32>
    %cst_33 = arith.constant 9.99999974E-6 : f32
    %42 = vector.broadcast %cst_33 : f32 to vector<8x1xf32>
    %43 = arith.addf %39, %42 : vector<8x1xf32>
    %44 = math.rsqrt %43 : vector<8x1xf32>
    %45 = vector.broadcast %44 : vector<8x1xf32> to vector<8x32xf32>
    %46 = arith.mulf %41, %45 : vector<8x32xf32>
    %47 = vector.broadcast %27 : vector<1x32xf32> to vector<8x32xf32>
    %48 = arith.mulf %46, %47 : vector<8x32xf32>
    %49 = vector.broadcast %28 : vector<1x32xf32> to vector<8x32xf32>
    %50 = arith.addf %48, %49 : vector<8x32xf32>
    %c0_34 = arith.constant 0 : index
    %c0_35 = arith.constant 0 : index
    %51 = vector.load %arg30[%c0_34, %c0_35] : memref<8x32xf32, #tpu.memory_space<vmem>>, vector<8x32xf32>
    tpu.vector_store %arg30[%c0_34, %c0_35], %50 {strides = array<i32>} : memref<8x32xf32, #tpu.memory_space<vmem>>, vector<8x32xf32>,
    %52 = arith.addf %3, %50 : vector<8x32xf32>
    %c0_36 = arith.constant 0 : index
    %c0_37 = arith.constant 0 : index
    %53 = vector.load %arg24[%c0_36, %c0_37] : memref<8x32xf32, #tpu.memory_space<vmem>>, vector<8x32xf32>
    tpu.vector_store %arg24[%c0_36, %c0_37], %52 {strides = array<i32>} : memref<8x32xf32, #tpu.memory_space<vmem>>, vector<8x32xf32>,
    %c0_i32_38 = arith.constant 0 : i32
    %c8_i32_39 = arith.constant 8 : i32
    %54 = arith.addi %c0_i32_38, %c8_i32_39 : i32
    %c1_i32_40 = arith.constant 1 : i32
    scf.for %arg31 = %c0_i32_38 to %54 step %c1_i32_40  : i32 {
      %58 = arith.addi %10, %arg31 : i32
      %59 = arith.index_cast %58 : i32 to index
      %60 = memref.load %arg1[%59] : memref<24xi32, #tpu.memory_space<smem>>
      %61 = arith.index_cast %60 : i32 to index
      %c0_43 = arith.constant 0 : index
      %62 = vector.load %arg28[%61, %c0_43] : memref<16x32xf32, #tpu.memory_space<vmem>>, vector<1x32xf32>
      %63 = arith.index_cast %arg31 : i32 to index
      %c0_44 = arith.constant 0 : index
      %64 = vector.load %arg30[%63, %c0_44] : memref<8x32xf32, #tpu.memory_space<vmem>>, vector<1x32xf32>
      %65 = arith.addf %62, %64 : vector<1x32xf32>
      %66 = arith.index_cast %60 : i32 to index
      %c0_45 = arith.constant 0 : index
      %67 = vector.load %arg28[%66, %c0_45] : memref<16x32xf32, #tpu.memory_space<vmem>>, vector<1x32xf32>
      tpu.vector_store %arg28[%66, %c0_45], %65 {strides = array<i32>} : memref<16x32xf32, #tpu.memory_space<vmem>>, vector<1x32xf32>,
    }
    %c8_i32_41 = arith.constant 8 : i32
    %c2_i32 = arith.constant 2 : i32
    %55 = arith.cmpi eq, %arg0, %c2_i32 : i32
    %56 = arith.extui %55 : i1 to i32
    %c0_i32_42 = arith.constant 0 : i32
    %57 = arith.cmpi ne, %56, %c0_i32_42 : i32
    scf.if %57 {
      %c0_43 = arith.constant 0 : index
      %c0_44 = arith.constant 0 : index
      %58 = vector.load %arg3[%c0_43, %c0_44] : memref<16x32xf32, #tpu.memory_space<vmem>>, vector<16x32xf32>
      %c0_45 = arith.constant 0 : index
      %c0_46 = arith.constant 0 : index
      %59 = vector.load %arg28[%c0_45, %c0_46] : memref<16x32xf32, #tpu.memory_space<vmem>>, vector<16x32xf32>
      %c0_47 = arith.constant 0 : index
      %c0_48 = arith.constant 0 : index
      %60 = vector.load %arg15[%c0_47, %c0_48] : memref<32x32xf32, #tpu.memory_space<vmem>>, vector<32x32xf32>
      %cst_49 = arith.constant dense<0.000000e+00> : vector<16x32xf32>
      %61 = tpu.matmul %59, %60, %cst_49 {dimension_numbers = #tpu.dot_dimension_numbers<[1], [0], [0], [1], [0, 0, 1, 1], [], []>} : vector<16x32xf32>, vector<32x32xf32>, vector<16x32xf32> -> vector<16x32xf32>
      %c0_50 = arith.constant 0 : index
      %c0_51 = arith.constant 0 : index
      %62 = vector.load %arg16[%c0_50, %c0_51] : memref<32x32xf32, #tpu.memory_space<vmem>>, vector<32x32xf32>
      %cst_52 = arith.constant dense<0.000000e+00> : vector<16x32xf32>
      %63 = tpu.matmul %58, %62, %cst_52 {dimension_numbers = #tpu.dot_dimension_numbers<[1], [0], [0], [1], [0, 0, 1, 1], [], []>} : vector<16x32xf32>, vector<32x32xf32>, vector<16x32xf32> -> vector<16x32xf32>
      %64 = arith.addf %61, %63 : vector<16x32xf32>
      %c0_53 = arith.constant 0 : index
      %c0_54 = arith.constant 0 : index
      %65 = vector.load %arg17[%c0_53, %c0_54] : memref<1x32xf32, #tpu.memory_space<vmem>>, vector<1x32xf32>
      %66 = vector.broadcast %65 : vector<1x32xf32> to vector<16x32xf32>
      %67 = arith.addf %64, %66 : vector<16x32xf32>
      %cst_55 = arith.constant 0.000000e+00 : f32
      %68 = vector.broadcast %cst_55 : f32 to vector<16x32xf32>
      %69 = arith.maximumf %67, %68 : vector<16x32xf32>
      %c0_56 = arith.constant 0 : index
      %c0_57 = arith.constant 0 : index
      %70 = vector.load %arg18[%c0_56, %c0_57] : memref<32x32xf32, #tpu.memory_space<vmem>>, vector<32x32xf32>
      %cst_58 = arith.constant dense<0.000000e+00> : vector<16x32xf32>
      %71 = tpu.matmul %69, %70, %cst_58 {dimension_numbers = #tpu.dot_dimension_numbers<[1], [0], [0], [1], [0, 0, 1, 1], [], []>} : vector<16x32xf32>, vector<32x32xf32>, vector<16x32xf32> -> vector<16x32xf32>
      %c0_59 = arith.constant 0 : index
      %c0_60 = arith.constant 0 : index
      %72 = vector.load %arg19[%c0_59, %c0_60] : memref<1x32xf32, #tpu.memory_space<vmem>>, vector<1x32xf32>
      %73 = vector.broadcast %72 : vector<1x32xf32> to vector<16x32xf32>
      %74 = arith.addf %71, %73 : vector<16x32xf32>
      %cst_61 = arith.constant 0.000000e+00 : f32
      %75 = vector.broadcast %cst_61 : f32 to vector<16x32xf32>
      %76 = arith.maximumf %74, %75 : vector<16x32xf32>
      %c0_62 = arith.constant 0 : index
      %c0_63 = arith.constant 0 : index
      %77 = vector.load %arg20[%c0_62, %c0_63] : memref<32x32xf32, #tpu.memory_space<vmem>>, vector<32x32xf32>
      %cst_64 = arith.constant dense<0.000000e+00> : vector<16x32xf32>
      %78 = tpu.matmul %76, %77, %cst_64 {dimension_numbers = #tpu.dot_dimension_numbers<[1], [0], [0], [1], [0, 0, 1, 1], [], []>} : vector<16x32xf32>, vector<32x32xf32>, vector<16x32xf32> -> vector<16x32xf32>
      %c0_65 = arith.constant 0 : index
      %c0_66 = arith.constant 0 : index
      %79 = vector.load %arg21[%c0_65, %c0_66] : memref<1x32xf32, #tpu.memory_space<vmem>>, vector<1x32xf32>
      %80 = vector.broadcast %79 : vector<1x32xf32> to vector<16x32xf32>
      %81 = arith.addf %78, %80 : vector<16x32xf32>
      %c0_67 = arith.constant 0 : index
      %c0_68 = arith.constant 0 : index
      %82 = vector.load %arg22[%c0_67, %c0_68] : memref<1x32xf32, #tpu.memory_space<vmem>>, vector<1x32xf32>
      %c0_69 = arith.constant 0 : index
      %c0_70 = arith.constant 0 : index
      %83 = vector.load %arg23[%c0_69, %c0_70] : memref<1x32xf32, #tpu.memory_space<vmem>>, vector<1x32xf32>
      %cst_71 = arith.constant dense<0.000000e+00> : vector<16xf32>
      %84 = vector.multi_reduction <add>, %81, %cst_71 [1] : vector<16x32xf32> to vector<16xf32>
      %85 = vector.shape_cast %84 : vector<16xf32> to vector<16x1xf32>
      %cst_72 = arith.constant 3.200000e+01 : f32
      %86 = vector.broadcast %cst_72 : f32 to vector<16x1xf32>
      %87 = arith.divf %85, %86 : vector<16x1xf32>
      %88 = vector.broadcast %87 : vector<16x1xf32> to vector<16x32xf32>
      %89 = arith.subf %81, %88 : vector<16x32xf32>
      %90 = arith.mulf %89, %89 : vector<16x32xf32>
      %cst_73 = arith.constant dense<0.000000e+00> : vector<16xf32>
      %91 = vector.multi_reduction <add>, %90, %cst_73 [1] : vector<16x32xf32> to vector<16xf32>
      %92 = vector.shape_cast %91 : vector<16xf32> to vector<16x1xf32>
      %cst_74 = arith.constant 3.200000e+01 : f32
      %93 = vector.broadcast %cst_74 : f32 to vector<16x1xf32>
      %94 = arith.divf %92, %93 : vector<16x1xf32>
      %95 = vector.broadcast %87 : vector<16x1xf32> to vector<16x32xf32>
      %96 = arith.subf %81, %95 : vector<16x32xf32>
      %cst_75 = arith.constant 9.99999974E-6 : f32
      %97 = vector.broadcast %cst_75 : f32 to vector<16x1xf32>
      %98 = arith.addf %94, %97 : vector<16x1xf32>
      %99 = math.rsqrt %98 : vector<16x1xf32>
      %100 = vector.broadcast %99 : vector<16x1xf32> to vector<16x32xf32>
      %101 = arith.mulf %96, %100 : vector<16x32xf32>
      %102 = vector.broadcast %82 : vector<1x32xf32> to vector<16x32xf32>
      %103 = arith.mulf %101, %102 : vector<16x32xf32>
      %104 = vector.broadcast %83 : vector<1x32xf32> to vector<16x32xf32>
      %105 = arith.addf %103, %104 : vector<16x32xf32>
      %106 = arith.addf %58, %105 : vector<16x32xf32>
      %c0_76 = arith.constant 0 : index
      %c0_77 = arith.constant 0 : index
      %107 = vector.load %arg25[%c0_76, %c0_77] : memref<16x32xf32, #tpu.memory_space<vmem>>, vector<16x32xf32>
      tpu.vector_store %arg25[%c0_76, %c0_77], %106 {strides = array<i32>} : memref<16x32xf32, #tpu.memory_space<vmem>>, vector<16x32xf32>,
    } else {
    }
    return
  }
  func.func @transform_0(%arg0: i32, %arg1: memref<24xi32, #tpu.memory_space<smem>>, %arg2: memref<24xi32, #tpu.memory_space<smem>>) -> (i32, i32) {
    %c0_i32 = arith.constant 0 : i32
    %c0_i32_0 = arith.constant 0 : i32
    %c0_i32_1 = arith.constant 0 : i32
    return %c0_i32, %c0_i32_0 : i32, i32
  }
  func.func @transform_1(%arg0: i32, %arg1: memref<24xi32, #tpu.memory_space<smem>>, %arg2: memref<24xi32, #tpu.memory_space<smem>>) -> (i32, i32) {
    %c0_i32 = arith.constant 0 : i32
    %c0_i32_0 = arith.constant 0 : i32
    return %arg0, %c0_i32 : i32, i32
  }
  func.func @transform_2(%arg0: i32, %arg1: memref<24xi32, #tpu.memory_space<smem>>, %arg2: memref<24xi32, #tpu.memory_space<smem>>) -> (i32, i32) {
    %c0_i32 = arith.constant 0 : i32
    %c0_i32_0 = arith.constant 0 : i32
    %c0_i32_1 = arith.constant 0 : i32
    return %c0_i32, %c0_i32_0 : i32, i32
  }
  func.func @transform_3(%arg0: i32, %arg1: memref<24xi32, #tpu.memory_space<smem>>, %arg2: memref<24xi32, #tpu.memory_space<smem>>) -> (i32, i32) {
    %c0_i32 = arith.constant 0 : i32
    %c0_i32_0 = arith.constant 0 : i32
    %c0_i32_1 = arith.constant 0 : i32
    return %c0_i32, %c0_i32_0 : i32, i32
  }
  func.func @transform_4(%arg0: i32, %arg1: memref<24xi32, #tpu.memory_space<smem>>, %arg2: memref<24xi32, #tpu.memory_space<smem>>) -> (i32, i32) {
    %c0_i32 = arith.constant 0 : i32
    %c0_i32_0 = arith.constant 0 : i32
    %c0_i32_1 = arith.constant 0 : i32
    return %c0_i32, %c0_i32_0 : i32, i32
  }
  func.func @transform_5(%arg0: i32, %arg1: memref<24xi32, #tpu.memory_space<smem>>, %arg2: memref<24xi32, #tpu.memory_space<smem>>) -> (i32, i32) {
    %c0_i32 = arith.constant 0 : i32
    %c0_i32_0 = arith.constant 0 : i32
    %c0_i32_1 = arith.constant 0 : i32
    return %c0_i32, %c0_i32_0 : i32, i32
  }
  func.func @transform_6(%arg0: i32, %arg1: memref<24xi32, #tpu.memory_space<smem>>, %arg2: memref<24xi32, #tpu.memory_space<smem>>) -> (i32, i32) {
    %c0_i32 = arith.constant 0 : i32
    %c0_i32_0 = arith.constant 0 : i32
    %c0_i32_1 = arith.constant 0 : i32
    return %c0_i32, %c0_i32_0 : i32, i32
  }
  func.func @transform_7(%arg0: i32, %arg1: memref<24xi32, #tpu.memory_space<smem>>, %arg2: memref<24xi32, #tpu.memory_space<smem>>) -> (i32, i32) {
    %c0_i32 = arith.constant 0 : i32
    %c0_i32_0 = arith.constant 0 : i32
    %c0_i32_1 = arith.constant 0 : i32
    return %c0_i32, %c0_i32_0 : i32, i32
  }
  func.func @transform_8(%arg0: i32, %arg1: memref<24xi32, #tpu.memory_space<smem>>, %arg2: memref<24xi32, #tpu.memory_space<smem>>) -> (i32, i32) {
    %c0_i32 = arith.constant 0 : i32
    %c0_i32_0 = arith.constant 0 : i32
    %c0_i32_1 = arith.constant 0 : i32
    return %c0_i32, %c0_i32_0 : i32, i32
  }
  func.func @transform_9(%arg0: i32, %arg1: memref<24xi32, #tpu.memory_space<smem>>, %arg2: memref<24xi32, #tpu.memory_space<smem>>) -> (i32, i32) {
    %c0_i32 = arith.constant 0 : i32
    %c0_i32_0 = arith.constant 0 : i32
    %c0_i32_1 = arith.constant 0 : i32
    return %c0_i32, %c0_i32_0 : i32, i32
  }
  func.func @transform_10(%arg0: i32, %arg1: memref<24xi32, #tpu.memory_space<smem>>, %arg2: memref<24xi32, #tpu.memory_space<smem>>) -> (i32, i32) {
    %c0_i32 = arith.constant 0 : i32
    %c0_i32_0 = arith.constant 0 : i32
    %c0_i32_1 = arith.constant 0 : i32
    return %c0_i32, %c0_i32_0 : i32, i32
  }
  func.func @transform_11(%arg0: i32, %arg1: memref<24xi32, #tpu.memory_space<smem>>, %arg2: memref<24xi32, #tpu.memory_space<smem>>) -> (i32, i32) {
    %c0_i32 = arith.constant 0 : i32
    %c0_i32_0 = arith.constant 0 : i32
    %c0_i32_1 = arith.constant 0 : i32
    return %c0_i32, %c0_i32_0 : i32, i32
  }
  func.func @transform_12(%arg0: i32, %arg1: memref<24xi32, #tpu.memory_space<smem>>, %arg2: memref<24xi32, #tpu.memory_space<smem>>) -> (i32, i32) {
    %c0_i32 = arith.constant 0 : i32
    %c0_i32_0 = arith.constant 0 : i32
    %c0_i32_1 = arith.constant 0 : i32
    return %c0_i32, %c0_i32_0 : i32, i32
  }
  func.func @transform_13(%arg0: i32, %arg1: memref<24xi32, #tpu.memory_space<smem>>, %arg2: memref<24xi32, #tpu.memory_space<smem>>) -> (i32, i32) {
    %c0_i32 = arith.constant 0 : i32
    %c0_i32_0 = arith.constant 0 : i32
    %c0_i32_1 = arith.constant 0 : i32
    return %c0_i32, %c0_i32_0 : i32, i32
  }
  func.func @transform_14(%arg0: i32, %arg1: memref<24xi32, #tpu.memory_space<smem>>, %arg2: memref<24xi32, #tpu.memory_space<smem>>) -> (i32, i32) {
    %c0_i32 = arith.constant 0 : i32
    %c0_i32_0 = arith.constant 0 : i32
    %c0_i32_1 = arith.constant 0 : i32
    return %c0_i32, %c0_i32_0 : i32, i32
  }
  func.func @transform_15(%arg0: i32, %arg1: memref<24xi32, #tpu.memory_space<smem>>, %arg2: memref<24xi32, #tpu.memory_space<smem>>) -> (i32, i32) {
    %c0_i32 = arith.constant 0 : i32
    %c0_i32_0 = arith.constant 0 : i32
    %c0_i32_1 = arith.constant 0 : i32
    return %c0_i32, %c0_i32_0 : i32, i32
  }
  func.func @transform_16(%arg0: i32, %arg1: memref<24xi32, #tpu.memory_space<smem>>, %arg2: memref<24xi32, #tpu.memory_space<smem>>) -> (i32, i32) {
    %c0_i32 = arith.constant 0 : i32
    %c0_i32_0 = arith.constant 0 : i32
    %c0_i32_1 = arith.constant 0 : i32
    return %c0_i32, %c0_i32_0 : i32, i32
  }
  func.func @transform_17(%arg0: i32, %arg1: memref<24xi32, #tpu.memory_space<smem>>, %arg2: memref<24xi32, #tpu.memory_space<smem>>) -> (i32, i32) {
    %c0_i32 = arith.constant 0 : i32
    %c0_i32_0 = arith.constant 0 : i32
    %c0_i32_1 = arith.constant 0 : i32
    return %c0_i32, %c0_i32_0 : i32, i32
  }
  func.func @transform_18(%arg0: i32, %arg1: memref<24xi32, #tpu.memory_space<smem>>, %arg2: memref<24xi32, #tpu.memory_space<smem>>) -> (i32, i32) {
    %c0_i32 = arith.constant 0 : i32
    %c0_i32_0 = arith.constant 0 : i32
    %c0_i32_1 = arith.constant 0 : i32
    return %c0_i32, %c0_i32_0 : i32, i32
  }
  func.func @transform_19(%arg0: i32, %arg1: memref<24xi32, #tpu.memory_space<smem>>, %arg2: memref<24xi32, #tpu.memory_space<smem>>) -> (i32, i32) {
    %c0_i32 = arith.constant 0 : i32
    %c0_i32_0 = arith.constant 0 : i32
    %c0_i32_1 = arith.constant 0 : i32
    return %c0_i32, %c0_i32_0 : i32, i32
  }
  func.func @transform_20(%arg0: i32, %arg1: memref<24xi32, #tpu.memory_space<smem>>, %arg2: memref<24xi32, #tpu.memory_space<smem>>) -> (i32, i32) {
    %c0_i32 = arith.constant 0 : i32
    %c0_i32_0 = arith.constant 0 : i32
    %c0_i32_1 = arith.constant 0 : i32
    return %c0_i32, %c0_i32_0 : i32, i32
  }
  func.func @transform_21(%arg0: i32, %arg1: memref<24xi32, #tpu.memory_space<smem>>, %arg2: memref<24xi32, #tpu.memory_space<smem>>) -> (i32, i32) {
    %c0_i32 = arith.constant 0 : i32
    %c0_i32_0 = arith.constant 0 : i32
    return %arg0, %c0_i32 : i32, i32
  }
  func.func @transform_22(%arg0: i32, %arg1: memref<24xi32, #tpu.memory_space<smem>>, %arg2: memref<24xi32, #tpu.memory_space<smem>>) -> (i32, i32) {
    %c0_i32 = arith.constant 0 : i32
    %c0_i32_0 = arith.constant 0 : i32
    %c0_i32_1 = arith.constant 0 : i32
    return %c0_i32, %c0_i32_0 : i32, i32
  }
}

module attributes {stable_mosaic.version = 11 : i64} {
  func.func @kernel(%arg0: i32, %arg1: memref<24xi32, #tpu.memory_space<smem>>, %arg2: memref<24xi32, #tpu.memory_space<smem>>, %arg3: memref<16x32xf32, #tpu.memory_space<vmem>>, %arg4: memref<8x32xf32, #tpu.memory_space<vmem>>, %arg5: memref<32x32xf32, #tpu.memory_space<vmem>>, %arg6: memref<32x32xf32, #tpu.memory_space<vmem>>, %arg7: memref<32x32xf32, #tpu.memory_space<vmem>>, %arg8: memref<1x32xf32, #tpu.memory_space<vmem>>, %arg9: memref<32x32xf32, #tpu.memory_space<vmem>>, %arg10: memref<1x32xf32, #tpu.memory_space<vmem>>, %arg11: memref<32x32xf32, #tpu.memory_space<vmem>>, %arg12: memref<1x32xf32, #tpu.memory_space<vmem>>, %arg13: memref<1x32xf32, #tpu.memory_space<vmem>>, %arg14: memref<1x32xf32, #tpu.memory_space<vmem>>, %arg15: memref<32x32xf32, #tpu.memory_space<vmem>>, %arg16: memref<32x32xf32, #tpu.memory_space<vmem>>, %arg17: memref<1x32xf32, #tpu.memory_space<vmem>>, %arg18: memref<32x32xf32, #tpu.memory_space<vmem>>, %arg19: memref<1x32xf32, #tpu.memory_space<vmem>>, %arg20: memref<32x32xf32, #tpu.memory_space<vmem>>, %arg21: memref<1x32xf32, #tpu.memory_space<vmem>>, %arg22: memref<1x32xf32, #tpu.memory_space<vmem>>, %arg23: memref<1x32xf32, #tpu.memory_space<vmem>>, %arg24: memref<8x32xf32, #tpu.memory_space<vmem>>, %arg25: memref<16x32xf32, #tpu.memory_space<vmem>>, %arg26: memref<16x32xf32, #tpu.memory_space<vmem>>, %arg27: memref<16x32xf32, #tpu.memory_space<vmem>>, %arg28: memref<16x32xf32, #tpu.memory_space<vmem>>, %arg29: memref<8x32xf32, #tpu.memory_space<vmem>>, %arg30: memref<8x32xf32, #tpu.memory_space<vmem>>) attributes {dimension_semantics = [#tpu.dimension_semantics<arbitrary>], iteration_bounds = array<i64: 3>, scalar_prefetch = 2 : i64, scratch_operands = 5 : i64, tpu.core_type = #tpu.core_type<tc>, window_params = [{pipeline_mode = #tpu.pipeline_mode<synchronous>, transform_indices = @transform_0, window_bounds = array<i64: 16, 32>}, {transform_indices = @transform_1, window_bounds = array<i64: 8, 32>}, {pipeline_mode = #tpu.pipeline_mode<synchronous>, transform_indices = @transform_2, window_bounds = array<i64: 32, 32>}, {pipeline_mode = #tpu.pipeline_mode<synchronous>, transform_indices = @transform_3, window_bounds = array<i64: 32, 32>}, {pipeline_mode = #tpu.pipeline_mode<synchronous>, transform_indices = @transform_4, window_bounds = array<i64: 32, 32>}, {pipeline_mode = #tpu.pipeline_mode<synchronous>, transform_indices = @transform_5, window_bounds = array<i64: 1, 32>}, {pipeline_mode = #tpu.pipeline_mode<synchronous>, transform_indices = @transform_6, window_bounds = array<i64: 32, 32>}, {pipeline_mode = #tpu.pipeline_mode<synchronous>, transform_indices = @transform_7, window_bounds = array<i64: 1, 32>}, {pipeline_mode = #tpu.pipeline_mode<synchronous>, transform_indices = @transform_8, window_bounds = array<i64: 32, 32>}, {pipeline_mode = #tpu.pipeline_mode<synchronous>, transform_indices = @transform_9, window_bounds = array<i64: 1, 32>}, {pipeline_mode = #tpu.pipeline_mode<synchronous>, transform_indices = @transform_10, window_bounds = array<i64: 1, 32>}, {pipeline_mode = #tpu.pipeline_mode<synchronous>, transform_indices = @transform_11, window_bounds = array<i64: 1, 32>}, {pipeline_mode = #tpu.pipeline_mode<synchronous>, transform_indices = @transform_12, window_bounds = array<i64: 32, 32>}, {pipeline_mode = #tpu.pipeline_mode<synchronous>, transform_indices = @transform_13, window_bounds = array<i64: 32, 32>}, {pipeline_mode = #tpu.pipeline_mode<synchronous>, transform_indices = @transform_14, window_bounds = array<i64: 1, 32>}, {pipeline_mode = #tpu.pipeline_mode<synchronous>, transform_indices = @transform_15, window_bounds = array<i64: 32, 32>}, {pipeline_mode = #tpu.pipeline_mode<synchronous>, transform_indices = @transform_16, window_bounds = array<i64: 1, 32>}, {pipeline_mode = #tpu.pipeline_mode<synchronous>, transform_indices = @transform_17, window_bounds = array<i64: 32, 32>}, {pipeline_mode = #tpu.pipeline_mode<synchronous>, transform_indices = @transform_18, window_bounds = array<i64: 1, 32>}, {pipeline_mode = #tpu.pipeline_mode<synchronous>, transform_indices = @transform_19, window_bounds = array<i64: 1, 32>}, {pipeline_mode = #tpu.pipeline_mode<synchronous>, transform_indices = @transform_20, window_bounds = array<i64: 1, 32>}, {transform_indices = @transform_21, window_bounds = array<i64: 8, 32>}, {pipeline_mode = #tpu.pipeline_mode<synchronous>, transform_indices = @transform_22, window_bounds = array<i64: 16, 32>}]} {
    %c0_i32 = arith.constant 0 : i32
    %0 = arith.cmpi eq, %arg0, %c0_i32 : i32
    %1 = arith.extui %0 : i1 to i32
    %c0_i32_0 = arith.constant 0 : i32
    %2 = arith.cmpi ne, %1, %c0_i32_0 : i32
    scf.if %2 {
      %c0_43 = arith.constant 0 : index
      %c0_44 = arith.constant 0 : index
      %58 = vector.load %arg3[%c0_43, %c0_44] : memref<16x32xf32, #tpu.memory_space<vmem>>, vector<16x32xf32>
      %c0_45 = arith.constant 0 : index
      %c0_46 = arith.constant 0 : index
      %59 = vector.load %arg5[%c0_45, %c0_46] : memref<32x32xf32, #tpu.memory_space<vmem>>, vector<32x32xf32>
      %cst_47 = arith.constant dense<0.000000e+00> : vector<16x32xf32>
      %60 = tpu.matmul %58, %59, %cst_47 {dimension_numbers = #tpu.dot_dimension_numbers<[1], [0], [0], [1], [0, 0, 1, 1], [], []>} : vector<16x32xf32>, vector<32x32xf32>, vector<16x32xf32> -> vector<16x32xf32>
      %c0_48 = arith.constant 0 : index
      %c0_49 = arith.constant 0 : index
      %61 = vector.load %arg26[%c0_48, %c0_49] : memref<16x32xf32, #tpu.memory_space<vmem>>, vector<16x32xf32>
      tpu.vector_store %arg26[%c0_48, %c0_49], %60 {strides = array<i32>} : memref<16x32xf32, #tpu.memory_space<vmem>>, vector<16x32xf32>,
      %c0_50 = arith.constant 0 : index
      %c0_51 = arith.constant 0 : index
      %62 = vector.load %arg6[%c0_50, %c0_51] : memref<32x32xf32, #tpu.memory_space<vmem>>, vector<32x32xf32>
      %cst_52 = arith.constant dense<0.000000e+00> : vector<16x32xf32>
      %63 = tpu.matmul %58, %62, %cst_52 {dimension_numbers = #tpu.dot_dimension_numbers<[1], [0], [0], [1], [0, 0, 1, 1], [], []>} : vector<16x32xf32>, vector<32x32xf32>, vector<16x32xf32> -> vector<16x32xf32>
      %c0_53 = arith.constant 0 : index
      %c0_54 = arith.constant 0 : index
      %64 = vector.load %arg27[%c0_53, %c0_54] : memref<16x32xf32, #tpu.memory_space<vmem>>, vector<16x32xf32>
      tpu.vector_store %arg27[%c0_53, %c0_54], %63 {strides = array<i32>} : memref<16x32xf32, #tpu.memory_space<vmem>>, vector<16x32xf32>,
      %cst_55 = arith.constant 0.000000e+00 : f32
      %65 = vector.broadcast %cst_55 : f32 to vector<16x32xf32>
      %c0_56 = arith.constant 0 : index
      %c0_57 = arith.constant 0 : index
      %66 = vector.load %arg28[%c0_56, %c0_57] : memref<16x32xf32, #tpu.memory_space<vmem>>, vector<16x32xf32>
      tpu.vector_store %arg28[%c0_56, %c0_57], %65 {strides = array<i32>} : memref<16x32xf32, #tpu.memory_space<vmem>>, vector<16x32xf32>,
    } else {
    }
    %c0 = arith.constant 0 : index
    %c0_1 = arith.constant 0 : index
    %3 = vector.load %arg4[%c0, %c0_1] : memref<8x32xf32, #tpu.memory_space<vmem>>, vector<8x32xf32>
    %c0_2 = arith.constant 0 : index
    %c0_3 = arith.constant 0 : index
    %4 = vector.load %arg7[%c0_2, %c0_3] : memref<32x32xf32, #tpu.memory_space<vmem>>, vector<32x32xf32>
    %cst = arith.constant dense<0.000000e+00> : vector<8x32xf32>
    %5 = tpu.matmul %3, %4, %cst {dimension_numbers = #tpu.dot_dimension_numbers<[1], [0], [0], [1], [0, 0, 1, 1], [], []>} : vector<8x32xf32>, vector<32x32xf32>, vector<8x32xf32> -> vector<8x32xf32>
    %c0_4 = arith.constant 0 : index
    %c0_5 = arith.constant 0 : index
    %6 = vector.load %arg8[%c0_4, %c0_5] : memref<1x32xf32, #tpu.memory_space<vmem>>, vector<1x32xf32>
    %7 = vector.broadcast %6 : vector<1x32xf32> to vector<8x32xf32>
    %8 = arith.addf %5, %7 : vector<8x32xf32>
    %c0_6 = arith.constant 0 : index
    %c0_7 = arith.constant 0 : index
    %9 = vector.load %arg29[%c0_6, %c0_7] : memref<8x32xf32, #tpu.memory_space<vmem>>, vector<8x32xf32>
    tpu.vector_store %arg29[%c0_6, %c0_7], %8 {strides = array<i32>} : memref<8x32xf32, #tpu.memory_space<vmem>>, vector<8x32xf32>,
    %c8_i32 = arith.constant 8 : i32
    %10 = arith.muli %arg0, %c8_i32 : i32
    %c0_i32_8 = arith.constant 0 : i32
    %c8_i32_9 = arith.constant 8 : i32
    %11 = arith.addi %c0_i32_8, %c8_i32_9 : i32
    %c1_i32 = arith.constant 1 : i32
    scf.for %arg31 = %c0_i32_8 to %11 step %c1_i32  : i32 {
      %58 = arith.addi %10, %arg31 : i32
      %59 = arith.index_cast %58 : i32 to index
      %60 = memref.load %arg1[%59] : memref<24xi32, #tpu.memory_space<smem>>
      %61 = arith.addi %10, %arg31 : i32
      %62 = arith.index_cast %61 : i32 to index
      %63 = memref.load %arg2[%62] : memref<24xi32, #tpu.memory_space<smem>>
      %64 = arith.index_cast %arg31 : i32 to index
      %c0_43 = arith.constant 0 : index
      %65 = vector.load %arg29[%64, %c0_43] : memref<8x32xf32, #tpu.memory_space<vmem>>, vector<1x32xf32>
      %66 = arith.index_cast %60 : i32 to index
      %c0_44 = arith.constant 0 : index
      %67 = vector.load %arg26[%66, %c0_44] : memref<16x32xf32, #tpu.memory_space<vmem>>, vector<1x32xf32>
      %68 = arith.addf %65, %67 : vector<1x32xf32>
      %69 = arith.index_cast %63 : i32 to index
      %c0_45 = arith.constant 0 : index
      %70 = vector.load %arg27[%69, %c0_45] : memref<16x32xf32, #tpu.memory_space<vmem>>, vector<1x32xf32>
      %71 = arith.addf %68, %70 : vector<1x32xf32>
      %72 = arith.index_cast %arg31 : i32 to index
      %c0_46 = arith.constant 0 : index
      %73 = vector.load %arg29[%72, %c0_46] : memref<8x32xf32, #tpu.memory_space<vmem>>, vector<1x32xf32>
      tpu.vector_store %arg29[%72, %c0_46], %71 {strides = array<i32>} : memref<8x32xf32, #tpu.memory_space<vmem>>, vector<1x32xf32>,
    }
    %c8_i32_10 = arith.constant 8 : i32
    %c0_11 = arith.constant 0 : index
    %c0_12 = arith.constant 0 : index
    %12 = vector.load %arg29[%c0_11, %c0_12] : memref<8x32xf32, #tpu.memory_space<vmem>>, vector<8x32xf32>
    %cst_13 = arith.constant 0.000000e+00 : f32
    %13 = vector.broadcast %cst_13 : f32 to vector<8x32xf32>
    %14 = arith.maximumf %12, %13 : vector<8x32xf32>
    %c0_14 = arith.constant 0 : index
    %c0_15 = arith.constant 0 : index
    %15 = vector.load %arg9[%c0_14, %c0_15] : memref<32x32xf32, #tpu.memory_space<vmem>>, vector<32x32xf32>
    %cst_16 = arith.constant dense<0.000000e+00> : vector<8x32xf32>
    %16 = tpu.matmul %14, %15, %cst_16 {dimension_numbers = #tpu.dot_dimension_numbers<[1], [0], [0], [1], [0, 0, 1, 1], [], []>} : vector<8x32xf32>, vector<32x32xf32>, vector<8x32xf32> -> vector<8x32xf32>
    %c0_17 = arith.constant 0 : index
    %c0_18 = arith.constant 0 : index
    %17 = vector.load %arg10[%c0_17, %c0_18] : memref<1x32xf32, #tpu.memory_space<vmem>>, vector<1x32xf32>
    %18 = vector.broadcast %17 : vector<1x32xf32> to vector<8x32xf32>
    %19 = arith.addf %16, %18 : vector<8x32xf32>
    %cst_19 = arith.constant 0.000000e+00 : f32
    %20 = vector.broadcast %cst_19 : f32 to vector<8x32xf32>
    %21 = arith.maximumf %19, %20 : vector<8x32xf32>
    %c0_20 = arith.constant 0 : index
    %c0_21 = arith.constant 0 : index
    %22 = vector.load %arg11[%c0_20, %c0_21] : memref<32x32xf32, #tpu.memory_space<vmem>>, vector<32x32xf32>
    %cst_22 = arith.constant dense<0.000000e+00> : vector<8x32xf32>
    %23 = tpu.matmul %21, %22, %cst_22 {dimension_numbers = #tpu.dot_dimension_numbers<[1], [0], [0], [1], [0, 0, 1, 1], [], []>} : vector<8x32xf32>, vector<32x32xf32>, vector<8x32xf32> -> vector<8x32xf32>
    %c0_23 = arith.constant 0 : index
    %c0_24 = arith.constant 0 : index
    %24 = vector.load %arg12[%c0_23, %c0_24] : memref<1x32xf32, #tpu.memory_space<vmem>>, vector<1x32xf32>
    %25 = vector.broadcast %24 : vector<1x32xf32> to vector<8x32xf32>
    %26 = arith.addf %23, %25 : vector<8x32xf32>
    %c0_25 = arith.constant 0 : index
    %c0_26 = arith.constant 0 : index
    %27 = vector.load %arg13[%c0_25, %c0_26] : memref<1x32xf32, #tpu.memory_space<vmem>>, vector<1x32xf32>
    %c0_27 = arith.constant 0 : index
    %c0_28 = arith.constant 0 : index
    %28 = vector.load %arg14[%c0_27, %c0_28] : memref<1x32xf32, #tpu.memory_space<vmem>>, vector<1x32xf32>
    %cst_29 = arith.constant dense<0.000000e+00> : vector<8xf32>
    %29 = vector.multi_reduction <add>, %26, %cst_29 [1] : vector<8x32xf32> to vector<8xf32>
    %30 = vector.shape_cast %29 : vector<8xf32> to vector<8x1xf32>
    %cst_30 = arith.constant 3.200000e+01 : f32
    %31 = vector.broadcast %cst_30 : f32 to vector<8x1xf32>
    %32 = arith.divf %30, %31 : vector<8x1xf32>
    %33 = vector.broadcast %32 : vector<8x1xf32> to vector<8x32xf32>
    %34 = arith.subf %26, %33 : vector<8x32xf32>
    %35 = arith.mulf %34, %34 : vector<8x32xf32>
    %cst_31 = arith.constant dense<0.000000e+00> : vector<8xf32>
    %36 = vector.multi_reduction <add>, %35, %cst_31 [1] : vector<8x32xf32> to vector<8xf32>
    %37 = vector.shape_cast %36 : vector<8xf32> to vector<8x1xf32>
    %cst_32 = arith.constant 3.200000e+01 : f32
    %38 = vector.broadcast %cst_32 : f32 to vector<8x1xf32>
    %39 = arith.divf %37, %38 : vector<8x1xf32>
    %40 = vector.broadcast %32 : vector<8x1xf32> to vector<8x32xf32>
    %41 = arith.subf %26, %40 : vector<8x32xf32>
    %cst_33 = arith.constant 9.99999974E-6 : f32
    %42 = vector.broadcast %cst_33 : f32 to vector<8x1xf32>
    %43 = arith.addf %39, %42 : vector<8x1xf32>
    %44 = math.rsqrt %43 : vector<8x1xf32>
    %45 = vector.broadcast %44 : vector<8x1xf32> to vector<8x32xf32>
    %46 = arith.mulf %41, %45 : vector<8x32xf32>
    %47 = vector.broadcast %27 : vector<1x32xf32> to vector<8x32xf32>
    %48 = arith.mulf %46, %47 : vector<8x32xf32>
    %49 = vector.broadcast %28 : vector<1x32xf32> to vector<8x32xf32>
    %50 = arith.addf %48, %49 : vector<8x32xf32>
    %c0_34 = arith.constant 0 : index
    %c0_35 = arith.constant 0 : index
    %51 = vector.load %arg30[%c0_34, %c0_35] : memref<8x32xf32, #tpu.memory_space<vmem>>, vector<8x32xf32>
    tpu.vector_store %arg30[%c0_34, %c0_35], %50 {strides = array<i32>} : memref<8x32xf32, #tpu.memory_space<vmem>>, vector<8x32xf32>,
    %52 = arith.addf %3, %50 : vector<8x32xf32>
    %c0_36 = arith.constant 0 : index
    %c0_37 = arith.constant 0 : index
    %53 = vector.load %arg24[%c0_36, %c0_37] : memref<8x32xf32, #tpu.memory_space<vmem>>, vector<8x32xf32>
    tpu.vector_store %arg24[%c0_36, %c0_37], %52 {strides = array<i32>} : memref<8x32xf32, #tpu.memory_space<vmem>>, vector<8x32xf32>,
    %c0_i32_38 = arith.constant 0 : i32
    %c8_i32_39 = arith.constant 8 : i32
    %54 = arith.addi %c0_i32_38, %c8_i32_39 : i32
    %c1_i32_40 = arith.constant 1 : i32
    scf.for %arg31 = %c0_i32_38 to %54 step %c1_i32_40  : i32 {
      %58 = arith.addi %10, %arg31 : i32
      %59 = arith.index_cast %58 : i32 to index
      %60 = memref.load %arg1[%59] : memref<24xi32, #tpu.memory_space<smem>>
      %61 = arith.index_cast %60 : i32 to index
      %c0_43 = arith.constant 0 : index
      %62 = vector.load %arg28[%61, %c0_43] : memref<16x32xf32, #tpu.memory_space<vmem>>, vector<1x32xf32>
      %63 = arith.index_cast %arg31 : i32 to index
      %c0_44 = arith.constant 0 : index
      %64 = vector.load %arg30[%63, %c0_44] : memref<8x32xf32, #tpu.memory_space<vmem>>, vector<1x32xf32>
      %65 = arith.addf %62, %64 : vector<1x32xf32>
      %66 = arith.index_cast %60 : i32 to index
      %c0_45 = arith.constant 0 : index
      %67 = vector.load %arg28[%66, %c0_45] : memref<16x32xf32, #tpu.memory_space<vmem>>, vector<1x32xf32>
      tpu.vector_store %arg28[%66, %c0_45], %65 {strides = array<i32>} : memref<16x32xf32, #tpu.memory_space<vmem>>, vector<1x32xf32>,
    }
    %c8_i32_41 = arith.constant 8 : i32
    %c2_i32 = arith.constant 2 : i32
    %55 = arith.cmpi eq, %arg0, %c2_i32 : i32
    %56 = arith.extui %55 : i1 to i32
    %c0_i32_42 = arith.constant 0 : i32
    %57 = arith.cmpi ne, %56, %c0_i32_42 : i32
    scf.if %57 {
      %c0_43 = arith.constant 0 : index
      %c0_44 = arith.constant 0 : index
      %58 = vector.load %arg3[%c0_43, %c0_44] : memref<16x32xf32, #tpu.memory_space<vmem>>, vector<16x32xf32>
      %c0_45 = arith.constant 0 : index
      %c0_46 = arith.constant 0 : index
      %59 = vector.load %arg28[%c0_45, %c0_46] : memref<16x32xf32, #tpu.memory_space<vmem>>, vector<16x32xf32>
      %c0_47 = arith.constant 0 : index
      %c0_48 = arith.constant 0 : index
      %60 = vector.load %arg15[%c0_47, %c0_48] : memref<32x32xf32, #tpu.memory_space<vmem>>, vector<32x32xf32>
      %cst_49 = arith.constant dense<0.000000e+00> : vector<16x32xf32>
      %61 = tpu.matmul %59, %60, %cst_49 {dimension_numbers = #tpu.dot_dimension_numbers<[1], [0], [0], [1], [0, 0, 1, 1], [], []>} : vector<16x32xf32>, vector<32x32xf32>, vector<16x32xf32> -> vector<16x32xf32>
      %c0_50 = arith.constant 0 : index
      %c0_51 = arith.constant 0 : index
      %62 = vector.load %arg16[%c0_50, %c0_51] : memref<32x32xf32, #tpu.memory_space<vmem>>, vector<32x32xf32>
      %cst_52 = arith.constant dense<0.000000e+00> : vector<16x32xf32>
      %63 = tpu.matmul %58, %62, %cst_52 {dimension_numbers = #tpu.dot_dimension_numbers<[1], [0], [0], [1], [0, 0, 1, 1], [], []>} : vector<16x32xf32>, vector<32x32xf32>, vector<16x32xf32> -> vector<16x32xf32>
      %64 = arith.addf %61, %63 : vector<16x32xf32>
      %c0_53 = arith.constant 0 : index
      %c0_54 = arith.constant 0 : index
      %65 = vector.load %arg17[%c0_53, %c0_54] : memref<1x32xf32, #tpu.memory_space<vmem>>, vector<1x32xf32>
      %66 = vector.broadcast %65 : vector<1x32xf32> to vector<16x32xf32>
      %67 = arith.addf %64, %66 : vector<16x32xf32>
      %cst_55 = arith.constant 0.000000e+00 : f32
      %68 = vector.broadcast %cst_55 : f32 to vector<16x32xf32>
      %69 = arith.maximumf %67, %68 : vector<16x32xf32>
      %c0_56 = arith.constant 0 : index
      %c0_57 = arith.constant 0 : index
      %70 = vector.load %arg18[%c0_56, %c0_57] : memref<32x32xf32, #tpu.memory_space<vmem>>, vector<32x32xf32>
      %cst_58 = arith.constant dense<0.000000e+00> : vector<16x32xf32>
      %71 = tpu.matmul %69, %70, %cst_58 {dimension_numbers = #tpu.dot_dimension_numbers<[1], [0], [0], [1], [0, 0, 1, 1], [], []>} : vector<16x32xf32>, vector<32x32xf32>, vector<16x32xf32> -> vector<16x32xf32>
      %c0_59 = arith.constant 0 : index
      %c0_60 = arith.constant 0 : index
      %72 = vector.load %arg19[%c0_59, %c0_60] : memref<1x32xf32, #tpu.memory_space<vmem>>, vector<1x32xf32>
      %73 = vector.broadcast %72 : vector<1x32xf32> to vector<16x32xf32>
      %74 = arith.addf %71, %73 : vector<16x32xf32>
      %cst_61 = arith.constant 0.000000e+00 : f32
      %75 = vector.broadcast %cst_61 : f32 to vector<16x32xf32>
      %76 = arith.maximumf %74, %75 : vector<16x32xf32>
      %c0_62 = arith.constant 0 : index
      %c0_63 = arith.constant 0 : index
      %77 = vector.load %arg20[%c0_62, %c0_63] : memref<32x32xf32, #tpu.memory_space<vmem>>, vector<32x32xf32>
      %cst_64 = arith.constant dense<0.000000e+00> : vector<16x32xf32>
      %78 = tpu.matmul %76, %77, %cst_64 {dimension_numbers = #tpu.dot_dimension_numbers<[1], [0], [0], [1], [0, 0, 1, 1], [], []>} : vector<16x32xf32>, vector<32x32xf32>, vector<16x32xf32> -> vector<16x32xf32>
      %c0_65 = arith.constant 0 : index
      %c0_66 = arith.constant 0 : index
      %79 = vector.load %arg21[%c0_65, %c0_66] : memref<1x32xf32, #tpu.memory_space<vmem>>, vector<1x32xf32>
      %80 = vector.broadcast %79 : vector<1x32xf32> to vector<16x32xf32>
      %81 = arith.addf %78, %80 : vector<16x32xf32>
      %c0_67 = arith.constant 0 : index
      %c0_68 = arith.constant 0 : index
      %82 = vector.load %arg22[%c0_67, %c0_68] : memref<1x32xf32, #tpu.memory_space<vmem>>, vector<1x32xf32>
      %c0_69 = arith.constant 0 : index
      %c0_70 = arith.constant 0 : index
      %83 = vector.load %arg23[%c0_69, %c0_70] : memref<1x32xf32, #tpu.memory_space<vmem>>, vector<1x32xf32>
      %cst_71 = arith.constant dense<0.000000e+00> : vector<16xf32>
      %84 = vector.multi_reduction <add>, %81, %cst_71 [1] : vector<16x32xf32> to vector<16xf32>
      %85 = vector.shape_cast %84 : vector<16xf32> to vector<16x1xf32>
      %cst_72 = arith.constant 3.200000e+01 : f32
      %86 = vector.broadcast %cst_72 : f32 to vector<16x1xf32>
      %87 = arith.divf %85, %86 : vector<16x1xf32>
      %88 = vector.broadcast %87 : vector<16x1xf32> to vector<16x32xf32>
      %89 = arith.subf %81, %88 : vector<16x32xf32>
      %90 = arith.mulf %89, %89 : vector<16x32xf32>
      %cst_73 = arith.constant dense<0.000000e+00> : vector<16xf32>
      %91 = vector.multi_reduction <add>, %90, %cst_73 [1] : vector<16x32xf32> to vector<16xf32>
      %92 = vector.shape_cast %91 : vector<16xf32> to vector<16x1xf32>
      %cst_74 = arith.constant 3.200000e+01 : f32
      %93 = vector.broadcast %cst_74 : f32 to vector<16x1xf32>
      %94 = arith.divf %92, %93 : vector<16x1xf32>
      %95 = vector.broadcast %87 : vector<16x1xf32> to vector<16x32xf32>
      %96 = arith.subf %81, %95 : vector<16x32xf32>
      %cst_75 = arith.constant 9.99999974E-6 : f32
      %97 = vector.broadcast %cst_75 : f32 to vector<16x1xf32>
      %98 = arith.addf %94, %97 : vector<16x1xf32>
      %99 = math.rsqrt %98 : vector<16x1xf32>
      %100 = vector.broadcast %99 : vector<16x1xf32> to vector<16x32xf32>
      %101 = arith.mulf %96, %100 : vector<16x32xf32>
      %102 = vector.broadcast %82 : vector<1x32xf32> to vector<16x32xf32>
      %103 = arith.mulf %101, %102 : vector<16x32xf32>
      %104 = vector.broadcast %83 : vector<1x32xf32> to vector<16x32xf32>
      %105 = arith.addf %103, %104 : vector<16x32xf32>
      %106 = arith.addf %58, %105 : vector<16x32xf32>
      %c0_76 = arith.constant 0 : index
      %c0_77 = arith.constant 0 : index
      %107 = vector.load %arg25[%c0_76, %c0_77] : memref<16x32xf32, #tpu.memory_space<vmem>>, vector<16x32xf32>
      tpu.vector_store %arg25[%c0_76, %c0_77], %106 {strides = array<i32>} : memref<16x32xf32, #tpu.memory_space<vmem>>, vector<16x32xf32>,
    } else {
    }
    return
  }
  func.func @transform_0(%arg0: i32, %arg1: memref<24xi32, #tpu.memory_space<smem>>, %arg2: memref<24xi32, #tpu.memory_space<smem>>) -> (i32, i32) {
    %c0_i32 = arith.constant 0 : i32
    %c0_i32_0 = arith.constant 0 : i32
    %c0_i32_1 = arith.constant 0 : i32
    return %c0_i32, %c0_i32_0 : i32, i32
  }
  func.func @transform_1(%arg0: i32, %arg1: memref<24xi32, #tpu.memory_space<smem>>, %arg2: memref<24xi32, #tpu.memory_space<smem>>) -> (i32, i32) {
    %c0_i32 = arith.constant 0 : i32
    %c0_i32_0 = arith.constant 0 : i32
    return %arg0, %c0_i32 : i32, i32
  }
  func.func @transform_2(%arg0: i32, %arg1: memref<24xi32, #tpu.memory_space<smem>>, %arg2: memref<24xi32, #tpu.memory_space<smem>>) -> (i32, i32) {
    %c0_i32 = arith.constant 0 : i32
    %c0_i32_0 = arith.constant 0 : i32
    %c0_i32_1 = arith.constant 0 : i32
    return %c0_i32, %c0_i32_0 : i32, i32
  }
  func.func @transform_3(%arg0: i32, %arg1: memref<24xi32, #tpu.memory_space<smem>>, %arg2: memref<24xi32, #tpu.memory_space<smem>>) -> (i32, i32) {
    %c0_i32 = arith.constant 0 : i32
    %c0_i32_0 = arith.constant 0 : i32
    %c0_i32_1 = arith.constant 0 : i32
    return %c0_i32, %c0_i32_0 : i32, i32
  }
  func.func @transform_4(%arg0: i32, %arg1: memref<24xi32, #tpu.memory_space<smem>>, %arg2: memref<24xi32, #tpu.memory_space<smem>>) -> (i32, i32) {
    %c0_i32 = arith.constant 0 : i32
    %c0_i32_0 = arith.constant 0 : i32
    %c0_i32_1 = arith.constant 0 : i32
    return %c0_i32, %c0_i32_0 : i32, i32
  }
  func.func @transform_5(%arg0: i32, %arg1: memref<24xi32, #tpu.memory_space<smem>>, %arg2: memref<24xi32, #tpu.memory_space<smem>>) -> (i32, i32) {
    %c0_i32 = arith.constant 0 : i32
    %c0_i32_0 = arith.constant 0 : i32
    %c0_i32_1 = arith.constant 0 : i32
    return %c0_i32, %c0_i32_0 : i32, i32
  }
  func.func @transform_6(%arg0: i32, %arg1: memref<24xi32, #tpu.memory_space<smem>>, %arg2: memref<24xi32, #tpu.memory_space<smem>>) -> (i32, i32) {
    %c0_i32 = arith.constant 0 : i32
    %c0_i32_0 = arith.constant 0 : i32
    %c0_i32_1 = arith.constant 0 : i32
    return %c0_i32, %c0_i32_0 : i32, i32
  }
  func.func @transform_7(%arg0: i32, %arg1: memref<24xi32, #tpu.memory_space<smem>>, %arg2: memref<24xi32, #tpu.memory_space<smem>>) -> (i32, i32) {
    %c0_i32 = arith.constant 0 : i32
    %c0_i32_0 = arith.constant 0 : i32
    %c0_i32_1 = arith.constant 0 : i32
    return %c0_i32, %c0_i32_0 : i32, i32
  }
  func.func @transform_8(%arg0: i32, %arg1: memref<24xi32, #tpu.memory_space<smem>>, %arg2: memref<24xi32, #tpu.memory_space<smem>>) -> (i32, i32) {
    %c0_i32 = arith.constant 0 : i32
    %c0_i32_0 = arith.constant 0 : i32
    %c0_i32_1 = arith.constant 0 : i32
    return %c0_i32, %c0_i32_0 : i32, i32
  }
  func.func @transform_9(%arg0: i32, %arg1: memref<24xi32, #tpu.memory_space<smem>>, %arg2: memref<24xi32, #tpu.memory_space<smem>>) -> (i32, i32) {
    %c0_i32 = arith.constant 0 : i32
    %c0_i32_0 = arith.constant 0 : i32
    %c0_i32_1 = arith.constant 0 : i32
    return %c0_i32, %c0_i32_0 : i32, i32
  }
  func.func @transform_10(%arg0: i32, %arg1: memref<24xi32, #tpu.memory_space<smem>>, %arg2: memref<24xi32, #tpu.memory_space<smem>>) -> (i32, i32) {
    %c0_i32 = arith.constant 0 : i32
    %c0_i32_0 = arith.constant 0 : i32
    %c0_i32_1 = arith.constant 0 : i32
    return %c0_i32, %c0_i32_0 : i32, i32
  }
  func.func @transform_11(%arg0: i32, %arg1: memref<24xi32, #tpu.memory_space<smem>>, %arg2: memref<24xi32, #tpu.memory_space<smem>>) -> (i32, i32) {
    %c0_i32 = arith.constant 0 : i32
    %c0_i32_0 = arith.constant 0 : i32
    %c0_i32_1 = arith.constant 0 : i32
    return %c0_i32, %c0_i32_0 : i32, i32
  }
  func.func @transform_12(%arg0: i32, %arg1: memref<24xi32, #tpu.memory_space<smem>>, %arg2: memref<24xi32, #tpu.memory_space<smem>>) -> (i32, i32) {
    %c0_i32 = arith.constant 0 : i32
    %c0_i32_0 = arith.constant 0 : i32
    %c0_i32_1 = arith.constant 0 : i32
    return %c0_i32, %c0_i32_0 : i32, i32
  }
  func.func @transform_13(%arg0: i32, %arg1: memref<24xi32, #tpu.memory_space<smem>>, %arg2: memref<24xi32, #tpu.memory_space<smem>>) -> (i32, i32) {
    %c0_i32 = arith.constant 0 : i32
    %c0_i32_0 = arith.constant 0 : i32
    %c0_i32_1 = arith.constant 0 : i32
    return %c0_i32, %c0_i32_0 : i32, i32
  }
  func.func @transform_14(%arg0: i32, %arg1: memref<24xi32, #tpu.memory_space<smem>>, %arg2: memref<24xi32, #tpu.memory_space<smem>>) -> (i32, i32) {
    %c0_i32 = arith.constant 0 : i32
    %c0_i32_0 = arith.constant 0 : i32
    %c0_i32_1 = arith.constant 0 : i32
    return %c0_i32, %c0_i32_0 : i32, i32
  }
  func.func @transform_15(%arg0: i32, %arg1: memref<24xi32, #tpu.memory_space<smem>>, %arg2: memref<24xi32, #tpu.memory_space<smem>>) -> (i32, i32) {
    %c0_i32 = arith.constant 0 : i32
    %c0_i32_0 = arith.constant 0 : i32
    %c0_i32_1 = arith.constant 0 : i32
    return %c0_i32, %c0_i32_0 : i32, i32
  }
  func.func @transform_16(%arg0: i32, %arg1: memref<24xi32, #tpu.memory_space<smem>>, %arg2: memref<24xi32, #tpu.memory_space<smem>>) -> (i32, i32) {
    %c0_i32 = arith.constant 0 : i32
    %c0_i32_0 = arith.constant 0 : i32
    %c0_i32_1 = arith.constant 0 : i32
    return %c0_i32, %c0_i32_0 : i32, i32
  }
  func.func @transform_17(%arg0: i32, %arg1: memref<24xi32, #tpu.memory_space<smem>>, %arg2: memref<24xi32, #tpu.memory_space<smem>>) -> (i32, i32) {
    %c0_i32 = arith.constant 0 : i32
    %c0_i32_0 = arith.constant 0 : i32
    %c0_i32_1 = arith.constant 0 : i32
    return %c0_i32, %c0_i32_0 : i32, i32
  }
  func.func @transform_18(%arg0: i32, %arg1: memref<24xi32, #tpu.memory_space<smem>>, %arg2: memref<24xi32, #tpu.memory_space<smem>>) -> (i32, i32) {
    %c0_i32 = arith.constant 0 : i32
    %c0_i32_0 = arith.constant 0 : i32
    %c0_i32_1 = arith.constant 0 : i32
    return %c0_i32, %c0_i32_0 : i32, i32
  }
  func.func @transform_19(%arg0: i32, %arg1: memref<24xi32, #tpu.memory_space<smem>>, %arg2: memref<24xi32, #tpu.memory_space<smem>>) -> (i32, i32) {
    %c0_i32 = arith.constant 0 : i32
    %c0_i32_0 = arith.constant 0 : i32
    %c0_i32_1 = arith.constant 0 : i32
    return %c0_i32, %c0_i32_0 : i32, i32
  }
  func.func @transform_20(%arg0: i32, %arg1: memref<24xi32, #tpu.memory_space<smem>>, %arg2: memref<24xi32, #tpu.memory_space<smem>>) -> (i32, i32) {
    %c0_i32 = arith.constant 0 : i32
    %c0_i32_0 = arith.constant 0 : i32
    %c0_i32_1 = arith.constant 0 : i32
    return %c0_i32, %c0_i32_0 : i32, i32
  }
  func.func @transform_21(%arg0: i32, %arg1: memref<24xi32, #tpu.memory_space<smem>>, %arg2: memref<24xi32, #tpu.memory_space<smem>>) -> (i32, i32) {
    %c0_i32 = arith.constant 0 : i32
    %c0_i32_0 = arith.constant 0 : i32
    return %arg0, %c0_i32 : i32, i32
  }
  func.func @transform_22(%arg0: i32, %arg1: memref<24xi32, #tpu.memory_space<smem>>, %arg2: memref<24xi32, #tpu.memory_space<smem>>) -> (i32, i32) {
    %c0_i32 = arith.constant 0 : i32
    %c0_i32_0 = arith.constant 0 : i32
    %c0_i32_1 = arith.constant 0 : i32
    return %c0_i32, %c0_i32_0 : i32, i32
  }
}

module attributes {stable_mosaic.version = 11 : i64} {
  func.func @kernel(%arg0: i32, %arg1: memref<8x32xf32, #tpu.memory_space<vmem>>, %arg2: memref<32x32xf32, #tpu.memory_space<vmem>>, %arg3: memref<1x32xf32, #tpu.memory_space<vmem>>, %arg4: memref<32x32xf32, #tpu.memory_space<vmem>>, %arg5: memref<1x32xf32, #tpu.memory_space<vmem>>, %arg6: memref<32x16xf32, #tpu.memory_space<vmem>>, %arg7: memref<1x16xf32, #tpu.memory_space<vmem>>, %arg8: memref<16x32xf32, #tpu.memory_space<vmem>>, %arg9: memref<1x32xf32, #tpu.memory_space<vmem>>, %arg10: memref<32x32xf32, #tpu.memory_space<vmem>>, %arg11: memref<1x32xf32, #tpu.memory_space<vmem>>, %arg12: memref<32x128xf32, #tpu.memory_space<vmem>>, %arg13: memref<1x128xf32, #tpu.memory_space<vmem>>, %arg14: memref<8x128xf32, #tpu.memory_space<vmem>>) attributes {dimension_semantics = [#tpu.dimension_semantics<parallel>], iteration_bounds = array<i64: 2>, scalar_prefetch = 0 : i64, scratch_operands = 0 : i64, tpu.core_type = #tpu.core_type<tc>, window_params = [{transform_indices = @transform_0, window_bounds = array<i64: 8, 32>}, {pipeline_mode = #tpu.pipeline_mode<synchronous>, transform_indices = @transform_1, window_bounds = array<i64: 32, 32>}, {pipeline_mode = #tpu.pipeline_mode<synchronous>, transform_indices = @transform_2, window_bounds = array<i64: 1, 32>}, {pipeline_mode = #tpu.pipeline_mode<synchronous>, transform_indices = @transform_3, window_bounds = array<i64: 32, 32>}, {pipeline_mode = #tpu.pipeline_mode<synchronous>, transform_indices = @transform_4, window_bounds = array<i64: 1, 32>}, {pipeline_mode = #tpu.pipeline_mode<synchronous>, transform_indices = @transform_5, window_bounds = array<i64: 32, 16>}, {pipeline_mode = #tpu.pipeline_mode<synchronous>, transform_indices = @transform_6, window_bounds = array<i64: 1, 16>}, {pipeline_mode = #tpu.pipeline_mode<synchronous>, transform_indices = @transform_7, window_bounds = array<i64: 16, 32>}, {pipeline_mode = #tpu.pipeline_mode<synchronous>, transform_indices = @transform_8, window_bounds = array<i64: 1, 32>}, {pipeline_mode = #tpu.pipeline_mode<synchronous>, transform_indices = @transform_9, window_bounds = array<i64: 32, 32>}, {pipeline_mode = #tpu.pipeline_mode<synchronous>, transform_indices = @transform_10, window_bounds = array<i64: 1, 32>}, {pipeline_mode = #tpu.pipeline_mode<synchronous>, transform_indices = @transform_11, window_bounds = array<i64: 32, 128>}, {pipeline_mode = #tpu.pipeline_mode<synchronous>, transform_indices = @transform_12, window_bounds = array<i64: 1, 128>}, {transform_indices = @transform_13, window_bounds = array<i64: 8, 128>}]} {
    %c0 = arith.constant 0 : index
    %c0_0 = arith.constant 0 : index
    %0 = vector.load %arg2[%c0, %c0_0] : memref<32x32xf32, #tpu.memory_space<vmem>>, vector<32x32xf32>
    %c0_1 = arith.constant 0 : index
    %c0_2 = arith.constant 0 : index
    %1 = vector.load %arg3[%c0_1, %c0_2] : memref<1x32xf32, #tpu.memory_space<vmem>>, vector<1x32xf32>
    %c0_3 = arith.constant 0 : index
    %c0_4 = arith.constant 0 : index
    %2 = vector.load %arg4[%c0_3, %c0_4] : memref<32x32xf32, #tpu.memory_space<vmem>>, vector<32x32xf32>
    %c0_5 = arith.constant 0 : index
    %c0_6 = arith.constant 0 : index
    %3 = vector.load %arg5[%c0_5, %c0_6] : memref<1x32xf32, #tpu.memory_space<vmem>>, vector<1x32xf32>
    %c0_7 = arith.constant 0 : index
    %c0_8 = arith.constant 0 : index
    %4 = vector.load %arg6[%c0_7, %c0_8] : memref<32x16xf32, #tpu.memory_space<vmem>>, vector<32x16xf32>
    %c0_9 = arith.constant 0 : index
    %c0_10 = arith.constant 0 : index
    %5 = vector.load %arg7[%c0_9, %c0_10] : memref<1x16xf32, #tpu.memory_space<vmem>>, vector<1x16xf32>
    %c0_11 = arith.constant 0 : index
    %c0_12 = arith.constant 0 : index
    %6 = vector.load %arg8[%c0_11, %c0_12] : memref<16x32xf32, #tpu.memory_space<vmem>>, vector<16x32xf32>
    %c0_13 = arith.constant 0 : index
    %c0_14 = arith.constant 0 : index
    %7 = vector.load %arg9[%c0_13, %c0_14] : memref<1x32xf32, #tpu.memory_space<vmem>>, vector<1x32xf32>
    %c0_15 = arith.constant 0 : index
    %c0_16 = arith.constant 0 : index
    %8 = vector.load %arg10[%c0_15, %c0_16] : memref<32x32xf32, #tpu.memory_space<vmem>>, vector<32x32xf32>
    %c0_17 = arith.constant 0 : index
    %c0_18 = arith.constant 0 : index
    %9 = vector.load %arg11[%c0_17, %c0_18] : memref<1x32xf32, #tpu.memory_space<vmem>>, vector<1x32xf32>
    %c0_19 = arith.constant 0 : index
    %c0_20 = arith.constant 0 : index
    %10 = vector.load %arg12[%c0_19, %c0_20] : memref<32x128xf32, #tpu.memory_space<vmem>>, vector<32x128xf32>
    %c0_21 = arith.constant 0 : index
    %c0_22 = arith.constant 0 : index
    %11 = vector.load %arg13[%c0_21, %c0_22] : memref<1x128xf32, #tpu.memory_space<vmem>>, vector<1x128xf32>
    %c0_23 = arith.constant 0 : index
    %c0_24 = arith.constant 0 : index
    %12 = vector.load %arg1[%c0_23, %c0_24] : memref<8x32xf32, #tpu.memory_space<vmem>>, vector<8x32xf32>
    %cst = arith.constant dense<0.000000e+00> : vector<8x32xf32>
    %13 = tpu.matmul %12, %0, %cst {dimension_numbers = #tpu.dot_dimension_numbers<[1], [0], [0], [1], [0, 0, 1, 1], [], []>} : vector<8x32xf32>, vector<32x32xf32>, vector<8x32xf32> -> vector<8x32xf32>
    %14 = vector.broadcast %1 : vector<1x32xf32> to vector<8x32xf32>
    %15 = arith.addf %13, %14 : vector<8x32xf32>
    %cst_25 = arith.constant 0.000000e+00 : f32
    %16 = vector.broadcast %cst_25 : f32 to vector<8x32xf32>
    %17 = arith.maximumf %15, %16 : vector<8x32xf32>
    %cst_26 = arith.constant dense<0.000000e+00> : vector<8x32xf32>
    %18 = tpu.matmul %17, %2, %cst_26 {dimension_numbers = #tpu.dot_dimension_numbers<[1], [0], [0], [1], [0, 0, 1, 1], [], []>} : vector<8x32xf32>, vector<32x32xf32>, vector<8x32xf32> -> vector<8x32xf32>
    %19 = vector.broadcast %3 : vector<1x32xf32> to vector<8x32xf32>
    %20 = arith.addf %18, %19 : vector<8x32xf32>
    %cst_27 = arith.constant 0.000000e+00 : f32
    %21 = vector.broadcast %cst_27 : f32 to vector<8x32xf32>
    %22 = arith.maximumf %20, %21 : vector<8x32xf32>
    %cst_28 = arith.constant dense<0.000000e+00> : vector<8x16xf32>
    %23 = tpu.matmul %22, %4, %cst_28 {dimension_numbers = #tpu.dot_dimension_numbers<[1], [0], [0], [1], [0, 0, 1, 1], [], []>} : vector<8x32xf32>, vector<32x16xf32>, vector<8x16xf32> -> vector<8x16xf32>
    %24 = vector.broadcast %5 : vector<1x16xf32> to vector<8x16xf32>
    %25 = arith.addf %23, %24 : vector<8x16xf32>
    %cst_29 = arith.constant dense<0.000000e+00> : vector<8x32xf32>
    %26 = tpu.matmul %25, %6, %cst_29 {dimension_numbers = #tpu.dot_dimension_numbers<[1], [0], [0], [1], [0, 0, 1, 1], [], []>} : vector<8x16xf32>, vector<16x32xf32>, vector<8x32xf32> -> vector<8x32xf32>
    %27 = vector.broadcast %7 : vector<1x32xf32> to vector<8x32xf32>
    %28 = arith.addf %26, %27 : vector<8x32xf32>
    %cst_30 = arith.constant 2.000000e+01 : f32
    %29 = vector.broadcast %cst_30 : f32 to vector<8x32xf32>
    %30 = arith.cmpf ogt, %28, %29 : vector<8x32xf32>
    %cst_31 = arith.constant 2.000000e+01 : f32
    %31 = vector.broadcast %cst_31 : f32 to vector<8x32xf32>
    %32 = arith.minimumf %28, %31 : vector<8x32xf32>
    %33 = math.exp %32 : vector<8x32xf32>
    %34 = math.log1p %33 : vector<8x32xf32>
    %35 = arith.select %30, %28, %34 : vector<8x32xi1>, vector<8x32xf32>
    %cst_32 = arith.constant dense<0.000000e+00> : vector<8x32xf32>
    %36 = tpu.matmul %35, %8, %cst_32 {dimension_numbers = #tpu.dot_dimension_numbers<[1], [0], [0], [1], [0, 0, 1, 1], [], []>} : vector<8x32xf32>, vector<32x32xf32>, vector<8x32xf32> -> vector<8x32xf32>
    %37 = vector.broadcast %9 : vector<1x32xf32> to vector<8x32xf32>
    %38 = arith.addf %36, %37 : vector<8x32xf32>
    %cst_33 = arith.constant 2.000000e+01 : f32
    %39 = vector.broadcast %cst_33 : f32 to vector<8x32xf32>
    %40 = arith.cmpf ogt, %38, %39 : vector<8x32xf32>
    %cst_34 = arith.constant 2.000000e+01 : f32
    %41 = vector.broadcast %cst_34 : f32 to vector<8x32xf32>
    %42 = arith.minimumf %38, %41 : vector<8x32xf32>
    %43 = math.exp %42 : vector<8x32xf32>
    %44 = math.log1p %43 : vector<8x32xf32>
    %45 = arith.select %40, %38, %44 : vector<8x32xi1>, vector<8x32xf32>
    %cst_35 = arith.constant dense<0.000000e+00> : vector<8x128xf32>
    %46 = tpu.matmul %45, %10, %cst_35 {dimension_numbers = #tpu.dot_dimension_numbers<[1], [0], [0], [1], [0, 0, 1, 1], [], []>} : vector<8x32xf32>, vector<32x128xf32>, vector<8x128xf32> -> vector<8x128xf32>
    %47 = vector.broadcast %11 : vector<1x128xf32> to vector<8x128xf32>
    %48 = arith.addf %46, %47 : vector<8x128xf32>
    %c0_36 = arith.constant 0 : index
    %c0_37 = arith.constant 0 : index
    %49 = vector.load %arg14[%c0_36, %c0_37] : memref<8x128xf32, #tpu.memory_space<vmem>>, vector<8x128xf32>
    tpu.vector_store %arg14[%c0_36, %c0_37], %48 {strides = array<i32>} : memref<8x128xf32, #tpu.memory_space<vmem>>, vector<8x128xf32>,
    return
  }
  func.func @transform_0(%arg0: i32) -> (i32, i32) {
    %c0_i32 = arith.constant 0 : i32
    %c0_i32_0 = arith.constant 0 : i32
    return %arg0, %c0_i32 : i32, i32
  }
  func.func @transform_1(%arg0: i32) -> (i32, i32) {
    %c0_i32 = arith.constant 0 : i32
    %c0_i32_0 = arith.constant 0 : i32
    %c0_i32_1 = arith.constant 0 : i32
    return %c0_i32, %c0_i32_0 : i32, i32
  }
  func.func @transform_2(%arg0: i32) -> (i32, i32) {
    %c0_i32 = arith.constant 0 : i32
    %c0_i32_0 = arith.constant 0 : i32
    %c0_i32_1 = arith.constant 0 : i32
    return %c0_i32, %c0_i32_0 : i32, i32
  }
  func.func @transform_3(%arg0: i32) -> (i32, i32) {
    %c0_i32 = arith.constant 0 : i32
    %c0_i32_0 = arith.constant 0 : i32
    %c0_i32_1 = arith.constant 0 : i32
    return %c0_i32, %c0_i32_0 : i32, i32
  }
  func.func @transform_4(%arg0: i32) -> (i32, i32) {
    %c0_i32 = arith.constant 0 : i32
    %c0_i32_0 = arith.constant 0 : i32
    %c0_i32_1 = arith.constant 0 : i32
    return %c0_i32, %c0_i32_0 : i32, i32
  }
  func.func @transform_5(%arg0: i32) -> (i32, i32) {
    %c0_i32 = arith.constant 0 : i32
    %c0_i32_0 = arith.constant 0 : i32
    %c0_i32_1 = arith.constant 0 : i32
    return %c0_i32, %c0_i32_0 : i32, i32
  }
  func.func @transform_6(%arg0: i32) -> (i32, i32) {
    %c0_i32 = arith.constant 0 : i32
    %c0_i32_0 = arith.constant 0 : i32
    %c0_i32_1 = arith.constant 0 : i32
    return %c0_i32, %c0_i32_0 : i32, i32
  }
  func.func @transform_7(%arg0: i32) -> (i32, i32) {
    %c0_i32 = arith.constant 0 : i32
    %c0_i32_0 = arith.constant 0 : i32
    %c0_i32_1 = arith.constant 0 : i32
    return %c0_i32, %c0_i32_0 : i32, i32
  }
  func.func @transform_8(%arg0: i32) -> (i32, i32) {
    %c0_i32 = arith.constant 0 : i32
    %c0_i32_0 = arith.constant 0 : i32
    %c0_i32_1 = arith.constant 0 : i32
    return %c0_i32, %c0_i32_0 : i32, i32
  }
  func.func @transform_9(%arg0: i32) -> (i32, i32) {
    %c0_i32 = arith.constant 0 : i32
    %c0_i32_0 = arith.constant 0 : i32
    %c0_i32_1 = arith.constant 0 : i32
    return %c0_i32, %c0_i32_0 : i32, i32
  }
  func.func @transform_10(%arg0: i32) -> (i32, i32) {
    %c0_i32 = arith.constant 0 : i32
    %c0_i32_0 = arith.constant 0 : i32
    %c0_i32_1 = arith.constant 0 : i32
    return %c0_i32, %c0_i32_0 : i32, i32
  }
  func.func @transform_11(%arg0: i32) -> (i32, i32) {
    %c0_i32 = arith.constant 0 : i32
    %c0_i32_0 = arith.constant 0 : i32
    %c0_i32_1 = arith.constant 0 : i32
    return %c0_i32, %c0_i32_0 : i32, i32
  }
  func.func @transform_12(%arg0: i32) -> (i32, i32) {
    %c0_i32 = arith.constant 0 : i32
    %c0_i32_0 = arith.constant 0 : i32
    %c0_i32_1 = arith.constant 0 : i32
    return %c0_i32, %c0_i32_0 : i32, i32
  }
  func.func @transform_13(%arg0: i32) -> (i32, i32) {
    %c0_i32 = arith.constant 0 : i32
    %c0_i32_0 = arith.constant 0 : i32
    return %arg0, %c0_i32 : i32, i32
  }
}

</mosaic_0001>

<bundles_post_ra>
// kernel: fgn_forward.5
= control target key start
LH: loop header
LB: loop body
LE: loop exit
PB: predicated region body
PF: predicated region fallthrough
CT: control target
= control target key end

     0   :  { %14 = vsyncpa [#allocation3], 0  ;;  %s1004_s0 = inlined_call_operand.vmem [shape: f32[16,16], index: 0, kind: input, shape index: {}]   ;;  %s1005_s1 = inlined_call_operand.vmem [shape: f32[16,32], index: 1, kind: input, shape index: {}]   ;;  %s1006_s2 = inlined_call_operand.vmem [shape: f32[1,32], index: 2, kind: input, shape index: {}]   ;;  %s1007_s3 = inlined_call_operand.vmem [shape: f32[32,32], index: 3, kind: input, shape index: {}]   ;;  %s1008_s4 = inlined_call_operand.hbm [shape: f32[1,32], index: 4, kind: input, shape index: {}]   ;;  %s1009_s5 = inlined_call_operand.vmem [shape: f32[32,32], index: 5, kind: input, shape index: {}]   ;;  %s1010_s6 = inlined_call_operand.hbm [shape: f32[1,32], index: 6, kind: input, shape index: {}]   ;;  %s1011_s7 = inlined_call_operand.hbm [shape: f32[1,32], index: 7, kind: input, shape index: {}]   ;;  %s1012_s8 = inlined_call_operand.hbm [shape: f32[1,32], index: 8, kind: input, shape index: {}]   ;;  %s1013_s9 = inlined_call_operand.vmem [shape: f32[16,32], index: 9, kind: output, shape index: {}]  }
   0x1   :  { %15 = vsyncpa [#allocation5], 0 }
   0x2   :  { %16 = vsyncpa [#allocation8], 0  ;;  %s891_s30 = smov 0  }
   0x3 LB: > { %s283_s12 = sshll.u32 %s1010_s6, 4  ;;  %s900_s13 = sadd.s32 4294967295, %s834_s30   ;;  %s834_s30 = sphi %s891_s30, %s22_s30   ;;  %s284_s12 = int_to_ptr.hbm [resolvable:$true] %s283_s12 }
   0x4   : > { %p619_p0 = scmp.ge.s32.totalorder %s834_s30, 1  ;;  %p247_p1 = scmp.lt.s32.totalorder %s834_s30, 3 }
   0x5   : > { %p666_p2 = scmp.eq.s32.totalorder %s900_s13, 0  ;;  %s836_s15 = smov [#allocation4]  }
   0x6   : > { %p905_p3 = pnand %p619_p0, %p247_p1  ;;  %s285_s16 = sshll.u32 %s836_s15, 4  ;;  %s286_s16 = int_to_ptr.vmem [resolvable:$true] %s285_s16 }
   0x7   : > { %s268_s19 = sshll.u32 %s1008_s4, 4  ;;  %s295_s22 = sshll.u32 %s1011_s7, 4  ;;  %s269_s19 = int_to_ptr.hbm [resolvable:$true] %s268_s19  ;;  %s296_s22 = int_to_ptr.hbm [resolvable:$true] %s295_s22 }
   0x8   : > { %p653_p4 = pneg %p905_p3  ;;  %s837_s24 = smov [#allocation2]  }
   0x9   : > { %s270_s25 = sshll.u32 %s837_s24, 4  ;;  %s838_s26 = smov [#allocation6]   ;;  %s271_s25 = int_to_ptr.vmem [resolvable:$true] %s270_s25 }
   0xa   : > { %p919_p5 = pnand %p666_p2, %p653_p4  ;;  %s297_s27 = sshll.u32 %s838_s26, 4  ;;  %s298_s27 = int_to_ptr.vmem [resolvable:$true] %s297_s27 }
   0xb   : > { %s307_s10 = sshll.u32 %s1012_s8, 4  ;;  %s839_s11 = smov [#allocation7]   ;;  %s308_s10 = int_to_ptr.hbm [resolvable:$true] %s307_s10 }
   0xc   : > { %659 = dma.hbm_to_vmem [thread:$0]  (!%p919_p5), %s284_s12, 16, %s286_s16, [#allocation5]  }
   0xd   : > { %656 = dma.hbm_to_vmem [thread:$0]  (!%p919_p5), %s269_s19, 16, %s271_s25, [#allocation3]  }
   0xe   : > { %662 = dma.hbm_to_vmem [thread:$0]  (!%p919_p5), %s296_s22, 16, %s298_s27, [#allocation5]  }
   0xf   : > { %s309_s15 = sshll.u32 %s839_s11, 4  ;;  %329 = sbr.rel (%p905_p3) target bundleno = 694 (0x2b6), region = 56  ;;  %s310_s15 = int_to_ptr.vmem [resolvable:$true] %s309_s15 }
  0x10   : > { %665 = dma.hbm_to_vmem [thread:$0]  (!%p919_p5), %s308_s10, 16, %s310_s15, [#allocation8]  }
  0x14   : > { %821 = dma.done.wait (%p666_p2), [#allocation3], 16  }
  0x15   : > { %823 = vsyncadd (%p666_p2), [#allocation3], 4294967280 }
  0x16   : > { %825 = dma.done.wait (%p666_p2), [#allocation5], 32  }
  0x17   : > { %827 = vsyncadd (%p666_p2), [#allocation5], 4294967264 }
  0x18   : > { %829 = dma.done.wait (%p666_p2), [#allocation8], 16  }
  0x19   : > { %831 = vsyncadd (%p666_p2), [#allocation8], 4294967280  ;;  %p379_p6 = scmp.lt.s32.totalorder %s900_s13, 1  ;;  %v388_v0 = vld [vmem:[%s1005_s1 + $0x8] sm:$0xff]  ;;  %v387_v1 = vld [vmem:[%s1005_s1] sm:$0xff]  ;;  %vm404_vm0 = vcmask 130048  }
  0x1a   : > { %422 = vmatpush.msra.mxu0 %v388_v0  ;;  %v393_v3 = vld [vmem:[%s1007_s3 + $0x18] sm:$0xff]  ;;  %v392_v4 = vld [vmem:[%s1007_s3 + $0x10] sm:$0xff]  ;;  %v391_v5 = vld [vmem:[%s1007_s3 + $0x8] sm:$0xff]  ;;  %vm432_vm1 = vcmask 261120   ;;  %v840_v23 = vmov 32.0  }
  0x1b   : > { %s1017_s13 = smov (!%p379_p6, %s900_s13), 1  ;;  %448 = vmatpush.msra.mxu1 %v393_v3  ;;  %v390_v6 = vld [vmem:[%s1007_s3] sm:$0xff]  ;;  %v398_v7 = vld [vmem:[%s1009_s5 + $0x18] sm:$0xff]  ;;  %v397_v12 = vld [vmem:[%s1009_s5 + $0x10] sm:$0xff]  ;;  %692 = vrcp.f32 %v840_v23 }
  0x1c   : > { %s630_s12 = sshll.u32 %s1017_s13, 3  ;;  %423 = vmatpush.msra.mxu0 %v387_v1  ;;  %475 = vmatpush.msra.mxu2 %v398_v7  ;;  %v687_v8 = vld [vmem:[%s1006_s2] ss:$0 sm:$0xff]  ;;  %v396_v13 = vld [vmem:[%s1009_s5 + $0x8] sm:$0xff]  ;;  %v689_v19 = vld [vmem:[#allocation4] ss:$0 sm:$0xff] }
  0x1d   : > { %s382_s17 = scalar_lea.vmem %s1004_s0, %s630_s12  ;;  %449 = vmatpush.msra.mxu1 %v392_v4  ;;  %v395_v14 = vld [vmem:[%s1009_s5] sm:$0xff]  ;;  %s386_s24 = scalar_lea.vmem %s1013_s9, %s630_s12 }
  0x1e   : > { %v400_v2 = vld [vmem:[%s382_s17] sm:$0xff]  ;;  %476 = vmatpush.msra.mxu2 %v397_v12 }
  0x1f   : > { %632 = vmatmul.msk.f32.vlgmr.msra.gmra.mxu0 %vm404_vm0, %v400_v2  ;;  %450 = vmatpush.msra.mxu1 %v391_v5  ;;  %v688_v15 = vld [vmem:[#allocation2] ss:$0 sm:$0xff]  ;;  %v690_v44 = vld [vmem:[#allocation6] ss:$0 sm:$0xff]  ;;  %v691_v46 = vld [vmem:[#allocation7] ss:$0 sm:$0xff] }
  0x20   : > { %477 = vmatpush.msra.mxu2 %v396_v13 }
  0x21   : > { %451 = vmatpush.msra.mxu1 %v390_v6  ;;  %v693_v24 = vpop.eup %692 }
  0x22   : > { %478 = vmatpush.msra.mxu2 %v395_v14  ;;  %v489_v25 = vmul.f32 32.0, %v693_v24  ;;  %vm493_vm2 = vweird.f32 %v693_v24 }
  0x24   : > { %v490_v26 = vsub.f32 1.0, %v489_v25 }
  0x26   : > { %v491_v27 = vmul.f32 %v693_v24, %v490_v26 }
  0x28   : > { %v492_v28 = vadd.f32 %v693_v24, %v491_v27 }
  0x2a   : > { %v494_v29 = vsel %vm493_vm2, %v693_v24, %v492_v28 }
  0x9c   : > { %v425_v9 = vpop.f32.mrf.mxu0 }
  0x9d   : > { %v426_v10 = vadd.f32 %v687_v8, %v425_v9 }
  0x9f   : > { %v428_v11 = vmax.f32 %v426_v10, 0.0 }
  0xa1   : > { %633 = vmatmul.msk.f32.vlgmr.msra.gmra.mxu1 %vm432_vm1, %v428_v11 }
 0x11e   : > { %v453_v16 = vpop.f32.mrf.mxu1 }
 0x11f   : > { %v454_v17 = vadd.f32 %v688_v15, %v453_v16 }
 0x121   : > { %v456_v18 = vmax.f32 %v454_v17, 0.0 }
 0x123   : > { %634 = vmatmul.msk.f32.vlgmr.msra.gmra.mxu2 %vm432_vm1, %v456_v18 }
 0x1a6   : > { %v480_v20 = vpop.f32.mrf.mxu2 }
 0x1a7   : > { %v481_v21 = vadd.f32 %v689_v19, %v480_v20 }
 0x1a9   : > { %v485_v22 = vsel %vm432_vm1, %v481_v21, 0.0 }
 0x1aa   : > { %486 = vadd.xlane.f32.xlu0 %v485_v22 }
 0x21d   : > { %v487_v30 = vpop.xlane.xlu0 %486 }
 0x21e   : > { %v495_v31 = vmul.f32 %v494_v29, %v487_v30 }
 0x220   : > { %v496_v32 = vsub.f32 %v481_v21, %v495_v31 }
 0x222   : > { %v497_v33 = vmul.f32 %v496_v32, %v496_v32 }
 0x224   : > { %v498_v34 = vsel %vm432_vm1, %v497_v33, 0.0 }
 0x225   : > { %499 = vadd.xlane.f32.xlu0 %v498_v34 }
 0x298   : > { %v500_v35 = vpop.xlane.xlu0 %499 }
 0x299   : > { %v501_v36 = vmul.f32 %v500_v35, %v494_v29 }
 0x29b   : > { %v502_v37 = vadd.f32 1e-05, %v501_v36 }
 0x29d   : > { %694 = vrsqrt.f32 %v502_v37  ;;  %vm509_vm4 = vweird.f32 %v502_v37 }
 0x2a3   : > { %v695_v38 = vpop.eup %694 }
 0x2a4   : > { %v504_v39 = vmul.f32 %v695_v38, %v502_v37  ;;  %vm510_vm3 = vweird.f32 %v695_v38 }
 0x2a5   : > { %vm511_vm5 = vmor %vm509_vm4, %vm510_vm3 }
 0x2a6   : > { %v505_v40 = vmul.f32 %v695_v38, %v504_v39 }
 0x2a8   : > { %v506_v41 = vmul.f32 0.5, %v505_v40 }
 0x2aa   : > { %v507_v42 = vsub.f32 1.5, %v506_v41 }
 0x2ac   : > { %v508_v43 = vmul.f32 %v695_v38, %v507_v42 }
 0x2ae   : > { %v512_v45 = vsel %vm511_vm5, %v695_v38, %v508_v43 }
 0x2af   : > { %v513_v47 = vmul.f32 %v512_v45, %v496_v32 }
 0x2b1   : > { %v517_v48 = vmul.f32 %v690_v44, %v513_v47 }
 0x2b3   : > { %v521_v49 = vadd.f32 %v691_v46, %v517_v48 }
 0x2b5   : > { %522 = vst.msk [vmem:[%s386_s24] sm:$0xff] %vm432_vm1, %v521_v49 }
 0x2b6 PF: > { %s22_s30 = sadd.s32 1, %s834_s30  }
 0x2b7   : > { %p19_p7 = scmp.ge.s32.totalorder %s22_s30, 4  }
 0x2b9   :  { %21 = sbr.rel (!%p19_p7) target bundleno = 3 (0x3), region = 103 }
 0x2be   :  { %542 = vsyncpa [#allocation3], 1 }
 0x2bf   :  { %544 = vsyncpa [#allocation3 + $0x1], 1 }
 0x2c0   :  { %545 = vsyncpa [#allocation5], 1 }
 0x2c1   :  { %546 = vsyncpa [#allocation8], 1 }

// kernel: fgn_forward.6
= control target key start
LH: loop header
LB: loop body
LE: loop exit
PB: predicated region body
PF: predicated region fallthrough
CT: control target
= control target key end

     0   :  { %14 = vsyncpa [#allocation3], 0  ;;  %s1146_s0 = inlined_call_operand.vmem [shape: f32[24,8], index: 0, kind: input, shape index: {}]   ;;  %s1147_s1 = inlined_call_operand.hbm [shape: f32[8,32], index: 1, kind: input, shape index: {}]   ;;  %s1148_s2 = inlined_call_operand.hbm [shape: f32[1,32], index: 2, kind: input, shape index: {}]   ;;  %s1149_s3 = inlined_call_operand.vmem [shape: f32[32,32], index: 3, kind: input, shape index: {}]   ;;  %s1150_s4 = inlined_call_operand.hbm [shape: f32[1,32], index: 4, kind: input, shape index: {}]   ;;  %s1151_s5 = inlined_call_operand.vmem [shape: f32[32,32], index: 5, kind: input, shape index: {}]   ;;  %s1152_s6 = inlined_call_operand.hbm [shape: f32[1,32], index: 6, kind: input, shape index: {}]   ;;  %s1153_s7 = inlined_call_operand.hbm [shape: f32[1,32], index: 7, kind: input, shape index: {}]   ;;  %s1154_s8 = inlined_call_operand.hbm [shape: f32[1,32], index: 8, kind: input, shape index: {}]   ;;  %s1155_s9 = inlined_call_operand.vmem [shape: f32[24,32], index: 9, kind: output, shape index: {}]  }
   0x1   :  { %15 = vsyncpa [#allocation5], 0 }
   0x2   :  { %16 = vsyncpa [#allocation8], 0 }
   0x3   :  { %17 = vsyncpa [#allocation11], 0  ;;  %s1028_s30 = smov 0  }
   0x4 LB: > { %s272_s12 = sshll.u32 %s1148_s2, 4  ;;  %s1037_s13 = sadd.s32 4294967295, %s969_s30   ;;  %s969_s30 = sphi %s1028_s30, %s23_s30   ;;  %s273_s12 = int_to_ptr.hbm [resolvable:$true] %s272_s12 }
   0x5   : > { %p666_p0 = scmp.ge.s32.totalorder %s969_s30, 1  ;;  %p248_p1 = scmp.lt.s32.totalorder %s969_s30, 4 }
   0x6   : > { %p731_p2 = scmp.eq.s32.totalorder %s1037_s13, 0  ;;  %s971_s15 = smov [#allocation4]  }
   0x7   : > { %p1042_p3 = pnand %p666_p0, %p248_p1  ;;  %s274_s16 = sshll.u32 %s971_s15, 4  ;;  %s275_s16 = int_to_ptr.vmem [resolvable:$true] %s274_s16 }
   0x8   : > { %s302_s19 = sshll.u32 %s1152_s6, 4  ;;  %s260_s22 = sshll.u32 %s1147_s1, 4  ;;  %s303_s19 = int_to_ptr.hbm [resolvable:$true] %s302_s19  ;;  %s261_s22 = int_to_ptr.hbm [resolvable:$true] %s260_s22 }
   0x9   : > { %p712_p4 = pneg %p1042_p3  ;;  %s972_s24 = smov [#allocation7]  }
   0xa   : > { %s304_s25 = sshll.u32 %s972_s24, 4  ;;  %s973_s26 = smov [#allocation2]   ;;  %s305_s25 = int_to_ptr.vmem [resolvable:$true] %s304_s25 }
   0xb   : > { %p1056_p5 = pnand %p731_p2, %p712_p4  ;;  %s262_s27 = sshll.u32 %s973_s26, 4  ;;  %s263_s27 = int_to_ptr.vmem [resolvable:$true] %s262_s27 }
   0xc   : > { %s287_s10 = sshll.u32 %s1150_s4, 4  ;;  %s314_s17 = sshll.u32 %s1153_s7, 4  ;;  %s288_s10 = int_to_ptr.hbm [resolvable:$true] %s287_s10  ;;  %s315_s17 = int_to_ptr.hbm [resolvable:$true] %s314_s17 }
   0xd   : > { %718 = dma.hbm_to_vmem [thread:$0]  (!%p1056_p5), %s273_s12, 16, %s275_s16, [#allocation5]  }
   0xe   : > { %724 = dma.hbm_to_vmem [thread:$0]  (!%p1056_p5), %s303_s19, 16, %s305_s25, [#allocation8]  }
   0xf   : > { %715 = dma.hbm_to_vmem [thread:$0]  (!%p1056_p5), %s261_s22, 128, %s263_s27, [#allocation3]  }
  0x10   : > { %s974_s18 = smov [#allocation6]   ;;  %s975_s16 = smov [#allocation9]  }
  0x11   : > { %s289_s12 = sshll.u32 %s974_s18, 4  ;;  %s316_s19 = sshll.u32 %s975_s16, 4  ;;  %s290_s12 = int_to_ptr.vmem [resolvable:$true] %s289_s12  ;;  %s317_s19 = int_to_ptr.vmem [resolvable:$true] %s316_s19 }
  0x12   : > { %721 = dma.hbm_to_vmem [thread:$0]  (!%p1056_p5), %s288_s10, 16, %s290_s12, [#allocation5]  }
  0x13   : > { %s326_s24 = sshll.u32 %s1154_s8, 4  ;;  %s976_s22 = smov [#allocation10]   ;;  %s327_s24 = int_to_ptr.hbm [resolvable:$true] %s326_s24 }
  0x14   : > { %727 = dma.hbm_to_vmem [thread:$0]  (!%p1056_p5), %s315_s17, 16, %s317_s19, [#allocation8]  }
  0x15   : > { %s328_s25 = sshll.u32 %s976_s22, 4  ;;  %348 = sbr.rel (%p1042_p3) target bundleno = 702 (0x2be), region = 56  ;;  %s329_s25 = int_to_ptr.vmem [resolvable:$true] %s328_s25 }
  0x16   : > { %730 = dma.hbm_to_vmem [thread:$0]  (!%p1056_p5), %s327_s24, 16, %s329_s25, [#allocation11]  }
  0x1a   : > { %952 = dma.done.wait (%p731_p2), [#allocation3], 128  }
  0x1b   : > { %954 = vsyncadd (%p731_p2), [#allocation3], 4294967168 }
  0x1c   : > { %956 = dma.done.wait (%p731_p2), [#allocation5], 32  }
  0x1d   : > { %958 = vsyncadd (%p731_p2), [#allocation5], 4294967264 }
  0x1e   : > { %960 = dma.done.wait (%p731_p2), [#allocation8], 32  }
  0x1f   : > { %962 = vsyncadd (%p731_p2), [#allocation8], 4294967264 }
  0x20   : > { %964 = dma.done.wait (%p731_p2), [#allocation11], 16  }
  0x21   : > { %966 = vsyncadd (%p731_p2), [#allocation11], 4294967280  ;;  %p408_p6 = scmp.lt.s32.totalorder %s1037_s13, 2  ;;  %vm432_vm0 = vcmask 64512   ;;  %v416_v0 = vld [vmem:[#allocation2] sm:$0xff]  ;;  %v421_v2 = vld [vmem:[%s1149_s3 + $0x18] sm:$0xff] }
  0x22   : > { %451 = vmatpush.msra.mxu0 %v416_v0  ;;  %476 = vmatpush.msra.mxu1 %v421_v2  ;;  %v420_v3 = vld [vmem:[%s1149_s3 + $0x10] sm:$0xff]  ;;  %v419_v4 = vld [vmem:[%s1149_s3 + $0x8] sm:$0xff]  ;;  %v418_v5 = vld [vmem:[%s1149_s3] sm:$0xff]  ;;  %vm460_vm1 = vcmask 261120   ;;  %v977_v22 = vmov 32.0  }
  0x23   : > { %s1159_s13 = smov (!%p408_p6, %s1037_s13), 2  ;;  %v426_v6 = vld [vmem:[%s1151_s5 + $0x18] sm:$0xff]  ;;  %v758_v7 = vld [vmem:[#allocation4] ss:$0 sm:$0xff]  ;;  %v425_v11 = vld [vmem:[%s1151_s5 + $0x10] sm:$0xff]  ;;  %763 = vrcp.f32 %v977_v22 }
  0x24   : > { %s681_s14 = sshll.u32 %s1159_s13, 3  ;;  %477 = vmatpush.msra.mxu1 %v420_v3  ;;  %503 = vmatpush.msra.mxu2 %v426_v6  ;;  %v424_v12 = vld [vmem:[%s1151_s5 + $0x8] sm:$0xff]  ;;  %v423_v13 = vld [vmem:[%s1151_s5] sm:$0xff]  ;;  %v762_v45 = vld [vmem:[#allocation10] ss:$0 sm:$0xff] }
  0x25   : > { %s411_s27 = scalar_lea.vmem %s1146_s0, %s681_s14  ;;  %v759_v14 = vld [vmem:[#allocation6] ss:$0 sm:$0xff]  ;;  %v760_v18 = vld [vmem:[#allocation7] ss:$0 sm:$0xff]  ;;  %v761_v43 = vld [vmem:[#allocation9] ss:$0 sm:$0xff]  ;;  %s415_s28 = scalar_lea.vmem %s1155_s9, %s681_s14 }
  0x26   : > { %v428_v1 = vld [vmem:[%s411_s27] sm:$0xff]  ;;  %478 = vmatpush.msra.mxu1 %v419_v4  ;;  %504 = vmatpush.msra.mxu2 %v425_v11 }
  0x27   : > { %683 = vmatmul.msk.f32.vlgmr.msra.gmra.mxu0 %vm432_vm0, %v428_v1 }
  0x28   : > { %479 = vmatpush.msra.mxu1 %v418_v5  ;;  %505 = vmatpush.msra.mxu2 %v424_v12 }
  0x29   : > { %v764_v23 = vpop.eup %763 }
  0x2a   : > { %506 = vmatpush.msra.mxu2 %v423_v13  ;;  %v517_v24 = vmul.f32 32.0, %v764_v23  ;;  %vm521_vm2 = vweird.f32 %v764_v23 }
  0x2c   : > { %v518_v25 = vsub.f32 1.0, %v517_v24 }
  0x2e   : > { %v519_v26 = vmul.f32 %v764_v23, %v518_v25 }
  0x30   : > { %v520_v27 = vadd.f32 %v764_v23, %v519_v26 }
  0x32   : > { %v522_v28 = vsel %vm521_vm2, %v764_v23, %v520_v27 }
  0xa4   : > { %v453_v8 = vpop.f32.mrf.mxu0 }
  0xa5   : > { %v454_v9 = vadd.f32 %v758_v7, %v453_v8 }
  0xa7   : > { %v456_v10 = vmax.f32 %v454_v9, 0.0 }
  0xa9   : > { %684 = vmatmul.msk.f32.vlgmr.msra.gmra.mxu1 %vm460_vm1, %v456_v10 }
 0x126   : > { %v481_v15 = vpop.f32.mrf.mxu1 }
 0x127   : > { %v482_v16 = vadd.f32 %v759_v14, %v481_v15 }
 0x129   : > { %v484_v17 = vmax.f32 %v482_v16, 0.0 }
 0x12b   : > { %685 = vmatmul.msk.f32.vlgmr.msra.gmra.mxu2 %vm460_vm1, %v484_v17 }
 0x1ae   : > { %v508_v19 = vpop.f32.mrf.mxu2 }
 0x1af   : > { %v509_v20 = vadd.f32 %v760_v18, %v508_v19 }
 0x1b1   : > { %v513_v21 = vsel %vm460_vm1, %v509_v20, 0.0 }
 0x1b2   : > { %514 = vadd.xlane.f32.xlu0 %v513_v21 }
 0x225   : > { %v515_v29 = vpop.xlane.xlu0 %514 }
 0x226   : > { %v523_v30 = vmul.f32 %v522_v28, %v515_v29 }
 0x228   : > { %v524_v31 = vsub.f32 %v509_v20, %v523_v30 }
 0x22a   : > { %v525_v32 = vmul.f32 %v524_v31, %v524_v31 }
 0x22c   : > { %v526_v33 = vsel %vm460_vm1, %v525_v32, 0.0 }
 0x22d   : > { %527 = vadd.xlane.f32.xlu0 %v526_v33 }
 0x2a0   : > { %v528_v34 = vpop.xlane.xlu0 %527 }
 0x2a1   : > { %v529_v35 = vmul.f32 %v528_v34, %v522_v28 }
 0x2a3   : > { %v530_v36 = vadd.f32 1e-05, %v529_v35 }
 0x2a5   : > { %765 = vrsqrt.f32 %v530_v36  ;;  %vm537_vm4 = vweird.f32 %v530_v36 }
 0x2ab   : > { %v766_v37 = vpop.eup %765 }
 0x2ac   : > { %v532_v38 = vmul.f32 %v766_v37, %v530_v36  ;;  %vm538_vm3 = vweird.f32 %v766_v37 }
 0x2ad   : > { %vm539_vm5 = vmor %vm537_vm4, %vm538_vm3 }
 0x2ae   : > { %v533_v39 = vmul.f32 %v766_v37, %v532_v38 }
 0x2b0   : > { %v534_v40 = vmul.f32 0.5, %v533_v39 }
 0x2b2   : > { %v535_v41 = vsub.f32 1.5, %v534_v40 }
 0x2b4   : > { %v536_v42 = vmul.f32 %v766_v37, %v535_v41 }
 0x2b6   : > { %v540_v44 = vsel %vm539_vm5, %v766_v37, %v536_v42 }
 0x2b7   : > { %v541_v46 = vmul.f32 %v540_v44, %v524_v31 }
 0x2b9   : > { %v545_v47 = vmul.f32 %v761_v43, %v541_v46 }
 0x2bb   : > { %v549_v48 = vadd.f32 %v762_v45, %v545_v47 }
 0x2bd   : > { %550 = vst.msk [vmem:[%s415_s28] sm:$0xff] %vm460_vm1, %v549_v48 }
 0x2be PF: > { %s23_s30 = sadd.s32 1, %s969_s30  }
 0x2bf   : > { %p20_p7 = scmp.ge.s32.totalorder %s23_s30, 5  }
 0x2c1   :  { %22 = sbr.rel (!%p20_p7) target bundleno = 4 (0x4), region = 111 }
 0x2c6   :  { %570 = vsyncpa [#allocation3], 1 }
 0x2c7   :  { %572 = vsyncpa [#allocation3 + $0x1], 1 }
 0x2c8   :  { %573 = vsyncpa [#allocation5], 1 }
 0x2c9   :  { %574 = vsyncpa [#allocation8], 1 }
 0x2ca   :  { %575 = vsyncpa [#allocation11], 1 }

// kernel: fgn_forward.8
= control target key start
LH: loop header
LB: loop body
LE: loop exit
PB: predicated region body
PF: predicated region fallthrough
CT: control target
= control target key end

     0   :  { %s2792_s29 = smov [#allocation8]   ;;  %s3305_s0 = inlined_call_operand.vmem [shape: s32[24], index: 0, kind: input, shape index: {}]   ;;  %s3306_s2 = inlined_call_operand.vmem [shape: f32[16,32], index: 2, kind: input, shape index: {}]   ;;  %s3307_s3 = inlined_call_operand.vmem [shape: f32[24,32], index: 3, kind: input, shape index: {}]   ;;  %s3308_s4 = inlined_call_operand.hbm [shape: f32[32,32], index: 4, kind: input, shape index: {}]   ;;  %s3309_s5 = inlined_call_operand.hbm [shape: f32[32,32], index: 5, kind: input, shape index: {}]   ;;  %s3310_s6 = inlined_call_operand.hbm [shape: f32[32,32], index: 6, kind: input, shape index: {}]   ;;  %s3311_s7 = inlined_call_operand.hbm [shape: f32[1,32], index: 7, kind: input, shape index: {}]   ;;  %s3312_s8 = inlined_call_operand.hbm [shape: f32[32,32], index: 8, kind: input, shape index: {}]   ;;  %s3313_s9 = inlined_call_operand.hbm [shape: f32[1,32], index: 9, kind: input, shape index: {}]   ;;  %s3314_s10 = inlined_call_operand.hbm [shape: f32[32,32], index: 10, kind: input, shape index: {}]   ;;  %s3315_s11 = inlined_call_operand.hbm [shape: f32[1,32], index: 11, kind: input, shape index: {}]   ;;  %s3316_s12 = inlined_call_operand.hbm [shape: f32[1,32], index: 12, kind: input, shape index: {}]   ;;  %s3317_s13 = inlined_call_operand.hbm [shape: f32[1,32], index: 13, kind: input, shape index: {}]   ;;  %s3318_s14 = inlined_call_operand.hbm [shape: f32[32,32], index: 14, kind: input, shape index: {}]   ;;  %s3319_s15 = inlined_call_operand.hbm [shape: f32[32,32], index: 15, kind: input, shape index: {}]   ;;  %s3320_s16 = inlined_call_operand.hbm [shape: f32[1,32], index: 16, kind: input, shape index: {}]   ;;  %s3321_s17 = inlined_call_operand.hbm [shape: f32[32,32], index: 17, kind: input, shape index: {}]   ;;  %s3322_s18 = inlined_call_operand.hbm [shape: f32[1,32], index: 18, kind: input, shape index: {}]   ;;  %s3323_s19 = inlined_call_operand.hbm [shape: f32[32,32], index: 19, kind: input, shape index: {}]   ;;  %s3324_s20 = inlined_call_operand.hbm [shape: f32[1,32], index: 20, kind: input, shape index: {}]   ;;  %s3325_s21 = inlined_call_operand.hbm [shape: f32[1,32], index: 21, kind: input, shape index: {}]   ;;  %s3326_s22 = inlined_call_operand.hbm [shape: f32[1,32], index: 22, kind: input, shape index: {}]   ;;  %s3327_s23 = inlined_call_operand.hbm [shape: f32[24,32], index: 23, kind: output, shape index: {0}]   ;;  %s3328_s24 = inlined_call_operand.vmem [shape: f32[16,32], index: 24, kind: output, shape index: {1}]   ;;  %s3329_s1 = inlined_call_operand.vmem [shape: s32[24], index: 1, kind: input, shape index: {}]  }
   0x1   :  { %3344 = sst [smem:[#allocation61_spill]] %s3305_s0  ;;  %s2793_s0 = smov [#allocation9]  }
   0x2   :  { %3345 = sst [smem:[#allocation62_spill]] %s3306_s2 }
   0x3   :  { %3346 = sst [smem:[#allocation63_spill]] %s3307_s3  ;;  %s36_s3 = sshll.u32 %s3329_s1, 4  ;;  %s37_s3 = int_to_ptr.vmem [resolvable:$true] %s36_s3 }
   0x4   :  { %3347 = sst [smem:[#allocation64_spill]] %s3308_s4 }
   0x5   :  { %3348 = sst [smem:[#allocation65_spill]] %s3309_s5 }
   0x6   :  { %3349 = sst [smem:[#allocation66_spill]] %s3310_s6 }
   0x7   :  { %3350 = sst [smem:[#allocation67_spill]] %s3311_s7 }
   0x8   :  { %3351 = sst [smem:[#allocation68_spill]] %s3312_s8 }
   0x9   :  { %3352 = sst [smem:[#allocation69_spill]] %s3313_s9 }
   0xa   :  { %3353 = sst [smem:[#allocation70_spill]] %s3315_s11 }
   0xb   :  { %3354 = sst [smem:[#allocation71_spill]] %s3322_s18 }
   0xc   :  { %3355 = sst [smem:[#allocation72_spill]] %s3327_s23 }
   0xd   :  { %3356 = sst [smem:[#allocation73_spill]] %s3328_s24 }
   0xe   :  { %s3357_s27 = sld [smem:[#allocation61_spill]] }
  0x14   :  { %s31_s18 = sshll.u32 %s3357_s27, 4  ;;  %s32_s18 = int_to_ptr.vmem [resolvable:$true] %s31_s18 }
  0x15   :  { %34 = dma.vmem_to_smem %s32_s18, 16, %s2792_s29, [#allocation7] }
  0x16   :  { %39 = dma.vmem_to_smem %s37_s3, 16, %s2793_s0, [#allocation7] }
  0x17   :  { %2722 = dma.done.wait [#allocation7], 32 }
  0x18   :  { %2723 = vsyncadd [#allocation7], 4294967264 }
  0x19   :  { %42 = sfence }
  0x1a   :  { %43 = vsyncpa [#allocation11], 0 }
  0x1b   :  { %44 = vsyncpa [#allocation14], 0 }
  0x1c   :  { %45 = vsyncpa [#allocation17], 0 }
  0x1d   :  { %46 = vsyncpa [#allocation20], 0 }
  0x1e   :  { %47 = vsyncpa [#allocation23], 0 }
  0x1f   :  { %48 = vsyncpa [#allocation26], 0 }
  0x20   :  { %49 = vsyncpa [#allocation29], 0 }
  0x21   :  { %50 = vsyncpa [#allocation32], 0 }
  0x22   :  { %51 = vsyncpa [#allocation35], 0 }
  0x23   :  { %52 = vsyncpa [#allocation38], 0 }
  0x24   :  { %53 = vsyncpa [#allocation12], 0 }
  0x25   :  { %55 = vsyncpa [#allocation12 + $0x1], 0  ;;  %s2948_s1 = smov 0   ;;  %s2950_s18 = smov 0  }
  0x26   :  { %s2952_s8 = smov 0   ;;  %s2954_s30 = smov 0  }
  0x27 LB: > { %3358 = sst [smem:[#allocation53_spill]] %s2770_s1  ;;  %s2969_s4 = sadd.s32 4294967295, %s2782_s30   ;;  %s2782_s30 = sphi %s2954_s30, %s3390_s30   ;;  %s2778_s8 = sphi %s2952_s8, %s3393_s8   ;;  %s2774_s18 = sphi %s2950_s18, %s3392_s18   ;;  %s2770_s1 = sphi %s2948_s1, %s3391_s1  }
  0x28   : > { %3359 = sst [smem:[#allocation54_spill]] %s2774_s18  ;;  %s1732_s25 = sadd.s32 4294967294, %s2782_s30  }
  0x29   : > { %3360 = sst [smem:[#allocation55_spill]] %s2778_s8  ;;  %s2973_s9 = sadd.s32 1, %s2782_s30  }
  0x2a   : > { %3361 = sst [smem:[#allocation56_spill]] %s2782_s30  ;;  %s514_s5 = sadd.s32 1, %s2778_s8 }
  0x2b   : > { %3362 = sst [smem:[#allocation57_spill]] %s2973_s9  ;;  %s511_s2 = ssub.s32 %s2782_s30, %s2973_s9 }
  0x2c   : > { %p524_p0 = scmp.ne.s32.totalorder %s2778_s8, %s2774_s18  ;;  %p512_p1 = scmp.eq.s32.totalorder %s511_s2, 0 }
  0x2d   : > { %p525_p2 = scmp.eq.s32.totalorder %s2969_s4, 2  ;;  %p530_p3 = scmp.ne.s32.totalorder %s2774_s18, %s2770_s1 }
  0x2e   : > { %p531_p4 = scmp.eq.s32.totalorder %s1732_s25, 2  ;;  %p1733_p7 = scmp.ge.s32.totalorder %s2782_s30, 1 }
  0x2f   : > { %s2984_s6 = scalar_select %p512_p1, %s2778_s8, %s514_s5  }
  0x30   : > { %p2986_p5 = por %p525_p2, %p524_p0  ;;  %p2990_p6 = por %p531_p4, %p530_p3 }
  0x31   : > { %3363 = sst [smem:[#allocation58_spill]] %s2984_s6  ;;  %p559_p8 = scmp.lt.s32.totalorder %s2782_s30, 4 }
  0x32   : > { %s3364_s26 = scalar_select %p2986_p5, 1, 0 }
  0x33   : > { %s3366_s27 = scalar_select %p2990_p6, 1, 0 }
  0x34   : > { %3365 = sst [smem:[#allocation59_spill]] %s3364_s26  ;;  %p1734_p9 = scmp.ne.s32.totalorder %s2969_s4, 0 }
  0x35   : > { %3367 = sst [smem:[#allocation60_spill]] %s3366_s27  ;;  %p1946_p10 = scmp.eq.s32.totalorder %s2969_s4, 0 }
  0x36   : > { %p2998_p11 = pnand %p1733_p7, %p559_p8  ;;  %s3369_s29 = sld [smem:[#allocation65_spill]] }
  0x37   : > { %s3370_s2 = sld [smem:[#allocation67_spill]]  ;;  %s2794_s9 = smov [#allocation13]  }
  0x38   : > { %p1884_p12 = pneg %p2998_p11  ;;  %s589_s27 = sshll.u32 %s2794_s9, 4  ;;  %s590_s27 = int_to_ptr.vmem [resolvable:$true] %s589_s27 }
  0x39   : > { %s2795_s7 = smov 128   ;;  %s2796_s3 = smov 8  }
  0x3a   : > { %p3012_p13 = pnand %p1946_p10, %p1884_p12  ;;  %s3372_s1 = sld [smem:[#allocation69_spill]] }
  0x3b   : > { %s3373_s11 = sld [smem:[#allocation70_spill]]  ;;  %s2798_s24 = smov [#allocation19]  }
  0x3c   : > { %s587_s0 = sshll.u32 %s3369_s29, 4  ;;  %s2797_s29 = smov [#allocation16]   ;;  %s588_s0 = int_to_ptr.hbm [resolvable:$true] %s587_s0 }
  0x3d   : > { %s616_s6 = sshll.u32 %s3370_s2, 4  ;;  %s618_s25 = sshll.u32 %s2797_s29, 4  ;;  %s617_s6 = int_to_ptr.hbm [resolvable:$true] %s616_s6  ;;  %s619_s25 = int_to_ptr.vmem [resolvable:$true] %s618_s25 }
  0x3e   : > { %1890 = dma.hbm_to_vmem [thread:$0]  (!%p3012_p13), %s588_s0, 512, %s590_s27, [#allocation14], %s2795_s7, %s2795_s7, %s2796_s3  }
  0x3f   : > { %1896 = dma.hbm_to_vmem [thread:$0]  (!%p3012_p13), %s617_s6, 16, %s619_s25, [#allocation17]  }
  0x40   : > { %s642_s30 = sshll.u32 %s3372_s1, 4  ;;  %s644_s18 = sshll.u32 %s2798_s24, 4  ;;  %s643_s30 = int_to_ptr.hbm [resolvable:$true] %s642_s30  ;;  %s645_s18 = int_to_ptr.vmem [resolvable:$true] %s644_s18 }
  0x41   : > { %s668_s23 = sshll.u32 %s3373_s11, 4  ;;  %s2799_s27 = smov [#allocation22]   ;;  %s669_s23 = int_to_ptr.hbm [resolvable:$true] %s668_s23 }
  0x42   : > { %1902 = dma.hbm_to_vmem [thread:$0]  (!%p3012_p13), %s643_s30, 16, %s645_s18, [#allocation20]  }
  0x43   : > { %s670_s0 = sshll.u32 %s2799_s27, 4  ;;  %s692_s1 = sshll.u32 %s3317_s13, 4  ;;  %s671_s0 = int_to_ptr.vmem [resolvable:$true] %s670_s0  ;;  %s693_s1 = int_to_ptr.hbm [resolvable:$true] %s692_s1 }
  0x44   : > { %1908 = dma.hbm_to_vmem [thread:$0]  (!%p3012_p13), %s669_s23, 16, %s671_s0, [#allocation23]  }
  0x45   : > { %s717_s25 = sshll.u32 %s3319_s15, 4  ;;  %s2800_s24 = smov [#allocation25]   ;;  %s718_s25 = int_to_ptr.hbm [resolvable:$true] %s717_s25 }
  0x46   : > { %s694_s2 = sshll.u32 %s2800_s24, 4  ;;  %s2801_s18 = smov [#allocation28]   ;;  %s695_s2 = int_to_ptr.vmem [resolvable:$true] %s694_s2 }
  0x47   : > { %1914 = dma.hbm_to_vmem [thread:$0]  (!%p3012_p13), %s693_s1, 16, %s695_s2, [#allocation26]  }
  0x48   : > { %s719_s30 = sshll.u32 %s2801_s18, 4  ;;  %s743_s29 = sshll.u32 %s3321_s17, 4  ;;  %s720_s30 = int_to_ptr.vmem [resolvable:$true] %s719_s30  ;;  %s744_s29 = int_to_ptr.hbm [resolvable:$true] %s743_s29 }
  0x49   : > { %1920 = dma.hbm_to_vmem [thread:$0]  (!%p3012_p13), %s718_s25, 512, %s720_s30, [#allocation29], %s2795_s7, %s2795_s7, %s2796_s3  }
  0x4a   : > { %s769_s5 = sshll.u32 %s3323_s19, 4  ;;  %s2802_s6 = smov [#allocation31]   ;;  %s770_s5 = int_to_ptr.hbm [resolvable:$true] %s769_s5 }
  0x4b   : > { %s745_s1 = sshll.u32 %s2802_s6, 4  ;;  %s2803_s26 = smov [#allocation34]   ;;  %s746_s1 = int_to_ptr.vmem [resolvable:$true] %s745_s1 }
  0x4c   : > { %1926 = dma.hbm_to_vmem [thread:$0]  (!%p3012_p13), %s744_s29, 512, %s746_s1, [#allocation32], %s2795_s7, %s2795_s7, %s2796_s3  }
  0x4d   : > { %s771_s24 = sshll.u32 %s2803_s26, 4  ;;  %s796_s25 = sshll.u32 %s3325_s21, 4  ;;  %s772_s24 = int_to_ptr.vmem [resolvable:$true] %s771_s24  ;;  %s797_s25 = int_to_ptr.hbm [resolvable:$true] %s796_s25 }
  0x4e   : > { %1932 = dma.hbm_to_vmem [thread:$0]  (!%p3012_p13), %s770_s5, 512, %s772_s24, [#allocation35], %s2795_s7, %s2795_s7, %s2796_s3  }
  0x4f   : > { %s3374_s27 = sld [smem:[#allocation64_spill]]  ;;  %s2804_s0 = smov [#allocation37]  }
  0x50   : > { %s798_s29 = sshll.u32 %s2804_s0, 4  ;;  %s2805_s6 = smov [#allocation10]   ;;  %s799_s29 = int_to_ptr.vmem [resolvable:$true] %s798_s29 }
  0x51   : > { %1938 = dma.hbm_to_vmem [thread:$0]  (!%p3012_p13), %s797_s25, 16, %s799_s29, [#allocation38]  }
  0x52   : > { %s575_s1 = sshll.u32 %s2805_s6, 4  ;;  %s3375_s18 = sld [smem:[#allocation66_spill]]  ;;  %s576_s1 = int_to_ptr.vmem [resolvable:$true] %s575_s1 }
  0x53   : > { %s3376_s30 = sld [smem:[#allocation68_spill]]  ;;  %s2807_s0 = smov [#allocation18]  }
  0x54   : > { %s629_s29 = sshll.u32 %s2807_s0, 4  ;;  %s2808_s5 = smov [#allocation21]   ;;  %s630_s29 = int_to_ptr.vmem [resolvable:$true] %s629_s29 }
  0x55   : > { %s573_s23 = sshll.u32 %s3374_s27, 4  ;;  %s2806_s27 = smov [#allocation15]   ;;  %s574_s23 = int_to_ptr.hbm [resolvable:$true] %s573_s23 }
  0x56   : > { %1887 = dma.hbm_to_vmem [thread:$0]  (!%p3012_p13), %s574_s23, 512, %s576_s1, [#allocation11], %s2795_s7, %s2795_s7, %s2796_s3  }
  0x57   : > { %s603_s25 = sshll.u32 %s2806_s27, 4  ;;  %s653_s23 = sshll.u32 %s3314_s10, 4  ;;  %s604_s25 = int_to_ptr.vmem [resolvable:$true] %s603_s25  ;;  %s654_s23 = int_to_ptr.hbm [resolvable:$true] %s653_s23 }
  0x58   : > { %s601_s11 = sshll.u32 %s3375_s18, 4  ;;  %s680_s18 = sshll.u32 %s3316_s12, 4  ;;  %s602_s11 = int_to_ptr.hbm [resolvable:$true] %s601_s11  ;;  %s681_s18 = int_to_ptr.hbm [resolvable:$true] %s680_s18 }
  0x59   : > { %s627_s9 = sshll.u32 %s3376_s30, 4  ;;  %s2809_s24 = smov [#allocation24]   ;;  %s628_s9 = int_to_ptr.hbm [resolvable:$true] %s627_s9 }
  0x5a   : > { %1893 = dma.hbm_to_vmem [thread:$0]  (!%p3012_p13), %s602_s11, 512, %s604_s25, [#allocation14], %s2795_s7, %s2795_s7, %s2796_s3  }
  0x5b   : > { %1899 = dma.hbm_to_vmem [thread:$0]  (!%p3012_p13), %s628_s9, 512, %s630_s29, [#allocation17], %s2795_s7, %s2795_s7, %s2796_s3  }
  0x5c   : > { %s655_s11 = sshll.u32 %s2808_s5, 4  ;;  %s682_s30 = sshll.u32 %s2809_s24, 4  ;;  %s656_s11 = int_to_ptr.vmem [resolvable:$true] %s655_s11  ;;  %s683_s30 = int_to_ptr.vmem [resolvable:$true] %s682_s30 }
  0x5d   : > { %1905 = dma.hbm_to_vmem [thread:$0]  (!%p3012_p13), %s654_s23, 512, %s656_s11, [#allocation20], %s2795_s7, %s2795_s7, %s2796_s3  }
  0x5e   : > { %s703_s9 = sshll.u32 %s3318_s14, 4  ;;  %s732_s6 = sshll.u32 %s3320_s16, 4  ;;  %s704_s9 = int_to_ptr.hbm [resolvable:$true] %s703_s9  ;;  %s733_s6 = int_to_ptr.hbm [resolvable:$true] %s732_s6 }
  0x5f   : > { %1911 = dma.hbm_to_vmem [thread:$0]  (!%p3012_p13), %s681_s18, 16, %s683_s30, [#allocation23]  }
  0x60   : > { %s2810_s26 = smov [#allocation27]   ;;  %s2811_s23 = smov [#allocation30]  }
  0x61   : > { %s705_s1 = sshll.u32 %s2810_s26, 4  ;;  %s734_s2 = sshll.u32 %s2811_s23, 4  ;;  %s706_s1 = int_to_ptr.vmem [resolvable:$true] %s705_s1  ;;  %s735_s2 = int_to_ptr.vmem [resolvable:$true] %s734_s2 }
  0x62   : > { %1917 = dma.hbm_to_vmem [thread:$0]  (!%p3012_p13), %s704_s9, 512, %s706_s1, [#allocation26], %s2795_s7, %s2795_s7, %s2796_s3  }
  0x63   : > { %s3377_s18 = sld [smem:[#allocation71_spill]]  ;;  %s784_s25 = sshll.u32 %s3324_s20, 4  ;;  %s785_s25 = int_to_ptr.hbm [resolvable:$true] %s784_s25 }
  0x64   : > { %1923 = dma.hbm_to_vmem [thread:$0]  (!%p3012_p13), %s733_s6, 16, %s735_s2, [#allocation29]  }
  0x65   : > { %s2812_s0 = smov [#allocation33]   ;;  %s2813_s7 = smov [#allocation36]  }
  0x66   : > { %s760_s29 = sshll.u32 %s2812_s0, 4  ;;  %s786_s3 = sshll.u32 %s2813_s7, 4  ;;  %s761_s29 = int_to_ptr.vmem [resolvable:$true] %s760_s29  ;;  %s787_s3 = int_to_ptr.vmem [resolvable:$true] %s786_s3 }
  0x67   : > { %s808_s1 = sshll.u32 %s3326_s22, 4  ;;  %s2814_s6 = smov [#allocation39]   ;;  %s809_s1 = int_to_ptr.hbm [resolvable:$true] %s808_s1 }
  0x68   : > { %1935 = dma.hbm_to_vmem [thread:$0]  (!%p3012_p13), %s785_s25, 16, %s787_s3, [#allocation35]  }
  0x69   : > { %s758_s24 = sshll.u32 %s3377_s18, 4  ;;  %s810_s23 = sshll.u32 %s2814_s6, 4  ;;  %s759_s24 = int_to_ptr.hbm [resolvable:$true] %s758_s24  ;;  %s811_s23 = int_to_ptr.vmem [resolvable:$true] %s810_s23 }
  0x6a   : > { %1929 = dma.hbm_to_vmem [thread:$0]  (!%p3012_p13), %s759_s24, 16, %s761_s29, [#allocation32]  }
  0x6b   : > { %1941 = dma.hbm_to_vmem [thread:$0]  (!%p3012_p13), %s809_s1, 16, %s811_s23, [#allocation38]  }
  0x6c   : > { %830 = sbr.rel (%p2998_p11) target bundleno = 1705 (0x6a9), region = 104 }
  0x71   : > { %2725 = dma.done.wait (%p1946_p10), [#allocation11], 512  }
  0x72   : > { %2727 = vsyncadd (%p1946_p10), [#allocation11], 4294966784 }
  0x73   : > { %2729 = dma.done.wait (%p1946_p10), [#allocation14], 1024  }
  0x74   : > { %2731 = vsyncadd (%p1946_p10), [#allocation14], 4294966272 }
  0x75   : > { %2733 = dma.done.wait (%p1946_p10), [#allocation17], 528  }
  0x76   : > { %2735 = vsyncadd (%p1946_p10), [#allocation17], 4294966768 }
  0x77   : > { %2737 = dma.done.wait (%p1946_p10), [#allocation20], 528  }
  0x78   : > { %2739 = vsyncadd (%p1946_p10), [#allocation20], 4294966768 }
  0x79   : > { %2741 = dma.done.wait (%p1946_p10), [#allocation23], 32  }
  0x7a   : > { %2743 = vsyncadd (%p1946_p10), [#allocation23], 4294967264 }
  0x7b   : > { %2745 = dma.done.wait (%p1946_p10), [#allocation26], 528  }
  0x7c   : > { %2747 = vsyncadd (%p1946_p10), [#allocation26], 4294966768 }
  0x7d   : > { %2749 = dma.done.wait (%p1946_p10), [#allocation29], 528  }
  0x7e   : > { %2751 = vsyncadd (%p1946_p10), [#allocation29], 4294966768 }
  0x7f   : > { %2753 = dma.done.wait (%p1946_p10), [#allocation32], 528  }
  0x80   : > { %2755 = vsyncadd (%p1946_p10), [#allocation32], 4294966768 }
  0x81   : > { %2757 = dma.done.wait (%p1946_p10), [#allocation35], 528  }
  0x82   : > { %2759 = vsyncadd (%p1946_p10), [#allocation35], 4294966768 }
  0x83   : > { %2761 = dma.done.wait (%p1946_p10), [#allocation38], 32  }
  0x84   : > { %2763 = vsyncadd (%p1946_p10), [#allocation38], 4294967264  ;;  %s3378_s8 = sld [smem:[#allocation54_spill]]  ;;  %p982_p0 = scmp.lt.s32.totalorder %s2969_s4, 2 }
  0x85   : > { %s3379_s30 = sld [smem:[#allocation63_spill]] }
  0x86   : > { %s983_s5 = scalar_select %p982_p0, %s2969_s4, 2 }
  0x87   : > { %s3380_s7 = sld [smem:[#allocation62_spill]] (!%p1734_p9) }
  0x88   : > { %s1775_s11 = sshll.u32 %s983_s5, 3  ;;  %989 = sbr.rel (%p1734_p9) target bundleno = 283 (0x11b), region = 184 }
  0x8a   : > { %s977_s28 = sand.u32 1, %s3378_s8  }
  0x8b   : > { %s3178_s2 = sshll.u32 %s977_s28, 3  ;;  %s3184_s27 = scalar_lea.vmem %s3379_s30, %s1775_s11 }
  0x8c   : > { %s979_s25 = scalar_lea.vmem [#allocation40], %s3178_s2 }
  0x8d   : > { %v995_v0 = vld [vmem:[#allocation10 + $0x18] sm:$0xff]  ;;  %v994_v2 = vld [vmem:[#allocation10 + $0x10] sm:$0xff]  ;;  %vm996_vm0 = vcmask 261120   ;;  %v2815_v4 = vmov 0.0   ;;  %v993_v5 = vld [vmem:[#allocation10 + $0x8] sm:$0xff] }
  0x8e   : > { %v1031_v1 = vld [vmem:[#allocation13 + $0x18] sm:$0xff]  ;;  %1798 = vmatpush.msra.mxu2 %v995_v0  ;;  %v1030_v3 = vld [vmem:[#allocation13 + $0x10] sm:$0xff]  ;;  %1057 = vst.msk [vmem:[#allocation4] sm:$0xff] %vm996_vm0, %v2815_v4  ;;  %v1029_v6 = vld [vmem:[#allocation13 + $0x8] sm:$0xff]  ;;  %1015 = vmatpush.msra.mxu0 %v995_v0 }
  0x8f   : > { %1802 = vmatpush.msra.mxu3 %v1031_v1  ;;  %1044 = vmatpush.msra.mxu1 %v1031_v1  ;;  %1058 = vst.msk [vmem:[#allocation4 + $0x8] sm:$0xff] %vm996_vm0, %v2815_v4  ;;  %v992_v7 = vld [vmem:[#allocation10] sm:$0xff]  ;;  %v991_v9 = vld [vmem:[%s3380_s7 + $0x8] sm:$0xff] }
  0x90   : > { %1799 = vmatpush.msra.mxu2 %v994_v2  ;;  %v1028_v8 = vld [vmem:[#allocation13] sm:$0xff]  ;;  %1016 = vmatpush.msra.mxu0 %v994_v2 }
  0x91   : > { %1803 = vmatpush.msra.mxu3 %v1030_v3  ;;  %1045 = vmatpush.msra.mxu1 %v1030_v3  ;;  %v990_v10 = vld [vmem:[%s3380_s7] sm:$0xff] }
  0x92   : > { %1800 = vmatpush.msra.mxu2 %v993_v5  ;;  %1017 = vmatpush.msra.mxu0 %v993_v5 }
  0x93   : > { %1804 = vmatpush.msra.mxu3 %v1029_v6  ;;  %1046 = vmatpush.msra.mxu1 %v1029_v6 }
  0x94   : > { %1801 = vmatpush.msra.mxu2 %v992_v7  ;;  %1018 = vmatpush.msra.mxu0 %v992_v7 }
  0x95   : > { %1805 = vmatpush.msra.mxu3 %v1028_v8  ;;  %1778 = vmatmul.msk.f32.vlgmr.msra.gmra.mxu2 %vm996_vm0, %v991_v9 }
  0x96   : > { %1780 = vmatmul.msk.f32.vlgmr.msra.gmra.mxu3 %vm996_vm0, %v991_v9  ;;  %1047 = vmatpush.msra.mxu1 %v1028_v8 }
  0x97   : > { %1777 = vmatmul.msk.f32.vlgmr.msra.gmra.mxu0 %vm996_vm0, %v990_v10  ;;  %1779 = vmatmul.msk.f32.vlgmr.msra.gmra.mxu1 %vm996_vm0, %v990_v10 }
 0x114   : > { %v1020_v11 = vpop.f32.mrf.mxu0  ;;  %v1049_v12 = vpop.f32.mrf.mxu1 }
 0x115   : > { %1026 = vst.msk [vmem:[#allocation2] sm:$0xff] %vm996_vm0, %v1020_v11 }
 0x116   : > { %1055 = vst.msk [vmem:[#allocation3] sm:$0xff] %vm996_vm0, %v1049_v12 }
 0x118   : > { %v1023_v13 = vpop.f32.mrf.mxu2 }
 0x119   : > { %v1052_v14 = vpop.f32.mrf.mxu3  ;;  %1027 = vst.msk [vmem:[#allocation2 + $0x8] sm:$0xff] %vm996_vm0, %v1023_v13 }
 0x11a   : > { %1056 = vst.msk [vmem:[#allocation3 + $0x8] sm:$0xff] %vm996_vm0, %v1052_v14 }
 0x11b PF: > { %v1063_v15 = vld [vmem:[#allocation15 + $0x18] sm:$0xff]  ;;  %v1062_v16 = vld [vmem:[#allocation15 + $0x10] sm:$0xff]  ;;  %v1061_v17 = vld [vmem:[#allocation15 + $0x8] sm:$0xff]  ;;  %vm1068_vm1 = vcmask 261120   ;;  %s3211_s26 = sshll.u32 %s2969_s4, 3  ;;  %s2784_s1 = smov 0  }
 0x11c   : > { %1084 = vmatpush.msra.mxu0 %v1063_v15  ;;  %v1060_v18 = vld [vmem:[#allocation15] sm:$0xff] }
 0x11d   : > { %v3206_v19 = vld [vmem:[%s3184_s27] sm:$0xff] }
 0x11e   : > { %1085 = vmatpush.msra.mxu0 %v1062_v16  ;;  %v2058_v20 = vld [vmem:[#allocation16] ss:$0 sm:$0xff] }
 0x120   : > { %1086 = vmatpush.msra.mxu0 %v1061_v17 }
 0x122   : > { %1087 = vmatpush.msra.mxu0 %v1060_v18 }
 0x123   : > { %1781 = vmatmul.msk.f32.vlgmr.msra.gmra.mxu0 %vm1068_vm1, %v3206_v19 }
 0x1a0   : > { %v1089_v21 = vpop.f32.mrf.mxu0 }
 0x1a1   : > { %v1090_v22 = vadd.f32 %v2058_v20, %v1089_v21 }
 0x1a3   : > { %1092 = vst.msk [vmem:[#allocation5] sm:$0xff] %vm1068_vm1, %v1090_v22 }
 0x1a4 LB: >> { %s1100_s6 = sadd.s32 %s2786_s1, %s3211_s26  ;;  %s1103_s5 = scalar_lea.vmem [#allocation5], %s2786_s1  ;;  %vm1111_vm2 = vcmask 253952   ;;  %s2786_s1 = sphi %s2784_s1, %s1099_s1  }
 0x1a5   : >> { %s1101_s23 = sld [smem:[#allocation8 + %s1100_s6]]  ;;  %s1099_s1 = sadd.s32 1, %s2786_s1  }
 0x1a6   : >> { %s1102_s8 = sld [smem:[#allocation9 + %s1100_s6]]  ;;  %p1096_p1 = scmp.ge.s32.totalorder %s1099_s1, 8  }
 0x1a7   : > { %v1118_v28 = vld [vmem:[#allocation18 + $0x18] sm:$0xff] (%p1096_p1)  ;;  %v1117_v29 = vld [vmem:[#allocation18 + $0x10] sm:$0xff] (%p1096_p1)  ;;  %v1116_v32 = vld [vmem:[#allocation18 + $0x8] sm:$0xff] (%p1096_p1)  ;;  %v2816_v46 = vmov (%p1096_p1), 32.0   ;;  %s2788_s24 = smov (%p1096_p1), 0  }
 0x1a8   : > { %1138 = vmatpush.msra.mxu1 (%p1096_p1), %v1118_v28  ;;  %v1150_v31 = vld [vmem:[#allocation21 + $0x18] sm:$0xff] (%p1096_p1)  ;;  %v1149_v35 = vld [vmem:[#allocation21 + $0x10] sm:$0xff] (%p1096_p1)  ;;  %v1148_v36 = vld [vmem:[#allocation21 + $0x8] sm:$0xff] (%p1096_p1)  ;;  %2063 = vrcp.f32 (%p1096_p1), %v2816_v46 }
 0x1a9   : > { %1170 = vmatpush.msra.mxu2 (%p1096_p1), %v1150_v31  ;;  %v1115_v33 = vld [vmem:[#allocation18] sm:$0xff] (%p1096_p1) }
 0x1aa   : >> { %v1104_v23 = vld [vmem:[%s1103_s5] sm:$0x1]  ;;  %1139 = vmatpush.msra.mxu1 (%p1096_p1), %v1117_v29  ;;  %v1147_v37 = vld [vmem:[#allocation21] sm:$0xff] (%p1096_p1)  ;;  %v2059_v38 = vld [vmem:[#allocation19] ss:$0 sm:$0xff] (%p1096_p1) }
 0x1ab   : >> { %s1105_s11 = scalar_lea.vmem [#allocation2], %s1101_s23  ;;  %1171 = vmatpush.msra.mxu2 (%p1096_p1), %v1149_v35  ;;  %v2060_v42 = vld [vmem:[#allocation22] ss:$0 sm:$0xff] (%p1096_p1)  ;;  %v2061_v3 = vld [vmem:[#allocation24] ss:$0 sm:$0xff] (%p1096_p1) }
 0x1ac   : >> { %v1106_v24 = vld [vmem:[%s1105_s11] sm:$0x1]  ;;  %s1108_s18 = scalar_lea.vmem [#allocation3], %s1102_s8  ;;  %1140 = vmatpush.msra.mxu1 (%p1096_p1), %v1116_v32  ;;  %v2062_v5 = vld [vmem:[#allocation25] ss:$0 sm:$0xff] (%p1096_p1) }
 0x1ad   : >> { %v1107_v25 = vadd.f32 %v1106_v24, %v1104_v23  ;;  %v1109_v26 = vld [vmem:[%s1108_s18] sm:$0x1]  ;;  %1098 = sbr.rel (!%p1096_p1) target bundleno = 420 (0x1a4), region = 251  ;;  %1172 = vmatpush.msra.mxu2 (%p1096_p1), %v1148_v36 }
 0x1ae   : > { %1141 = vmatpush.msra.mxu1 (%p1096_p1), %v1115_v33  ;;  %v2064_v47 = vpop.eup (%p1096_p1), %2063 }
 0x1af   : >> { %v1110_v27 = vadd.f32 %v1109_v26, %v1107_v25  ;;  %1173 = vmatpush.msra.mxu2 (%p1096_p1), %v1147_v37  ;;  %v1184_v48 = vmul.f32 (%p1096_p1), 32.0, %v2064_v47  ;;  %vm1188_vm3 = vweird.f32 (%p1096_p1), %v2064_v47 }
 0x1b1   : >> { %1112 = vst.msk [vmem:[%s1103_s5] sm:$0x1] %vm1111_vm2, %v1110_v27  ;;  %v1185_v49 = vsub.f32 (%p1096_p1), 1.0, %v1184_v48 }
 0x1b3   : > { %v1186_v50 = vmul.f32 %v2064_v47, %v1185_v49 }
 0x1b5   : > { %v1187_v51 = vadd.f32 %v2064_v47, %v1186_v50 }
 0x1b7   : > { %v3219_v52 = vsel %vm1188_vm3, %v2064_v47, %v1187_v51 }
 0x1b8   : > { %v1113_v30 = vld [vmem:[#allocation5] sm:$0xff] }
 0x1b9   : > { %v1114_v34 = vmax.f32 %v1113_v30, 0.0 }
 0x1bb   : > { %1783 = vmatmul.msk.f32.vlgmr.msra.gmra.mxu1 %vm1068_vm1, %v1114_v34 }
 0x238   : > { %v1143_v39 = vpop.f32.mrf.mxu1 }
 0x239   : > { %v1144_v40 = vadd.f32 %v2059_v38, %v1143_v39 }
 0x23b   : > { %v1146_v41 = vmax.f32 %v1144_v40, 0.0 }
 0x23d   : > { %1784 = vmatmul.msk.f32.vlgmr.msra.gmra.mxu2 %vm1068_vm1, %v1146_v41 }
 0x2c0   : > { %v1175_v43 = vpop.f32.mrf.mxu2 }
 0x2c1   : > { %v1176_v44 = vadd.f32 %v2060_v42, %v1175_v43 }
 0x2c3   : > { %v1180_v45 = vsel %vm1068_vm1, %v1176_v44, 0.0 }
 0x2c4   : > { %1181 = vadd.xlane.f32.xlu0 %v1180_v45 }
 0x337   : > { %v1182_v53 = vpop.xlane.xlu0 %1181 }
 0x338   : > { %v1190_v54 = vmul.f32 %v3219_v52, %v1182_v53 }
 0x33a   : > { %v1191_v55 = vsub.f32 %v1176_v44, %v1190_v54 }
 0x33c   : > { %v1192_v56 = vmul.f32 %v1191_v55, %v1191_v55 }
 0x33e   : > { %v1193_v57 = vsel %vm1068_vm1, %v1192_v56, 0.0 }
 0x33f   : > { %1194 = vadd.xlane.f32.xlu0 %v1193_v57 }
 0x3b2   : > { %v1195_v58 = vpop.xlane.xlu0 %1194 }
 0x3b3   : > { %v1196_v59 = vmul.f32 %v1195_v58, %v3219_v52 }
 0x3b5   : > { %v1197_v60 = vadd.f32 1e-05, %v1196_v59 }
 0x3b7   : > { %2065 = vrsqrt.f32 %v1197_v60  ;;  %vm1204_vm5 = vweird.f32 %v1197_v60 }
 0x3bd   : > { %v2066_v61 = vpop.eup %2065 }
 0x3be   : > { %v1199_v62 = vmul.f32 %v2066_v61, %v1197_v60  ;;  %vm1205_vm4 = vweird.f32 %v2066_v61 }
 0x3bf   : > { %vm1206_vm6 = vmor %vm1204_vm5, %vm1205_vm4 }
 0x3c0   : > { %v1200_v63 = vmul.f32 %v2066_v61, %v1199_v62 }
 0x3c2   : > { %v1201_v0 = vmul.f32 0.5, %v1200_v63 }
 0x3c4   : > { %v1202_v1 = vsub.f32 1.5, %v1201_v0 }
 0x3c6   : > { %v1203_v2 = vmul.f32 %v2066_v61, %v1202_v1 }
 0x3c8   : > { %v1207_v4 = vsel %vm1206_vm6, %v2066_v61, %v1203_v2 }
 0x3c9   : > { %v1208_v6 = vmul.f32 %v1207_v4, %v1191_v55 }
 0x3cb   : > { %v1212_v7 = vmul.f32 %v2061_v3, %v1208_v6 }
 0x3cd   : > { %v1216_v8 = vadd.f32 %v2062_v5, %v1212_v7 }
 0x3cf   : > { %1217 = vst.msk [vmem:[#allocation6] sm:$0xff] %vm1068_vm1, %v1216_v8  ;;  %v1218_v9 = vadd.f32 %v1216_v8, %v3206_v19 }
 0x3d1   : > { %1219 = vst.msk [vmem:[%s979_s25] sm:$0xff] %vm1068_vm1, %v1218_v9 }
 0x3d2 LB: >> { %s1226_s30 = sadd.s32 %s2790_s24, %s3211_s26  ;;  %s1230_s0 = scalar_lea.vmem [#allocation6], %s2790_s24  ;;  %s2790_s24 = sphi %s2788_s24, %s1225_s24  }
 0x3d3   : >> { %s1227_s27 = sld [smem:[#allocation8 + %s1226_s30]]  ;;  %s1225_s24 = sadd.s32 1, %s2790_s24  }
 0x3d4   : >> { %p1222_p2 = scmp.ge.s32.totalorder %s1225_s24, 8  }
 0x3d5   : > { %p1785_p3 = scmp.ne.s32.totalorder (%p1222_p2), %s2969_s4, 2 }
 0x3d6   : >> { %v1231_v10 = vld [vmem:[%s1230_s0] sm:$0x1] }
 0x3d9   : >> { %s1228_s29 = scalar_lea.vmem [#allocation4], %s1227_s27  ;;  %1224 = sbr.rel (!%p1222_p2) target bundleno = 978 (0x3d2), region = 262 }
 0x3da   : >> { %v1229_v11 = vld [vmem:[%s1228_s29] sm:$0x1] }
 0x3db   : >> { %v1232_v12 = vadd.f32 %v1231_v10, %v1229_v11 }
 0x3dd   : >> { %1234 = vst.msk [vmem:[%s1228_s29] sm:$0x1] %vm1111_vm2, %v1232_v12 }
 0x3de   : > { %1238 = sbr.rel (%p1785_p3) target bundleno = 1685 (0x695), region = 202  ;;  %s3381_s9 = sld [smem:[#allocation62_spill]] (!%p1785_p3) }
 0x3df   : > { %s3382_s8 = sld [smem:[#allocation73_spill]] (!%p1785_p3) }
 0x3e3   : > { %v1250_v13 = vld [vmem:[#allocation28 + $0x18] sm:$0xff]  ;;  %v1249_v15 = vld [vmem:[#allocation28 + $0x10] sm:$0xff]  ;;  %v1248_v17 = vld [vmem:[#allocation28 + $0x8] sm:$0xff] }
 0x3e4   : > { %v1246_v14 = vld [vmem:[#allocation27 + $0x18] sm:$0xff]  ;;  %1269 = vmatpush.msra.mxu0 %v1250_v13  ;;  %v1245_v16 = vld [vmem:[#allocation27 + $0x10] sm:$0xff]  ;;  %v1244_v18 = vld [vmem:[#allocation27 + $0x8] sm:$0xff] }
 0x3e5   : > { %1298 = vmatpush.msra.mxu1 %v1246_v14  ;;  %v1247_v19 = vld [vmem:[#allocation28] sm:$0xff]  ;;  %v3235_v21 = vld [vmem:[%s3381_s9] sm:$0xff]  ;;  %v1318_v27 = vld [vmem:[#allocation31 + $0x8] sm:$0xff]  ;;  %s3383_s5 = smov %s3382_s8 }
 0x3e6   : > { %1270 = vmatpush.msra.mxu0 %v1249_v15  ;;  %v1243_v20 = vld [vmem:[#allocation27] sm:$0xff]  ;;  %v1241_v22 = vld [vmem:[#allocation4] sm:$0xff]  ;;  %v1357_v42 = vld [vmem:[#allocation34 + $0x8] sm:$0xff] }
 0x3e7   : > { %1299 = vmatpush.msra.mxu1 %v1245_v16  ;;  %v3243_v23 = vld [vmem:[%s3381_s9 + $0x8] sm:$0xff]  ;;  %v1319_v26 = vld [vmem:[#allocation31 + $0x10] sm:$0xff] }
 0x3e8   : > { %1271 = vmatpush.msra.mxu0 %v1248_v17  ;;  %v1242_v24 = vld [vmem:[#allocation4 + $0x8] sm:$0xff]  ;;  %v1358_v41 = vld [vmem:[#allocation34 + $0x10] sm:$0xff] }
 0x3e9   : > { %1300 = vmatpush.msra.mxu1 %v1244_v18  ;;  %v1320_v25 = vld [vmem:[#allocation31 + $0x18] sm:$0xff]  ;;  %v1317_v28 = vld [vmem:[#allocation31] sm:$0xff] }
 0x3ea   : > { %1272 = vmatpush.msra.mxu0 %v1247_v19  ;;  %1343 = vmatpush.msra.mxu2 %v1320_v25  ;;  %v1359_v29 = vld [vmem:[#allocation34 + $0x18] sm:$0xff]  ;;  %v1356_v43 = vld [vmem:[#allocation34] sm:$0xff] }
 0x3eb   : > { %1301 = vmatpush.msra.mxu1 %v1243_v20  ;;  %1786 = vmatmul.msk.f32.vlgmr.msra.gmra.mxu0 %vm1068_vm1, %v3235_v21  ;;  %v2067_v30 = vld [vmem:[#allocation30] ss:$0 sm:$0xff]  ;;  %v2068_v44 = vld [vmem:[#allocation33] ss:$0 sm:$0xff]  ;;  %v2069_v51 = vld [vmem:[#allocation36] ss:$0 sm:$0xff] }
 0x3ec   : > { %1788 = vmatmul.msk.f32.vlgmr.msra.gmra.mxu1 %vm1068_vm1, %v1241_v22  ;;  %1344 = vmatpush.msra.mxu2 %v1319_v26  ;;  %v2070_v19 = vld [vmem:[#allocation37] ss:$0 sm:$0xff] }
 0x3ed   : > { %1382 = vmatpush.msra.mxu3 %v1359_v29 }
 0x3ee   : > { %1345 = vmatpush.msra.mxu2 %v1318_v27 }
 0x3ef   : > { %1383 = vmatpush.msra.mxu3 %v1358_v41 }
 0x3f0   : > { %1346 = vmatpush.msra.mxu2 %v1317_v28 }
 0x3f1   : > { %1384 = vmatpush.msra.mxu3 %v1357_v42 }
 0x3f3   : > { %1787 = vmatmul.msk.f32.gmra.mxu0 %vm1068_vm1, %v3243_v23  ;;  %1385 = vmatpush.msra.mxu3 %v1356_v43 }
 0x3f4   : > { %1789 = vmatmul.msk.f32.gmra.mxu1 %vm1068_vm1, %v1242_v24  ;;  %v2071_v24 = vld [vmem:[#allocation39] ss:$0 sm:$0xff] }
 0x468   : > { %v1274_v31 = vpop.f32.mrf.mxu0 }
 0x469   : > { %v1303_v32 = vpop.f32.mrf.mxu1 }
 0x46a   : > { %v1304_v33 = vadd.f32 %v1303_v32, %v1274_v31 }
 0x46c   : > { %v1313_v34 = vadd.f32 %v2067_v30, %v1304_v33 }
 0x46e   : > { %v1315_v35 = vmax.f32 %v1313_v34, 0.0 }
 0x470   : > { %1790 = vmatmul.msk.f32.vlgmr.msra.gmra.mxu2 %vm1068_vm1, %v1315_v35  ;;  %v1277_v36 = vpop.f32.mrf.mxu0 }
 0x471   : > { %v1306_v37 = vpop.f32.mrf.mxu1 }
 0x472   : > { %v1307_v38 = vadd.f32 %v1306_v37, %v1277_v36 }
 0x474   : > { %v1314_v39 = vadd.f32 %v2067_v30, %v1307_v38 }
 0x476   : > { %v1316_v40 = vmax.f32 %v1314_v39, 0.0 }
 0x478   : > { %1791 = vmatmul.msk.f32.gmra.mxu2 %vm1068_vm1, %v1316_v40 }
 0x4f3   : > { %v1348_v45 = vpop.f32.mrf.mxu2 }
 0x4f4   : > { %v1349_v46 = vadd.f32 %v2068_v44, %v1348_v45 }
 0x4f6   : > { %v1354_v47 = vmax.f32 %v1349_v46, 0.0 }
 0x4f8   : > { %1792 = vmatmul.msk.f32.vlgmr.msra.gmra.mxu3 %vm1068_vm1, %v1354_v47 }
 0x4fb   : > { %v1351_v48 = vpop.f32.mrf.mxu2 }
 0x4fc   : > { %v1352_v49 = vadd.f32 %v2068_v44, %v1351_v48 }
 0x4fe   : > { %v1355_v50 = vmax.f32 %v1352_v49, 0.0 }
 0x500   : > { %1793 = vmatmul.msk.f32.gmra.mxu3 %vm1068_vm1, %v1355_v50 }
 0x57b   : > { %v1387_v53 = vpop.f32.mrf.mxu3 }
 0x57c   : > { %v1388_v54 = vadd.f32 %v2069_v51, %v1387_v53 }
 0x57e   : > { %v1395_v55 = vsel %vm1068_vm1, %v1388_v54, 0.0 }
 0x57f   : > { %1396 = vadd.xlane.f32.xlu0 %v1395_v55 }
 0x583   : > { %v1390_v56 = vpop.f32.mrf.mxu3 }
 0x584   : > { %v1391_v57 = vadd.f32 %v2069_v51, %v1390_v56 }
 0x586   : > { %v1398_v58 = vsel %vm1068_vm1, %v1391_v57, 0.0 }
 0x587   : > { %1399 = vadd.xlane.f32.xlu0 %v1398_v58 }
 0x5f2   : > { %v1397_v59 = vpop.xlane.xlu0 %1396 }
 0x5f3   : > { %v1401_v60 = vmul.f32 %v1397_v59, %v3219_v52 }
 0x5f5   : > { %v1403_v61 = vsub.f32 %v1388_v54, %v1401_v60 }
 0x5f7   : > { %v1405_v62 = vmul.f32 %v1403_v61, %v1403_v61 }
 0x5f9   : > { %v1407_v63 = vsel %vm1068_vm1, %v1405_v62, 0.0 }
 0x5fa   : > { %1408 = vadd.xlane.f32.xlu1 %v1407_v63  ;;  %v1400_v0 = vpop.xlane.xlu0 %1399 }
 0x5fb   : > { %v1402_v1 = vmul.f32 %v1400_v0, %v3219_v52 }
 0x5fd   : > { %v1404_v2 = vsub.f32 %v1391_v57, %v1402_v1 }
 0x5ff   : > { %v1406_v3 = vmul.f32 %v1404_v2, %v1404_v2 }
 0x601   : > { %v1410_v4 = vsel %vm1068_vm1, %v1406_v3, 0.0 }
 0x602   : > { %1411 = vadd.xlane.f32.xlu1 %v1410_v4 }
 0x66d   : > { %v1409_v5 = vpop.xlane.xlu1 %1408 }
 0x66e   : > { %v1413_v6 = vmul.f32 %v1409_v5, %v3219_v52 }
 0x670   : > { %v1415_v7 = vadd.f32 1e-05, %v1413_v6 }
 0x672   : > { %2072 = vrsqrt.f32 %v1415_v7  ;;  %vm1423_vm8 = vweird.f32 %v1415_v7 }
 0x675   : > { %v1412_v8 = vpop.xlane.xlu1 %1411 }
 0x676   : > { %v1414_v9 = vmul.f32 %v1412_v8, %v3219_v52 }
 0x678   : > { %v2073_v10 = vpop.eup %2072  ;;  %v1416_v11 = vadd.f32 1e-05, %v1414_v9 }
 0x679   : > { %v1418_v12 = vmul.f32 %v2073_v10, %v1415_v7  ;;  %vm1424_vm7 = vweird.f32 %v2073_v10 }
 0x67a   : > { %2074 = vrsqrt.f32 %v1416_v11  ;;  %vm1425_vm9 = vmor %vm1423_vm8, %vm1424_vm7  ;;  %vm1433_vm11 = vweird.f32 %v1416_v11 }
 0x67b   : > { %v1419_v13 = vmul.f32 %v2073_v10, %v1418_v12 }
 0x67d   : > { %v1420_v14 = vmul.f32 0.5, %v1419_v13 }
 0x67f   : > { %v1421_v15 = vsub.f32 1.5, %v1420_v14 }
 0x680   : > { %v2075_v16 = vpop.eup %2074 }
 0x681   : > { %v1422_v17 = vmul.f32 %v2073_v10, %v1421_v15  ;;  %v1428_v18 = vmul.f32 %v2075_v16, %v1416_v11  ;;  %vm1434_vm10 = vweird.f32 %v2075_v16 }
 0x682   : > { %vm1435_vm12 = vmor %vm1433_vm11, %vm1434_vm10 }
 0x683   : > { %v1426_v20 = vsel %vm1425_vm9, %v2073_v10, %v1422_v17  ;;  %v1429_v22 = vmul.f32 %v2075_v16, %v1428_v18 }
 0x684   : > { %v1437_v25 = vmul.f32 %v1426_v20, %v1403_v61 }
 0x685   : > { %v1430_v26 = vmul.f32 0.5, %v1429_v22 }
 0x686   : > { %v1442_v52 = vmul.f32 %v2070_v19, %v1437_v25 }
 0x687   : > { %v1431_v27 = vsub.f32 1.5, %v1430_v26 }
 0x688   : > { %v1447_v28 = vadd.f32 %v2071_v24, %v1442_v52 }
 0x689   : > { %v1432_v29 = vmul.f32 %v2075_v16, %v1431_v27 }
 0x68a   : > { %v1449_v30 = vadd.f32 %v1447_v28, %v3235_v21 }
 0x68b   : > { %v1436_v31 = vsel %vm1435_vm12, %v2075_v16, %v1432_v29 }
 0x68c   : > { %1451 = vst.msk [vmem:[%s3382_s8] sm:$0xff] %vm1068_vm1, %v1449_v30  ;;  %v1438_v32 = vmul.f32 %v1436_v31, %v1404_v2 }
 0x68e   : > { %v1443_v33 = vmul.f32 %v2070_v19, %v1438_v32 }
 0x690   : > { %v1448_v34 = vadd.f32 %v2071_v24, %v1443_v33 }
 0x692   : > { %v1450_v35 = vadd.f32 %v1448_v34, %v3243_v23 }
 0x694   : > { %1452 = vst.msk [vmem:[%s3383_s5 + $0x8] sm:$0xff] %vm1068_vm1, %v1450_v35 }
 0x695 PF: > { %s3384_s27 = sld [smem:[#allocation72_spill]]  ;;  %s1466_s3 = sshll.u32 %s979_s25, 4  ;;  %s1467_s3 = int_to_ptr.vmem [resolvable:$true] %s1466_s3 }
 0x696   : > { %s1454_s4 = scalar_lea.sflag [#allocation12], %s977_s28 }
 0x69b   : > { %s1464_s7 = scalar_lea.hbm %s3384_s27, %s3211_s26  ;;  %s2690_s11 = scalar_lea.hbm %s3384_s27, 24 }
 0x69c   : > { %s1468_s9 = sshll.u32 %s1464_s7, 4  ;;  %s1469_s9 = int_to_ptr.hbm [resolvable:$true] %s1468_s9 }
 0x69d   : > { %s2684_s1 = sshra.s32 %s1469_s9, 4  ;;  %s2685_s1 = int_to_ptr.hbm [resolvable:$true] %s2684_s1 }
 0x69e   : > { %s2686_s6 = scalar_lea.hbm %s2685_s1, 8  ;;  %p2691_p9 = scmp.lt.s32.totalorder %s2685_s1, %s3384_s27 }
 0x69f   : > { %p2687_p4 = scmp.ne.s32.totalorder %s2685_s1, %s2686_s6  ;;  %p2692_p10 = scmp.lt.s32.totalorder %s2690_s11, %s2686_s6 }
 0x6a1   : > { %p2688_p7 = pnand %p2687_p4, %p2986_p5  ;;  %p2693_p11 = por %p2692_p10, %p2691_p9 }
 0x6a3   : > { %p2689_p8 = pneg %p2688_p7 }
 0x6a5   : > { %p2694_p12 = pnand %p2693_p11, %p2689_p8 }
 0x6a7   : > { %2697 = shalt.err (!%p2694_p12)
}
 0x6a8   : > { %1882 = dma.vmem_to_hbm [thread:$0]  (%p2986_p5), %s1467_s3, 128, %s1469_s9, %s1454_s4  }
 0x6a9 PF: > { %s3387_s28 = sld [smem:[#allocation56_spill]] }
 0x6aa   : > { %s3388_s2 = sld [smem:[#allocation53_spill]] }
 0x6af   : > { %p1984_p13 = scmp.ge.s32.totalorder %s3387_s28, 2 }
 0x6b0   : > { %s1486_s24 = sand.u32 1, %s3388_s2  }
 0x6b1   : > { %p1943_p0 = pnand %p1984_p13, %p2990_p6  ;;  %s1487_s30 = scalar_lea.sflag [#allocation12], %s1486_s24 }
 0x6b3   : > { %p1944_p1 = pneg %p1943_p0 }
 0x6b5   : > { %2765 = dma.done.wait (%p1944_p1), %s1487_s30, 128  }
 0x6b6   : > { %2767 = vsyncadd (%p1944_p1), %s1487_s30, 4294967168  ;;  %s3390_s30 = sld [smem:[#allocation57_spill]] }
 0x6b7   : > { %s3391_s1 = sld [smem:[#allocation54_spill]] }
 0x6b8   : > { %s3392_s18 = sld [smem:[#allocation55_spill]] }
 0x6b9   : > { %s3393_s8 = sld [smem:[#allocation58_spill]] }
 0x6bc   : > { %p58_p2 = scmp.ge.s32.totalorder %s3390_s30, 5  }
 0x6be   :  { %60 = sbr.rel (!%p58_p2) target bundleno = 39 (0x27), region = 273 }
 0x6c3   :  { %1493 = vsyncpa [#allocation11], 1 }
 0x6c4   :  { %1495 = vsyncpa [#allocation11 + $0x1], 1 }
 0x6c5   :  { %1496 = vsyncpa [#allocation14], 1 }
 0x6c6   :  { %1497 = vsyncpa [#allocation17], 1 }
 0x6c7   :  { %1498 = vsyncpa [#allocation20], 1 }
 0x6c8   :  { %1499 = vsyncpa [#allocation23], 1 }
 0x6c9   :  { %1500 = vsyncpa [#allocation26], 1 }
 0x6ca   :  { %1501 = vsyncpa [#allocation29], 1 }
 0x6cb   :  { %1502 = vsyncpa [#allocation32], 1 }
 0x6cc   :  { %1503 = vsyncpa [#allocation35], 1 }
 0x6cd   :  { %1504 = vsyncpa [#allocation38], 1 }
 0x6ce   :  { %1505 = vsyncpa [#allocation12], 1 }
 0x6cf   :  { %1507 = vsyncpa [#allocation12 + $0x1], 1 }

// kernel: fgn_forward.7
= control target key start
LH: loop header
LB: loop body
LE: loop exit
PB: predicated region body
PF: predicated region fallthrough
CT: control target
= control target key end

     0   :  { %s2617_s29 = smov [#allocation8]   ;;  %s3055_s0 = inlined_call_operand.vmem [shape: s32[24], index: 0, kind: input, shape index: {}]   ;;  %s3056_s2 = inlined_call_operand.vmem [shape: f32[16,32], index: 2, kind: input, shape index: {}]   ;;  %s3057_s3 = inlined_call_operand.vmem [shape: f32[24,32], index: 3, kind: input, shape index: {}]   ;;  %s3058_s4 = inlined_call_operand.hbm [shape: f32[32,32], index: 4, kind: input, shape index: {}]   ;;  %s3059_s5 = inlined_call_operand.hbm [shape: f32[32,32], index: 5, kind: input, shape index: {}]   ;;  %s3060_s6 = inlined_call_operand.hbm [shape: f32[32,32], index: 6, kind: input, shape index: {}]   ;;  %s3061_s7 = inlined_call_operand.vmem [shape: f32[1,32], index: 7, kind: input, shape index: {}]   ;;  %s3062_s8 = inlined_call_operand.hbm [shape: f32[32,32], index: 8, kind: input, shape index: {}]   ;;  %s3063_s9 = inlined_call_operand.hbm [shape: f32[1,32], index: 9, kind: input, shape index: {}]   ;;  %s3064_s10 = inlined_call_operand.hbm [shape: f32[32,32], index: 10, kind: input, shape index: {}]   ;;  %s3065_s11 = inlined_call_operand.hbm [shape: f32[1,32], index: 11, kind: input, shape index: {}]   ;;  %s3066_s12 = inlined_call_operand.hbm [shape: f32[1,32], index: 12, kind: input, shape index: {}]   ;;  %s3067_s13 = inlined_call_operand.hbm [shape: f32[1,32], index: 13, kind: input, shape index: {}]   ;;  %s3068_s14 = inlined_call_operand.hbm [shape: f32[32,32], index: 14, kind: input, shape index: {}]   ;;  %s3069_s15 = inlined_call_operand.hbm [shape: f32[32,32], index: 15, kind: input, shape index: {}]   ;;  %s3070_s16 = inlined_call_operand.hbm [shape: f32[1,32], index: 16, kind: input, shape index: {}]   ;;  %s3071_s17 = inlined_call_operand.hbm [shape: f32[32,32], index: 17, kind: input, shape index: {}]   ;;  %s3072_s18 = inlined_call_operand.hbm [shape: f32[1,32], index: 18, kind: input, shape index: {}]   ;;  %s3073_s19 = inlined_call_operand.hbm [shape: f32[32,32], index: 19, kind: input, shape index: {}]   ;;  %s3074_s20 = inlined_call_operand.hbm [shape: f32[1,32], index: 20, kind: input, shape index: {}]   ;;  %s3075_s21 = inlined_call_operand.hbm [shape: f32[1,32], index: 21, kind: input, shape index: {}]   ;;  %s3076_s22 = inlined_call_operand.hbm [shape: f32[1,32], index: 22, kind: input, shape index: {}]   ;;  %s3077_s23 = inlined_call_operand.vmem [shape: f32[24,32], index: 23, kind: output, shape index: {0}]   ;;  %s3078_s24 = inlined_call_operand.vmem [shape: f32[16,32], index: 24, kind: output, shape index: {1}]   ;;  %s3079_s1 = inlined_call_operand.vmem [shape: s32[24], index: 1, kind: input, shape index: {}]  }
   0x1   :  { %3086 = sst [smem:[#allocation49_spill]] %s3055_s0  ;;  %s2618_s0 = smov [#allocation9]  }
   0x2   :  { %3087 = sst [smem:[#allocation50_spill]] %s3056_s2 }
   0x3   :  { %3088 = sst [smem:[#allocation51_spill]] %s3057_s3  ;;  %s36_s3 = sshll.u32 %s3079_s1, 4  ;;  %s37_s3 = int_to_ptr.vmem [resolvable:$true] %s36_s3 }
   0x4   :  { %3089 = sst [smem:[#allocation52_spill]] %s3058_s4 }
   0x5   :  { %3090 = sst [smem:[#allocation53_spill]] %s3059_s5 }
   0x6   :  { %3091 = sst [smem:[#allocation54_spill]] %s3060_s6 }
   0x7   :  { %3092 = sst [smem:[#allocation55_spill]] %s3061_s7 }
   0x8   :  { %3093 = sst [smem:[#allocation56_spill]] %s3062_s8 }
   0x9   :  { %3094 = sst [smem:[#allocation57_spill]] %s3063_s9 }
   0xa   :  { %3095 = sst [smem:[#allocation58_spill]] %s3064_s10 }
   0xb   :  { %3096 = sst [smem:[#allocation59_spill]] %s3066_s12 }
   0xc   :  { %3097 = sst [smem:[#allocation60_spill]] %s3068_s14 }
   0xd   :  { %3098 = sst [smem:[#allocation61_spill]] %s3073_s19 }
   0xe   :  { %s3099_s27 = sld [smem:[#allocation49_spill]] }
  0x14   :  { %s31_s19 = sshll.u32 %s3099_s27, 4  ;;  %s32_s19 = int_to_ptr.vmem [resolvable:$true] %s31_s19 }
  0x15   :  { %34 = dma.vmem_to_smem %s32_s19, 16, %s2617_s29, [#allocation7] }
  0x16   :  { %39 = dma.vmem_to_smem %s37_s3, 16, %s2618_s0, [#allocation7] }
  0x17   :  { %2563 = dma.done.wait [#allocation7], 32 }
  0x18   :  { %2564 = vsyncadd [#allocation7], 4294967264 }
  0x19   :  { %42 = sfence }
  0x1a   :  { %43 = vsyncpa [#allocation11], 0 }
  0x1b   :  { %44 = vsyncpa [#allocation13], 0 }
  0x1c   :  { %45 = vsyncpa [#allocation16], 0 }
  0x1d   :  { %46 = vsyncpa [#allocation19], 0 }
  0x1e   :  { %47 = vsyncpa [#allocation22], 0 }
  0x1f   :  { %48 = vsyncpa [#allocation25], 0 }
  0x20   :  { %49 = vsyncpa [#allocation28], 0 }
  0x21   :  { %50 = vsyncpa [#allocation31], 0 }
  0x22   :  { %51 = vsyncpa [#allocation34], 0 }
  0x23   :  { %52 = vsyncpa [#allocation37], 0  ;;  %s2772_s1 = smov 0  }
  0x24 LB: > { %s2778_s19 = sadd.s32 4294967295, %s2607_s1   ;;  %p1689_p0 = scmp.ge.s32.totalorder %s2607_s1, 1  ;;  %s2607_s1 = sphi %s2772_s1, %s58_s1  }
  0x25   : > { %p556_p1 = scmp.lt.s32.totalorder %s2607_s1, 4  ;;  %p1690_p2 = scmp.ne.s32.totalorder %s2778_s19, 0 }
  0x26   : > { %p1885_p3 = scmp.eq.s32.totalorder %s2778_s19, 0  ;;  %s3100_s4 = sld [smem:[#allocation53_spill]] }
  0x27   : > { %p2787_p4 = pnand %p1689_p0, %p556_p1  ;;  %s3102_s6 = sld [smem:[#allocation56_spill]] }
  0x28   : > { %s2619_s27 = smov [#allocation12]   ;;  %s2620_s3 = smov [#allocation15]  }
  0x29   : > { %p1830_p5 = pneg %p2787_p4  ;;  %s586_s28 = sshll.u32 %s2619_s27, 4  ;;  %s587_s28 = int_to_ptr.vmem [resolvable:$true] %s586_s28 }
  0x2a   : > { %s617_s29 = sshll.u32 %s2620_s3, 4  ;;  %s3104_s10 = sld [smem:[#allocation58_spill]]  ;;  %s618_s29 = int_to_ptr.vmem [resolvable:$true] %s617_s29 }
  0x2b   : > { %p2798_p6 = pnand %p1885_p3, %p1830_p5  ;;  %s3084_s5 = smov 8  }
  0x2c   : > { %s584_s25 = sshll.u32 %s3100_s4, 4  ;;  %s3082_s4 = smov 128   ;;  %s585_s25 = int_to_ptr.hbm [resolvable:$true] %s584_s25 }
  0x2d   : > { %s615_s26 = sshll.u32 %s3102_s6, 4  ;;  %s2623_s2 = smov [#allocation18]   ;;  %s616_s26 = int_to_ptr.hbm [resolvable:$true] %s615_s26 }
  0x2e   : > { %1836 = dma.hbm_to_vmem [thread:$0]  (!%p2798_p6), %s585_s25, 512, %s587_s28, [#allocation13], %s3082_s4, %s3082_s4, %s3084_s5  }
  0x2f   : > { %1842 = dma.hbm_to_vmem [thread:$0]  (!%p2798_p6), %s616_s26, 512, %s618_s29, [#allocation16], %s3082_s4, %s3082_s4, %s3084_s5  }
  0x30   : > { %s641_s30 = sshll.u32 %s3104_s10, 4  ;;  %s643_s6 = sshll.u32 %s2623_s2, 4  ;;  %s642_s30 = int_to_ptr.hbm [resolvable:$true] %s641_s30  ;;  %s644_s6 = int_to_ptr.vmem [resolvable:$true] %s643_s6 }
  0x31   : > { %s3105_s12 = sld [smem:[#allocation59_spill]]  ;;  %s2624_s26 = smov [#allocation21]  }
  0x32   : > { %1848 = dma.hbm_to_vmem [thread:$0]  (!%p2798_p6), %s642_s30, 512, %s644_s6, [#allocation19], %s3082_s4, %s3082_s4, %s3084_s5  }
  0x33   : > { %s3106_s14 = sld [smem:[#allocation60_spill]]  ;;  %s670_s29 = sshll.u32 %s2624_s26, 4  ;;  %s671_s29 = int_to_ptr.vmem [resolvable:$true] %s670_s29 }
  0x34   : > { %s2625_s2 = smov [#allocation24]   ;;  %s746_s25 = sshll.u32 %s3072_s18, 4  ;;  %s747_s25 = int_to_ptr.hbm [resolvable:$true] %s746_s25 }
  0x35   : > { %s693_s27 = sshll.u32 %s2625_s2, 4  ;;  %s2626_s28 = smov [#allocation27]   ;;  %s694_s27 = int_to_ptr.vmem [resolvable:$true] %s693_s27 }
  0x36   : > { %s2627_s10 = smov [#allocation30]   ;;  %s772_s3 = sshll.u32 %s3074_s20, 4  ;;  %s773_s3 = int_to_ptr.hbm [resolvable:$true] %s772_s3 }
  0x37   : > { %s668_s0 = sshll.u32 %s3105_s12, 4  ;;  %s720_s12 = sshll.u32 %s3070_s16, 4  ;;  %s669_s0 = int_to_ptr.hbm [resolvable:$true] %s668_s0  ;;  %s721_s12 = int_to_ptr.hbm [resolvable:$true] %s720_s12 }
  0x38   : > { %1854 = dma.hbm_to_vmem [thread:$0]  (!%p2798_p6), %s669_s0, 16, %s671_s29, [#allocation22]  }
  0x39   : > { %s691_s8 = sshll.u32 %s3106_s14, 4  ;;  %s722_s0 = sshll.u32 %s2626_s28, 4  ;;  %s692_s8 = int_to_ptr.hbm [resolvable:$true] %s691_s8  ;;  %s723_s0 = int_to_ptr.vmem [resolvable:$true] %s722_s0 }
  0x3a   : > { %1860 = dma.hbm_to_vmem [thread:$0]  (!%p2798_p6), %s692_s8, 512, %s694_s27, [#allocation25], %s3082_s4, %s3082_s4, %s3084_s5  }
  0x3b   : > { %1866 = dma.hbm_to_vmem [thread:$0]  (!%p2798_p6), %s721_s12, 16, %s723_s0, [#allocation28]  }
  0x3c   : > { %s748_s26 = sshll.u32 %s2627_s10, 4  ;;  %s3107_s30 = sld [smem:[#allocation52_spill]]  ;;  %s749_s26 = int_to_ptr.vmem [resolvable:$true] %s748_s26 }
  0x3d   : > { %1872 = dma.hbm_to_vmem [thread:$0]  (!%p2798_p6), %s747_s25, 16, %s749_s26, [#allocation31]  }
  0x3e   : > { %s2628_s28 = smov [#allocation33]   ;;  %s2629_s12 = smov [#allocation10]  }
  0x3f   : > { %s774_s4 = sshll.u32 %s2628_s28, 4  ;;  %s572_s0 = sshll.u32 %s2629_s12, 4  ;;  %s775_s4 = int_to_ptr.vmem [resolvable:$true] %s774_s4  ;;  %s573_s0 = int_to_ptr.vmem [resolvable:$true] %s572_s0 }
  0x40   : > { %1878 = dma.hbm_to_vmem [thread:$0]  (!%p2798_p6), %s773_s3, 16, %s775_s4, [#allocation34]  }
  0x41   : > { %s3108_s2 = sld [smem:[#allocation54_spill]]  ;;  %s3109_s25 = smov 8  }
  0x42   : > { %s570_s6 = sshll.u32 %s3107_s30, 4  ;;  %s3110_s26 = smov 128   ;;  %s571_s6 = int_to_ptr.hbm [resolvable:$true] %s570_s6 }
  0x43   : > { %1833 = dma.hbm_to_vmem [thread:$0]  (!%p2798_p6), %s571_s6, 512, %s573_s0, [#allocation11], %s3110_s26, %s3110_s26, %s3109_s25  }
  0x44   : > { %s3111_s30 = sld [smem:[#allocation57_spill]]  ;;  %s2630_s14 = smov [#allocation14]  }
  0x45   : > { %s600_s4 = sshll.u32 %s2630_s14, 4  ;;  %s2631_s3 = smov [#allocation17]   ;;  %s601_s4 = int_to_ptr.vmem [resolvable:$true] %s600_s4 }
  0x46   : > { %s632_s12 = sshll.u32 %s2631_s3, 4  ;;  %s656_s6 = sshll.u32 %s3065_s11, 4  ;;  %s633_s12 = int_to_ptr.vmem [resolvable:$true] %s632_s12  ;;  %s657_s6 = int_to_ptr.hbm [resolvable:$true] %s656_s6 }
  0x47   : > { %s598_s5 = sshll.u32 %s3108_s2, 4  ;;  %s680_s2 = sshll.u32 %s3067_s13, 4  ;;  %s599_s5 = int_to_ptr.hbm [resolvable:$true] %s598_s5  ;;  %s681_s2 = int_to_ptr.hbm [resolvable:$true] %s680_s2 }
  0x48   : > { %1839 = dma.hbm_to_vmem [thread:$0]  (!%p2798_p6), %s599_s5, 512, %s601_s4, [#allocation13], %s3110_s26, %s3110_s26, %s3109_s25  }
  0x49   : > { %s2632_s8 = smov [#allocation20]   ;;  %s2633_s5 = smov [#allocation23]  }
  0x4a   : > { %s630_s28 = sshll.u32 %s3111_s30, 4  ;;  %s658_s27 = sshll.u32 %s2632_s8, 4  ;;  %s631_s28 = int_to_ptr.hbm [resolvable:$true] %s630_s28  ;;  %s659_s27 = int_to_ptr.vmem [resolvable:$true] %s658_s27 }
  0x4b   : > { %1845 = dma.hbm_to_vmem [thread:$0]  (!%p2798_p6), %s631_s28, 16, %s633_s12, [#allocation16]  }
  0x4c   : > { %1851 = dma.hbm_to_vmem [thread:$0]  (!%p2798_p6), %s657_s6, 16, %s659_s27, [#allocation19]  }
  0x4d   : > { %s682_s30 = sshll.u32 %s2633_s5, 4  ;;  %s705_s10 = sshll.u32 %s3069_s15, 4  ;;  %s683_s30 = int_to_ptr.vmem [resolvable:$true] %s682_s30  ;;  %s706_s10 = int_to_ptr.hbm [resolvable:$true] %s705_s10 }
  0x4e   : > { %1857 = dma.hbm_to_vmem [thread:$0]  (!%p2798_p6), %s681_s2, 16, %s683_s30, [#allocation22]  }
  0x4f   : > { %s731_s29 = sshll.u32 %s3071_s17, 4  ;;  %s2634_s0 = smov [#allocation26]   ;;  %s732_s29 = int_to_ptr.hbm [resolvable:$true] %s731_s29 }
  0x50   : > { %s707_s14 = sshll.u32 %s2634_s0, 4  ;;  %s2635_s6 = smov [#allocation29]   ;;  %s708_s14 = int_to_ptr.vmem [resolvable:$true] %s707_s14 }
  0x51   : > { %1863 = dma.hbm_to_vmem [thread:$0]  (!%p2798_p6), %s706_s10, 512, %s708_s14, [#allocation25], %s3110_s26, %s3110_s26, %s3109_s25  }
  0x52   : > { %s733_s8 = sshll.u32 %s2635_s6, 4  ;;  %s3112_s2 = sld [smem:[#allocation61_spill]]  ;;  %s734_s8 = int_to_ptr.vmem [resolvable:$true] %s733_s8 }
  0x53   : > { %1869 = dma.hbm_to_vmem [thread:$0]  (!%p2798_p6), %s732_s29, 512, %s734_s8, [#allocation28], %s3110_s26, %s3110_s26, %s3109_s25  }
  0x54   : > { %s784_s28 = sshll.u32 %s3075_s21, 4  ;;  %s2636_s10 = smov [#allocation32]   ;;  %s785_s28 = int_to_ptr.hbm [resolvable:$true] %s784_s28 }
  0x55   : > { %s759_s12 = sshll.u32 %s2636_s10, 4  ;;  %s2637_s0 = smov [#allocation35]   ;;  %s760_s12 = int_to_ptr.vmem [resolvable:$true] %s759_s12 }
  0x56   : > { %s786_s14 = sshll.u32 %s2637_s0, 4  ;;  %s796_s29 = sshll.u32 %s3076_s22, 4  ;;  %s787_s14 = int_to_ptr.vmem [resolvable:$true] %s786_s14  ;;  %s797_s29 = int_to_ptr.hbm [resolvable:$true] %s796_s29 }
  0x57   : > { %1881 = dma.hbm_to_vmem [thread:$0]  (!%p2798_p6), %s785_s28, 16, %s787_s14, [#allocation34]  }
  0x58   : > { %s757_s30 = sshll.u32 %s3112_s2, 4  ;;  %s2638_s8 = smov [#allocation36]   ;;  %s758_s30 = int_to_ptr.hbm [resolvable:$true] %s757_s30 }
  0x59   : > { %1875 = dma.hbm_to_vmem [thread:$0]  (!%p2798_p6), %s758_s30, 512, %s760_s12, [#allocation31], %s3110_s26, %s3110_s26, %s3109_s25  }
  0x5a   : > { %s798_s5 = sshll.u32 %s2638_s8, 4  ;;  %818 = sbr.rel (%p2787_p4) target bundleno = 1666 (0x682), region = 104  ;;  %s799_s5 = int_to_ptr.vmem [resolvable:$true] %s798_s5 }
  0x5b   : > { %1884 = dma.hbm_to_vmem [thread:$0]  (!%p2798_p6), %s797_s29, 16, %s799_s5, [#allocation37]  }
  0x5f   : > { %2566 = dma.done.wait (%p1885_p3), [#allocation11], 512  }
  0x60   : > { %2568 = vsyncadd (%p1885_p3), [#allocation11], 4294966784 }
  0x61   : > { %2570 = dma.done.wait (%p1885_p3), [#allocation13], 1024  }
  0x62   : > { %2572 = vsyncadd (%p1885_p3), [#allocation13], 4294966272 }
  0x63   : > { %2574 = dma.done.wait (%p1885_p3), [#allocation16], 528  }
  0x64   : > { %2576 = vsyncadd (%p1885_p3), [#allocation16], 4294966768 }
  0x65   : > { %2578 = dma.done.wait (%p1885_p3), [#allocation19], 528  }
  0x66   : > { %2580 = vsyncadd (%p1885_p3), [#allocation19], 4294966768 }
  0x67   : > { %2582 = dma.done.wait (%p1885_p3), [#allocation22], 32  }
  0x68   : > { %2584 = vsyncadd (%p1885_p3), [#allocation22], 4294967264 }
  0x69   : > { %2586 = dma.done.wait (%p1885_p3), [#allocation25], 1024  }
  0x6a   : > { %2588 = vsyncadd (%p1885_p3), [#allocation25], 4294966272 }
  0x6b   : > { %2590 = dma.done.wait (%p1885_p3), [#allocation28], 528  }
  0x6c   : > { %2592 = vsyncadd (%p1885_p3), [#allocation28], 4294966768 }
  0x6d   : > { %2594 = dma.done.wait (%p1885_p3), [#allocation31], 528  }
  0x6e   : > { %2596 = vsyncadd (%p1885_p3), [#allocation31], 4294966768 }
  0x6f   : > { %2598 = dma.done.wait (%p1885_p3), [#allocation34], 32  }
  0x70   : > { %2600 = vsyncadd (%p1885_p3), [#allocation34], 4294967264 }
  0x71   : > { %2602 = dma.done.wait (%p1885_p3), [#allocation37], 16  }
  0x72   : > { %2604 = vsyncadd (%p1885_p3), [#allocation37], 4294967280  ;;  %p964_p7 = scmp.lt.s32.totalorder %s2778_s19, 2  ;;  %s3113_s2 = sld [smem:[#allocation51_spill]] }
  0x73   : > { %s3114_s0 = sld [smem:[#allocation50_spill]] (!%p1690_p2) }
  0x74   : > { %s965_s9 = scalar_select %p964_p7, %s2778_s19, 2 }
  0x75   : > { %975 = sbr.rel (%p1690_p2) target bundleno = 264 (0x108), region = 180 }
  0x76   : > { %s1728_s7 = sshll.u32 %s965_s9, 3 }
  0x77   : > { %s2965_s28 = scalar_lea.vmem %s3077_s23, %s1728_s7 }
  0x78   : > { %s2960_s30 = scalar_lea.vmem %s3113_s2, %s1728_s7 }
  0x7a   : > { %v981_v0 = vld [vmem:[#allocation10 + $0x18] sm:$0xff]  ;;  %v980_v2 = vld [vmem:[#allocation10 + $0x10] sm:$0xff]  ;;  %vm982_vm0 = vcmask 261120   ;;  %v2639_v4 = vmov 0.0   ;;  %v979_v5 = vld [vmem:[#allocation10 + $0x8] sm:$0xff] }
  0x7b   : > { %v1017_v1 = vld [vmem:[#allocation12 + $0x18] sm:$0xff]  ;;  %1750 = vmatpush.msra.mxu2 %v981_v0  ;;  %v1016_v3 = vld [vmem:[#allocation12 + $0x10] sm:$0xff]  ;;  %1043 = vst.msk [vmem:[#allocation4] sm:$0xff] %vm982_vm0, %v2639_v4  ;;  %v1015_v6 = vld [vmem:[#allocation12 + $0x8] sm:$0xff]  ;;  %1001 = vmatpush.msra.mxu0 %v981_v0 }
  0x7c   : > { %1754 = vmatpush.msra.mxu3 %v1017_v1  ;;  %1030 = vmatpush.msra.mxu1 %v1017_v1  ;;  %1044 = vst.msk [vmem:[#allocation4 + $0x8] sm:$0xff] %vm982_vm0, %v2639_v4  ;;  %v978_v7 = vld [vmem:[#allocation10] sm:$0xff]  ;;  %v977_v9 = vld [vmem:[%s3114_s0 + $0x8] sm:$0xff] }
  0x7d   : > { %1751 = vmatpush.msra.mxu2 %v980_v2  ;;  %v1014_v8 = vld [vmem:[#allocation12] sm:$0xff]  ;;  %1002 = vmatpush.msra.mxu0 %v980_v2 }
  0x7e   : > { %1755 = vmatpush.msra.mxu3 %v1016_v3  ;;  %1031 = vmatpush.msra.mxu1 %v1016_v3  ;;  %v976_v10 = vld [vmem:[%s3114_s0] sm:$0xff] }
  0x7f   : > { %1752 = vmatpush.msra.mxu2 %v979_v5  ;;  %1003 = vmatpush.msra.mxu0 %v979_v5 }
  0x80   : > { %1756 = vmatpush.msra.mxu3 %v1015_v6  ;;  %1032 = vmatpush.msra.mxu1 %v1015_v6 }
  0x81   : > { %1753 = vmatpush.msra.mxu2 %v978_v7  ;;  %1004 = vmatpush.msra.mxu0 %v978_v7 }
  0x82   : > { %1757 = vmatpush.msra.mxu3 %v1014_v8  ;;  %1732 = vmatmul.msk.f32.vlgmr.msra.gmra.mxu2 %vm982_vm0, %v977_v9 }
  0x83   : > { %1734 = vmatmul.msk.f32.vlgmr.msra.gmra.mxu3 %vm982_vm0, %v977_v9  ;;  %1033 = vmatpush.msra.mxu1 %v1014_v8 }
  0x84   : > { %1731 = vmatmul.msk.f32.vlgmr.msra.gmra.mxu0 %vm982_vm0, %v976_v10  ;;  %1733 = vmatmul.msk.f32.vlgmr.msra.gmra.mxu1 %vm982_vm0, %v976_v10 }
 0x101   : > { %v1006_v11 = vpop.f32.mrf.mxu0  ;;  %v1035_v12 = vpop.f32.mrf.mxu1 }
 0x102   : > { %1012 = vst.msk [vmem:[#allocation2] sm:$0xff] %vm982_vm0, %v1006_v11 }
 0x103   : > { %1041 = vst.msk [vmem:[#allocation3] sm:$0xff] %vm982_vm0, %v1035_v12 }
 0x105   : > { %v1009_v13 = vpop.f32.mrf.mxu2 }
 0x106   : > { %v1038_v14 = vpop.f32.mrf.mxu3  ;;  %1013 = vst.msk [vmem:[#allocation2 + $0x8] sm:$0xff] %vm982_vm0, %v1009_v13 }
 0x107   : > { %1042 = vst.msk [vmem:[#allocation3 + $0x8] sm:$0xff] %vm982_vm0, %v1038_v14 }
 0x108 PF: > { %v1049_v15 = vld [vmem:[#allocation14 + $0x18] sm:$0xff]  ;;  %v1048_v16 = vld [vmem:[#allocation14 + $0x10] sm:$0xff]  ;;  %v1047_v17 = vld [vmem:[#allocation14 + $0x8] sm:$0xff]  ;;  %vm1054_vm1 = vcmask 261120   ;;  %s1736_s27 = sshll.u32 %s2778_s19, 3  ;;  %s3115_s5 = sld [smem:[#allocation55_spill]] }
 0x109   : > { %1070 = vmatpush.msra.mxu0 %v1049_v15  ;;  %v1046_v18 = vld [vmem:[#allocation14] sm:$0xff]  ;;  %s2609_s9 = smov 0  }
 0x10a   : > { %v2986_v19 = vld [vmem:[%s2960_s30] sm:$0xff] }
 0x10b   : > { %1071 = vmatpush.msra.mxu0 %v1048_v16 }
 0x10d   : > { %1072 = vmatpush.msra.mxu0 %v1047_v17 }
 0x10e   : > { %v1969_v20 = vld [vmem:[%s3115_s5] ss:$0 sm:$0xff] }
 0x10f   : > { %1073 = vmatpush.msra.mxu0 %v1046_v18 }
 0x110   : > { %1735 = vmatmul.msk.f32.vlgmr.msra.gmra.mxu0 %vm1054_vm1, %v2986_v19 }
 0x18d   : > { %v1075_v21 = vpop.f32.mrf.mxu0 }
 0x18e   : > { %v1076_v22 = vadd.f32 %v1969_v20, %v1075_v21 }
 0x190   : > { %1078 = vst.msk [vmem:[#allocation5] sm:$0xff] %vm1054_vm1, %v1076_v22 }
 0x191 LB: >> { %s1086_s7 = sadd.s32 %s2611_s9, %s1736_s27  ;;  %s1089_s2 = scalar_lea.vmem [#allocation5], %s2611_s9  ;;  %vm1097_vm2 = vcmask 253952   ;;  %s2611_s9 = sphi %s2609_s9, %s1085_s9  }
 0x192   : >> { %s1087_s25 = sld [smem:[#allocation8 + %s1086_s7]]  ;;  %s1085_s9 = sadd.s32 1, %s2611_s9  }
 0x193   : >> { %s1088_s26 = sld [smem:[#allocation9 + %s1086_s7]]  ;;  %p1082_p8 = scmp.ge.s32.totalorder %s1085_s9, 8  }
 0x194   : > { %v1104_v28 = vld [vmem:[#allocation15 + $0x18] sm:$0xff] (%p1082_p8)  ;;  %v1103_v29 = vld [vmem:[#allocation15 + $0x10] sm:$0xff] (%p1082_p8)  ;;  %v1102_v32 = vld [vmem:[#allocation15 + $0x8] sm:$0xff] (%p1082_p8)  ;;  %v2640_v46 = vmov (%p1082_p8), 32.0   ;;  %s2613_s3 = smov (%p1082_p8), 0  }
 0x195   : > { %1124 = vmatpush.msra.mxu1 (%p1082_p8), %v1104_v28  ;;  %v1136_v31 = vld [vmem:[#allocation18 + $0x18] sm:$0xff] (%p1082_p8)  ;;  %v1135_v35 = vld [vmem:[#allocation18 + $0x10] sm:$0xff] (%p1082_p8)  ;;  %v1134_v36 = vld [vmem:[#allocation18 + $0x8] sm:$0xff] (%p1082_p8)  ;;  %1974 = vrcp.f32 (%p1082_p8), %v2640_v46 }
 0x196   : > { %1156 = vmatpush.msra.mxu2 (%p1082_p8), %v1136_v31  ;;  %v1101_v33 = vld [vmem:[#allocation15] sm:$0xff] (%p1082_p8) }
 0x197   : >> { %v1090_v23 = vld [vmem:[%s1089_s2] sm:$0x1]  ;;  %1125 = vmatpush.msra.mxu1 (%p1082_p8), %v1103_v29  ;;  %v1133_v37 = vld [vmem:[#allocation18] sm:$0xff] (%p1082_p8) }
 0x198   : >> { %s1091_s30 = scalar_lea.vmem [#allocation2], %s1087_s25  ;;  %1157 = vmatpush.msra.mxu2 (%p1082_p8), %v1135_v35  ;;  %v1970_v38 = vld [vmem:[#allocation17] ss:$0 sm:$0xff] (%p1082_p8)  ;;  %v1971_v42 = vld [vmem:[#allocation20] ss:$0 sm:$0xff] (%p1082_p8) }
 0x199   : >> { %v1092_v24 = vld [vmem:[%s1091_s30] sm:$0x1]  ;;  %s1094_s4 = scalar_lea.vmem [#allocation3], %s1088_s26  ;;  %1126 = vmatpush.msra.mxu1 (%p1082_p8), %v1102_v32  ;;  %v1972_v3 = vld [vmem:[#allocation21] ss:$0 sm:$0xff] (%p1082_p8) }
 0x19a   : >> { %v1093_v25 = vadd.f32 %v1092_v24, %v1090_v23  ;;  %v1095_v26 = vld [vmem:[%s1094_s4] sm:$0x1]  ;;  %1084 = sbr.rel (!%p1082_p8) target bundleno = 401 (0x191), region = 242  ;;  %1158 = vmatpush.msra.mxu2 (%p1082_p8), %v1134_v36  ;;  %v1973_v5 = vld [vmem:[#allocation23] ss:$0 sm:$0xff] (%p1082_p8) }
 0x19b   : > { %1127 = vmatpush.msra.mxu1 (%p1082_p8), %v1101_v33  ;;  %v1975_v47 = vpop.eup (%p1082_p8), %1974 }
 0x19c   : >> { %v1096_v27 = vadd.f32 %v1095_v26, %v1093_v25  ;;  %1159 = vmatpush.msra.mxu2 (%p1082_p8), %v1133_v37  ;;  %v1170_v48 = vmul.f32 (%p1082_p8), 32.0, %v1975_v47  ;;  %vm1174_vm3 = vweird.f32 (%p1082_p8), %v1975_v47 }
 0x19e   : >> { %1098 = vst.msk [vmem:[%s1089_s2] sm:$0x1] %vm1097_vm2, %v1096_v27  ;;  %v1171_v49 = vsub.f32 (%p1082_p8), 1.0, %v1170_v48 }
 0x1a0   : > { %v1172_v50 = vmul.f32 %v1975_v47, %v1171_v49 }
 0x1a2   : > { %v1173_v51 = vadd.f32 %v1975_v47, %v1172_v50 }
 0x1a4   : > { %v3001_v52 = vsel %vm1174_vm3, %v1975_v47, %v1173_v51 }
 0x1a5   : > { %v1099_v30 = vld [vmem:[#allocation5] sm:$0xff] }
 0x1a6   : > { %v1100_v34 = vmax.f32 %v1099_v30, 0.0 }
 0x1a8   : > { %1737 = vmatmul.msk.f32.vlgmr.msra.gmra.mxu1 %vm1054_vm1, %v1100_v34 }
 0x225   : > { %v1129_v39 = vpop.f32.mrf.mxu1 }
 0x226   : > { %v1130_v40 = vadd.f32 %v1970_v38, %v1129_v39 }
 0x228   : > { %v1132_v41 = vmax.f32 %v1130_v40, 0.0 }
 0x22a   : > { %1738 = vmatmul.msk.f32.vlgmr.msra.gmra.mxu2 %vm1054_vm1, %v1132_v41 }
 0x2ad   : > { %v1161_v43 = vpop.f32.mrf.mxu2 }
 0x2ae   : > { %v1162_v44 = vadd.f32 %v1971_v42, %v1161_v43 }
 0x2b0   : > { %v1166_v45 = vsel %vm1054_vm1, %v1162_v44, 0.0 }
 0x2b1   : > { %1167 = vadd.xlane.f32.xlu0 %v1166_v45 }
 0x324   : > { %v1168_v53 = vpop.xlane.xlu0 %1167 }
 0x325   : > { %v1176_v54 = vmul.f32 %v3001_v52, %v1168_v53 }
 0x327   : > { %v1177_v55 = vsub.f32 %v1162_v44, %v1176_v54 }
 0x329   : > { %v1178_v56 = vmul.f32 %v1177_v55, %v1177_v55 }
 0x32b   : > { %v1179_v57 = vsel %vm1054_vm1, %v1178_v56, 0.0 }
 0x32c   : > { %1180 = vadd.xlane.f32.xlu0 %v1179_v57 }
 0x39f   : > { %v1181_v58 = vpop.xlane.xlu0 %1180 }
 0x3a0   : > { %v1182_v59 = vmul.f32 %v1181_v58, %v3001_v52 }
 0x3a2   : > { %v1183_v60 = vadd.f32 1e-05, %v1182_v59 }
 0x3a4   : > { %1976 = vrsqrt.f32 %v1183_v60  ;;  %vm1190_vm5 = vweird.f32 %v1183_v60 }
 0x3aa   : > { %v1977_v61 = vpop.eup %1976 }
 0x3ab   : > { %v1185_v62 = vmul.f32 %v1977_v61, %v1183_v60  ;;  %vm1191_vm4 = vweird.f32 %v1977_v61 }
 0x3ac   : > { %vm1192_vm6 = vmor %vm1190_vm5, %vm1191_vm4 }
 0x3ad   : > { %v1186_v63 = vmul.f32 %v1977_v61, %v1185_v62 }
 0x3af   : > { %v1187_v0 = vmul.f32 0.5, %v1186_v63 }
 0x3b1   : > { %v1188_v1 = vsub.f32 1.5, %v1187_v0 }
 0x3b3   : > { %v1189_v2 = vmul.f32 %v1977_v61, %v1188_v1 }
 0x3b5   : > { %v1193_v4 = vsel %vm1192_vm6, %v1977_v61, %v1189_v2 }
 0x3b6   : > { %v1194_v6 = vmul.f32 %v1193_v4, %v1177_v55 }
 0x3b8   : > { %v1198_v7 = vmul.f32 %v1972_v3, %v1194_v6 }
 0x3ba   : > { %v1202_v8 = vadd.f32 %v1973_v5, %v1198_v7 }
 0x3bc   : > { %1203 = vst.msk [vmem:[#allocation6] sm:$0xff] %vm1054_vm1, %v1202_v8  ;;  %v1204_v9 = vadd.f32 %v1202_v8, %v2986_v19 }
 0x3be   : > { %1205 = vst.msk [vmem:[%s2965_s28] sm:$0xff] %vm1054_vm1, %v1204_v9 }
 0x3bf LB: >> { %s1212_s10 = sadd.s32 %s2615_s3, %s1736_s27  ;;  %s1216_s0 = scalar_lea.vmem [#allocation6], %s2615_s3  ;;  %s2615_s3 = sphi %s2613_s3, %s1211_s3  }
 0x3c0   : >> { %s1213_s12 = sld [smem:[#allocation8 + %s1212_s10]]  ;;  %s1211_s3 = sadd.s32 1, %s2615_s3  }
 0x3c1   : >> { %p1208_p9 = scmp.ge.s32.totalorder %s1211_s3, 8  }
 0x3c2   : > { %p1739_p10 = scmp.ne.s32.totalorder (%p1208_p9), %s2778_s19, 2 }
 0x3c3   : >> { %v1217_v10 = vld [vmem:[%s1216_s0] sm:$0x1] }
 0x3c6   : >> { %s1214_s14 = scalar_lea.vmem [#allocation4], %s1213_s12  ;;  %1210 = sbr.rel (!%p1208_p9) target bundleno = 959 (0x3bf), region = 253 }
 0x3c7   : >> { %v1215_v11 = vld [vmem:[%s1214_s14] sm:$0x1] }
 0x3c8   : >> { %v1218_v12 = vadd.f32 %v1217_v10, %v1215_v11 }
 0x3ca   : >> { %1220 = vst.msk [vmem:[%s1214_s14] sm:$0x1] %vm1097_vm2, %v1218_v12 }
 0x3cb   : > { %1224 = sbr.rel (%p1739_p10) target bundleno = 1666 (0x682), region = 198  ;;  %s3116_s29 = sld [smem:[#allocation50_spill]] (!%p1739_p10) }
 0x3d0   : > { %v1236_v13 = vld [vmem:[#allocation26 + $0x18] sm:$0xff]  ;;  %v1235_v15 = vld [vmem:[#allocation26 + $0x10] sm:$0xff]  ;;  %v1234_v17 = vld [vmem:[#allocation26 + $0x8] sm:$0xff] }
 0x3d1   : > { %v1232_v14 = vld [vmem:[#allocation24 + $0x18] sm:$0xff]  ;;  %1255 = vmatpush.msra.mxu0 %v1236_v13  ;;  %v1231_v16 = vld [vmem:[#allocation24 + $0x10] sm:$0xff]  ;;  %v1230_v18 = vld [vmem:[#allocation24 + $0x8] sm:$0xff] }
 0x3d2   : > { %1284 = vmatpush.msra.mxu1 %v1232_v14  ;;  %v1233_v19 = vld [vmem:[#allocation26] sm:$0xff]  ;;  %v3017_v21 = vld [vmem:[%s3116_s29] sm:$0xff]  ;;  %v1304_v27 = vld [vmem:[#allocation29 + $0x8] sm:$0xff] }
 0x3d3   : > { %1256 = vmatpush.msra.mxu0 %v1235_v15  ;;  %v1229_v20 = vld [vmem:[#allocation24] sm:$0xff]  ;;  %v1227_v22 = vld [vmem:[#allocation4] sm:$0xff]  ;;  %v1343_v42 = vld [vmem:[#allocation32 + $0x8] sm:$0xff] }
 0x3d4   : > { %1285 = vmatpush.msra.mxu1 %v1231_v16  ;;  %v3025_v23 = vld [vmem:[%s3116_s29 + $0x8] sm:$0xff]  ;;  %v1305_v26 = vld [vmem:[#allocation29 + $0x10] sm:$0xff] }
 0x3d5   : > { %1257 = vmatpush.msra.mxu0 %v1234_v17  ;;  %v1228_v24 = vld [vmem:[#allocation4 + $0x8] sm:$0xff]  ;;  %v1344_v41 = vld [vmem:[#allocation32 + $0x10] sm:$0xff] }
 0x3d6   : > { %1286 = vmatpush.msra.mxu1 %v1230_v18  ;;  %v1306_v25 = vld [vmem:[#allocation29 + $0x18] sm:$0xff]  ;;  %v1303_v28 = vld [vmem:[#allocation29] sm:$0xff] }
 0x3d7   : > { %1258 = vmatpush.msra.mxu0 %v1233_v19  ;;  %1329 = vmatpush.msra.mxu2 %v1306_v25  ;;  %v1345_v29 = vld [vmem:[#allocation32 + $0x18] sm:$0xff]  ;;  %v1342_v43 = vld [vmem:[#allocation32] sm:$0xff] }
 0x3d8   : > { %1287 = vmatpush.msra.mxu1 %v1229_v20  ;;  %1740 = vmatmul.msk.f32.vlgmr.msra.gmra.mxu0 %vm1054_vm1, %v3017_v21  ;;  %v1978_v30 = vld [vmem:[#allocation27] ss:$0 sm:$0xff]  ;;  %v1979_v44 = vld [vmem:[#allocation30] ss:$0 sm:$0xff]  ;;  %v1980_v51 = vld [vmem:[#allocation33] ss:$0 sm:$0xff] }
 0x3d9   : > { %1742 = vmatmul.msk.f32.vlgmr.msra.gmra.mxu1 %vm1054_vm1, %v1227_v22  ;;  %1330 = vmatpush.msra.mxu2 %v1305_v26  ;;  %v1981_v19 = vld [vmem:[#allocation35] ss:$0 sm:$0xff] }
 0x3da   : > { %1368 = vmatpush.msra.mxu3 %v1345_v29 }
 0x3db   : > { %1331 = vmatpush.msra.mxu2 %v1304_v27 }
 0x3dc   : > { %1369 = vmatpush.msra.mxu3 %v1344_v41 }
 0x3dd   : > { %1332 = vmatpush.msra.mxu2 %v1303_v28 }
 0x3de   : > { %1370 = vmatpush.msra.mxu3 %v1343_v42 }
 0x3e0   : > { %1741 = vmatmul.msk.f32.gmra.mxu0 %vm1054_vm1, %v3025_v23  ;;  %1371 = vmatpush.msra.mxu3 %v1342_v43 }
 0x3e1   : > { %1743 = vmatmul.msk.f32.gmra.mxu1 %vm1054_vm1, %v1228_v24  ;;  %v1982_v24 = vld [vmem:[#allocation36] ss:$0 sm:$0xff] }
 0x455   : > { %v1260_v31 = vpop.f32.mrf.mxu0 }
 0x456   : > { %v1289_v32 = vpop.f32.mrf.mxu1 }
 0x457   : > { %v1290_v33 = vadd.f32 %v1289_v32, %v1260_v31 }
 0x459   : > { %v1299_v34 = vadd.f32 %v1978_v30, %v1290_v33 }
 0x45b   : > { %v1301_v35 = vmax.f32 %v1299_v34, 0.0 }
 0x45d   : > { %1744 = vmatmul.msk.f32.vlgmr.msra.gmra.mxu2 %vm1054_vm1, %v1301_v35  ;;  %v1263_v36 = vpop.f32.mrf.mxu0 }
 0x45e   : > { %v1292_v37 = vpop.f32.mrf.mxu1 }
 0x45f   : > { %v1293_v38 = vadd.f32 %v1292_v37, %v1263_v36 }
 0x461   : > { %v1300_v39 = vadd.f32 %v1978_v30, %v1293_v38 }
 0x463   : > { %v1302_v40 = vmax.f32 %v1300_v39, 0.0 }
 0x465   : > { %1745 = vmatmul.msk.f32.gmra.mxu2 %vm1054_vm1, %v1302_v40 }
 0x4e0   : > { %v1334_v45 = vpop.f32.mrf.mxu2 }
 0x4e1   : > { %v1335_v46 = vadd.f32 %v1979_v44, %v1334_v45 }
 0x4e3   : > { %v1340_v47 = vmax.f32 %v1335_v46, 0.0 }
 0x4e5   : > { %1746 = vmatmul.msk.f32.vlgmr.msra.gmra.mxu3 %vm1054_vm1, %v1340_v47 }
 0x4e8   : > { %v1337_v48 = vpop.f32.mrf.mxu2 }
 0x4e9   : > { %v1338_v49 = vadd.f32 %v1979_v44, %v1337_v48 }
 0x4eb   : > { %v1341_v50 = vmax.f32 %v1338_v49, 0.0 }
 0x4ed   : > { %1747 = vmatmul.msk.f32.gmra.mxu3 %vm1054_vm1, %v1341_v50 }
 0x568   : > { %v1373_v53 = vpop.f32.mrf.mxu3 }
 0x569   : > { %v1374_v54 = vadd.f32 %v1980_v51, %v1373_v53 }
 0x56b   : > { %v1381_v55 = vsel %vm1054_vm1, %v1374_v54, 0.0 }
 0x56c   : > { %1382 = vadd.xlane.f32.xlu0 %v1381_v55 }
 0x570   : > { %v1376_v56 = vpop.f32.mrf.mxu3 }
 0x571   : > { %v1377_v57 = vadd.f32 %v1980_v51, %v1376_v56 }
 0x573   : > { %v1384_v58 = vsel %vm1054_vm1, %v1377_v57, 0.0 }
 0x574   : > { %1385 = vadd.xlane.f32.xlu0 %v1384_v58 }
 0x5df   : > { %v1383_v59 = vpop.xlane.xlu0 %1382 }
 0x5e0   : > { %v1387_v60 = vmul.f32 %v1383_v59, %v3001_v52 }
 0x5e2   : > { %v1389_v61 = vsub.f32 %v1374_v54, %v1387_v60 }
 0x5e4   : > { %v1391_v62 = vmul.f32 %v1389_v61, %v1389_v61 }
 0x5e6   : > { %v1393_v63 = vsel %vm1054_vm1, %v1391_v62, 0.0 }
 0x5e7   : > { %1394 = vadd.xlane.f32.xlu1 %v1393_v63  ;;  %v1386_v0 = vpop.xlane.xlu0 %1385 }
 0x5e8   : > { %v1388_v1 = vmul.f32 %v1386_v0, %v3001_v52 }
 0x5ea   : > { %v1390_v2 = vsub.f32 %v1377_v57, %v1388_v1 }
 0x5ec   : > { %v1392_v3 = vmul.f32 %v1390_v2, %v1390_v2 }
 0x5ee   : > { %v1396_v4 = vsel %vm1054_vm1, %v1392_v3, 0.0 }
 0x5ef   : > { %1397 = vadd.xlane.f32.xlu1 %v1396_v4 }
 0x65a   : > { %v1395_v5 = vpop.xlane.xlu1 %1394 }
 0x65b   : > { %v1399_v6 = vmul.f32 %v1395_v5, %v3001_v52 }
 0x65d   : > { %v1401_v7 = vadd.f32 1e-05, %v1399_v6 }
 0x65f   : > { %1983 = vrsqrt.f32 %v1401_v7  ;;  %vm1409_vm8 = vweird.f32 %v1401_v7 }
 0x662   : > { %v1398_v8 = vpop.xlane.xlu1 %1397 }
 0x663   : > { %v1400_v9 = vmul.f32 %v1398_v8, %v3001_v52 }
 0x665   : > { %v1984_v10 = vpop.eup %1983  ;;  %v1402_v11 = vadd.f32 1e-05, %v1400_v9 }
 0x666   : > { %v1404_v12 = vmul.f32 %v1984_v10, %v1401_v7  ;;  %vm1410_vm7 = vweird.f32 %v1984_v10 }
 0x667   : > { %1985 = vrsqrt.f32 %v1402_v11  ;;  %vm1411_vm9 = vmor %vm1409_vm8, %vm1410_vm7  ;;  %vm1419_vm11 = vweird.f32 %v1402_v11 }
 0x668   : > { %v1405_v13 = vmul.f32 %v1984_v10, %v1404_v12 }
 0x66a   : > { %v1406_v14 = vmul.f32 0.5, %v1405_v13 }
 0x66c   : > { %v1407_v15 = vsub.f32 1.5, %v1406_v14 }
 0x66d   : > { %v1986_v16 = vpop.eup %1985 }
 0x66e   : > { %v1408_v17 = vmul.f32 %v1984_v10, %v1407_v15  ;;  %v1414_v18 = vmul.f32 %v1986_v16, %v1402_v11  ;;  %vm1420_vm10 = vweird.f32 %v1986_v16 }
 0x66f   : > { %vm1421_vm12 = vmor %vm1419_vm11, %vm1420_vm10 }
 0x670   : > { %v1412_v20 = vsel %vm1411_vm9, %v1984_v10, %v1408_v17  ;;  %v1415_v22 = vmul.f32 %v1986_v16, %v1414_v18 }
 0x671   : > { %v1423_v25 = vmul.f32 %v1412_v20, %v1389_v61 }
 0x672   : > { %v1416_v26 = vmul.f32 0.5, %v1415_v22 }
 0x673   : > { %v1428_v52 = vmul.f32 %v1981_v19, %v1423_v25 }
 0x674   : > { %v1417_v27 = vsub.f32 1.5, %v1416_v26 }
 0x675   : > { %v1433_v28 = vadd.f32 %v1982_v24, %v1428_v52 }
 0x676   : > { %v1418_v29 = vmul.f32 %v1986_v16, %v1417_v27 }
 0x677   : > { %v1435_v30 = vadd.f32 %v1433_v28, %v3017_v21 }
 0x678   : > { %v1422_v31 = vsel %vm1421_vm12, %v1986_v16, %v1418_v29 }
 0x679   : > { %1437 = vst.msk [vmem:[%s3078_s24] sm:$0xff] %vm1054_vm1, %v1435_v30  ;;  %v1424_v32 = vmul.f32 %v1422_v31, %v1390_v2 }
 0x67b   : > { %v1429_v33 = vmul.f32 %v1981_v19, %v1424_v32 }
 0x67d   : > { %v1434_v34 = vadd.f32 %v1982_v24, %v1429_v33 }
 0x67f   : > { %v1436_v35 = vadd.f32 %v1434_v34, %v3025_v23 }
 0x681   : > { %1438 = vst.msk [vmem:[%s3078_s24 + $0x8] sm:$0xff] %vm1054_vm1, %v1436_v35 }
 0x682 PF: > { %s58_s1 = sadd.s32 1, %s2607_s1  }
 0x683   : > { %p55_p11 = scmp.ge.s32.totalorder %s58_s1, 5  }
 0x685   :  { %57 = sbr.rel (!%p55_p11) target bundleno = 36 (0x24), region = 264 }
 0x68a   :  { %1464 = vsyncpa [#allocation11], 1 }
 0x68b   :  { %1466 = vsyncpa [#allocation11 + $0x1], 1 }
 0x68c   :  { %1467 = vsyncpa [#allocation13], 1 }
 0x68d   :  { %1468 = vsyncpa [#allocation16], 1 }
 0x68e   :  { %1469 = vsyncpa [#allocation19], 1 }
 0x68f   :  { %1470 = vsyncpa [#allocation22], 1 }
 0x690   :  { %1471 = vsyncpa [#allocation25], 1 }
 0x691   :  { %1472 = vsyncpa [#allocation28], 1 }
 0x692   :  { %1473 = vsyncpa [#allocation31], 1 }
 0x693   :  { %1474 = vsyncpa [#allocation34], 1 }
 0x694   :  { %1475 = vsyncpa [#allocation37], 1 }

// kernel: fgn_forward.9
= control target key start
LH: loop header
LB: loop body
LE: loop exit
PB: predicated region body
PF: predicated region fallthrough
CT: control target
= control target key end

     0   :  { %s822_s25 = smov 0   ;;  %s935_s0 = inlined_call_operand.vmem [shape: f32[16,32], index: 0, kind: input, shape index: {}]   ;;  %s936_s1 = inlined_call_operand.vmem [shape: f32[32,32], index: 1, kind: input, shape index: {}]   ;;  %s937_s2 = inlined_call_operand.vmem [shape: f32[1,32], index: 2, kind: input, shape index: {}]   ;;  %s938_s3 = inlined_call_operand.vmem [shape: f32[32,32], index: 3, kind: input, shape index: {}]   ;;  %s939_s4 = inlined_call_operand.vmem [shape: f32[1,32], index: 4, kind: input, shape index: {}]   ;;  %s940_s5 = inlined_call_operand.vmem [shape: f32[32,16], index: 5, kind: input, shape index: {}]   ;;  %s941_s6 = inlined_call_operand.vmem [shape: f32[1,16], index: 6, kind: input, shape index: {}]   ;;  %s942_s7 = inlined_call_operand.vmem [shape: f32[16,32], index: 7, kind: input, shape index: {}]   ;;  %s943_s8 = inlined_call_operand.vmem [shape: f32[1,32], index: 8, kind: input, shape index: {}]   ;;  %s944_s9 = inlined_call_operand.vmem [shape: f32[32,32], index: 9, kind: input, shape index: {}]   ;;  %s945_s10 = inlined_call_operand.vmem [shape: f32[1,32], index: 10, kind: input, shape index: {}]   ;;  %s946_s11 = inlined_call_operand.vmem [shape: f32[32,128], index: 11, kind: input, shape index: {}]   ;;  %s947_s12 = inlined_call_operand.vmem [shape: f32[1,128], index: 12, kind: input, shape index: {}]   ;;  %s948_s13 = inlined_call_operand.vmem [shape: f32[16,128], index: 13, kind: output, shape index: {}]  }
   0x1 LB: > { %s707_s26 = sadd.s32 4294967295, %s750_s25   ;;  %p711_p0 = scmp.ge.s32.totalorder %s750_s25, 1  ;;  %s750_s25 = sphi %s822_s25, %s23_s25  }
   0x2   : > { %p386_p1 = scmp.lt.s32.totalorder %s750_s25, 3 }
   0x4   : > { %p387_p2 = pnand %p711_p0, %p386_p1 }
   0x5   : > { %p428_p3 = scmp.lt.s32.totalorder (!%p387_p2), %s707_s26, 1 }
   0x6   : > { %390 = sbr.rel (%p387_p2) target bundleno = 858 (0x35a), region = 72 }
   0xb   : > { %v439_v0 = vld [vmem:[%s936_s1 + $0x18] sm:$0xff]  ;;  %v438_v1 = vld [vmem:[%s936_s1 + $0x10] sm:$0xff]  ;;  %v437_v3 = vld [vmem:[%s936_s1 + $0x8] sm:$0xff]  ;;  %s950_s26 = smov (!%p428_p3, %s707_s26), 1  ;;  %vm468_vm0 = vcmask 261120   ;;  %vm549_vm1 = vcmask 130048  }
   0xc   : > { %484 = vmatpush.msra.mxu0 %v439_v0  ;;  %v444_v2 = vld [vmem:[%s938_s3 + $0x18] sm:$0xff]  ;;  %v436_v4 = vld [vmem:[%s936_s1] sm:$0xff]  ;;  %s712_s20 = sshll.u32 %s950_s26, 3  ;;  %v443_v6 = vld [vmem:[%s938_s3 + $0x10] sm:$0xff] }
   0xd   : > { %511 = vmatpush.msra.mxu1 %v444_v2  ;;  %s431_s23 = scalar_lea.vmem %s935_s0, %s712_s20  ;;  %v442_v7 = vld [vmem:[%s938_s3 + $0x8] sm:$0xff]  ;;  %v441_v8 = vld [vmem:[%s938_s3] sm:$0xff]  ;;  %v449_v9 = vld [vmem:[%s940_s5 + $0x18] sm:$0xff]  ;;  %s435_s15 = scalar_lea.vmem %s948_s13, %s712_s20 }
   0xe   : > { %485 = vmatpush.msra.mxu0 %v438_v1  ;;  %v464_v5 = vld [vmem:[%s431_s23] sm:$0xff]  ;;  %538 = vmatpush.msra.mxu2 %v449_v9  ;;  %v448_v14 = vld [vmem:[%s940_s5 + $0x10] sm:$0xff]  ;;  %v447_v15 = vld [vmem:[%s940_s5 + $0x8] sm:$0xff] }
   0xf   : > { %512 = vmatpush.msra.mxu1 %v443_v6  ;;  %v730_v10 = vld [vmem:[%s937_s2] ss:$0 sm:$0xff]  ;;  %v452_v21 = vld [vmem:[%s942_s7 + $0x8] sm:$0xff]  ;;  %v457_v26 = vld [vmem:[%s944_s9 + $0x18] sm:$0xff] }
  0x10   : > { %486 = vmatpush.msra.mxu0 %v437_v3  ;;  %539 = vmatpush.msra.mxu2 %v448_v14  ;;  %v446_v16 = vld [vmem:[%s940_s5] sm:$0xff]  ;;  %v456_v27 = vld [vmem:[%s944_s9 + $0x10] sm:$0xff]  ;;  %v455_v28 = vld [vmem:[%s944_s9 + $0x8] sm:$0xff] }
  0x11   : > { %513 = vmatpush.msra.mxu1 %v442_v7  ;;  %v731_v17 = vld [vmem:[%s939_s4] ss:$0 sm:$0xff]  ;;  %567 = vmatpush.msra.mxu3 %v452_v21  ;;  %v462_v45 = vld [vmem:[%s946_s11 + $0x18] sm:$0xff]  ;;  %v461_v46 = vld [vmem:[%s946_s11 + $0x10] sm:$0xff] }
  0x12   : > { %487 = vmatpush.msra.mxu0 %v436_v4  ;;  %540 = vmatpush.msra.mxu2 %v447_v15  ;;  %v451_v22 = vld [vmem:[%s942_s7] sm:$0xff]  ;;  %v460_v47 = vld [vmem:[%s946_s11 + $0x8] sm:$0xff] }
  0x13   : > { %714 = vmatmul.msk.f32.vlgmr.msra.gmra.mxu0 %vm468_vm0, %v464_v5  ;;  %514 = vmatpush.msra.mxu1 %v441_v8  ;;  %v732_v23 = vld [vmem:[%s941_s6] ss:$0 sm:$0xff] }
  0x14   : > { %541 = vmatpush.msra.mxu2 %v446_v16  ;;  %568 = vmatpush.msra.mxu3 %v451_v22  ;;  %v454_v29 = vld [vmem:[%s944_s9] sm:$0xff] }
  0x15   : > { %v733_v30 = vld [vmem:[%s943_s8] ss:$0 sm:$0xff]  ;;  %645 = vmatpush.msrb.mxu0 %v462_v45 }
  0x16   : > { %605 = vmatpush.msrb.mxu3 %v457_v26  ;;  %v459_v48 = vld [vmem:[%s946_s11] sm:$0xff] }
  0x17   : > { %646 = vmatpush.msrb.mxu0 %v461_v46  ;;  %v734_v49 = vld [vmem:[%s945_s10] ss:$0 sm:$0xff] }
  0x18   : > { %606 = vmatpush.msrb.mxu3 %v456_v27  ;;  %v735_v0 = vld [vmem:[%s947_s12] ss:$0 sm:$0xff] }
  0x19   : > { %647 = vmatpush.msrb.mxu0 %v460_v47 }
  0x1a   : > { %607 = vmatpush.msrb.mxu3 %v455_v28 }
  0x1b   : > { %648 = vmatpush.msrb.mxu0 %v459_v48 }
  0x1c   : > { %608 = vmatpush.msrb.mxu3 %v454_v29 }
  0x90   : > { %v489_v11 = vpop.f32.mrf.mxu0 }
  0x91   : > { %v490_v12 = vadd.f32 %v730_v10, %v489_v11 }
  0x93   : > { %v492_v13 = vmax.f32 %v490_v12, 0.0 }
  0x95   : > { %715 = vmatmul.msk.f32.vlgmr.msra.gmra.mxu1 %vm468_vm0, %v492_v13 }
 0x112   : > { %v516_v18 = vpop.f32.mrf.mxu1 }
 0x113   : > { %v517_v19 = vadd.f32 %v731_v17, %v516_v18 }
 0x115   : > { %v519_v20 = vmax.f32 %v517_v19, 0.0 }
 0x117   : > { %716 = vmatmul.msk.f32.vlgmr.msra.gmra.mxu2 %vm468_vm0, %v519_v20 }
 0x19a   : > { %v543_v24 = vpop.f32.mrf.mxu2 }
 0x19b   : > { %v544_v25 = vadd.f32 %v732_v23, %v543_v24 }
 0x19d   : > { %717 = vmatmul.msk.f32.vlgmr.msra.gmra.mxu3 %vm549_vm1, %v544_v25 }
 0x220   : > { %v570_v31 = vpop.f32.mrf.mxu3 }
 0x221   : > { %v571_v32 = vadd.f32 %v733_v30, %v570_v31 }
 0x223   : > { %v574_v33 = vmin.f32 %v571_v32, 20.0  ;;  %vm573_vm3 = vcmp.gt.f32.partialorder %v571_v32, 20.0 }
 0x225   : > { %v575_v34 = vmul.f32 1.442695, %v574_v33 }
 0x227   : > { %736 = vpow2.f32 %v575_v34 }
 0x22d   : > { %v737_v35 = vpop.eup %736 }
 0x22e   : > { %v577_v36 = vadd.f32 1.0, %v737_v35  ;;  %v580_v37 = vmul.f32 -0.5, %v737_v35  ;;  %v583_v39 = vand.u32 2147483647, %v737_v35 }
 0x230   : > { %738 = vlog2.f32 %v577_v36  ;;  %v581_v38 = vadd.f32 1.0, %v580_v37  ;;  %vm584_vm2 = vcmp.lt.f32.partialorder %v583_v39, 0.0004427343 }
 0x232   : > { %v582_v42 = vmul.f32 %v737_v35, %v581_v38 }
 0x236   : > { %v739_v40 = vpop.eup %738 }
 0x237   : > { %v579_v41 = vmul.f32 0.6931472, %v739_v40 }
 0x239   : > { %v585_v43 = vsel %vm584_vm2, %v582_v42, %v579_v41 }
 0x23a   : > { %v586_v44 = vsel %vm573_vm3, %v571_v32, %v585_v43 }
 0x23b   : > { %718 = vmatmul.msk.f32.vlgmr.msrb.gmra.mxu3 %vm468_vm0, %v586_v44 }
 0x2be   : > { %v610_v50 = vpop.f32.mrf.mxu3 }
 0x2bf   : > { %v611_v51 = vadd.f32 %v734_v49, %v610_v50 }
 0x2c1   : > { %v614_v52 = vmin.f32 %v611_v51, 20.0  ;;  %vm613_vm5 = vcmp.gt.f32.partialorder %v611_v51, 20.0 }
 0x2c3   : > { %v615_v53 = vmul.f32 1.442695, %v614_v52 }
 0x2c5   : > { %740 = vpow2.f32 %v615_v53 }
 0x2cb   : > { %v741_v54 = vpop.eup %740 }
 0x2cc   : > { %v617_v55 = vadd.f32 1.0, %v741_v54  ;;  %v620_v56 = vmul.f32 -0.5, %v741_v54  ;;  %v623_v58 = vand.u32 2147483647, %v741_v54 }
 0x2ce   : > { %742 = vlog2.f32 %v617_v55  ;;  %v621_v57 = vadd.f32 1.0, %v620_v56  ;;  %vm624_vm4 = vcmp.lt.f32.partialorder %v623_v58, 0.0004427343 }
 0x2d0   : > { %v622_v61 = vmul.f32 %v741_v54, %v621_v57 }
 0x2d4   : > { %v743_v59 = vpop.eup %742 }
 0x2d5   : > { %v619_v60 = vmul.f32 0.6931472, %v743_v59 }
 0x2d7   : > { %v625_v62 = vsel %vm624_vm4, %v622_v61, %v619_v60 }
 0x2d8   : > { %v626_v63 = vsel %vm613_vm5, %v611_v51, %v625_v62 }
 0x2d9   : > { %719 = vmatmul.msk.f32.vlgmr.msrb.gmra.mxu0 %vm468_vm0, %v626_v63 }
 0x356   : > { %v650_v1 = vpop.f32.mrf.mxu0 }
 0x357   : > { %v651_v2 = vadd.f32 %v735_v0, %v650_v1 }
 0x359   : > { %653 = vst [vmem:[%s435_s15] sm:$0xff] %v651_v2 }
 0x35a PF: > { %s23_s25 = sadd.s32 1, %s750_s25  }
 0x35b   : > { %p20_p4 = scmp.ge.s32.totalorder %s23_s25, 4  }
 0x35d   :  { %22 = sbr.rel (!%p20_p4) target bundleno = 1 (0x1), region = 102 }

</bundles_post_ra>
